<compile_context>
chip_gen: v5e
topology: v5e:2x2
jax: 0.10.0
libtpu: 0.0.40
codegen_flags: <defaults>
</compile_context>

<pallas_src>
import functools
import math

import numpy as np

import jax
import jax.numpy as jnp
from jax import lax
from jax.experimental import pallas as pl
from jax.experimental.pallas import tpu as pltpu

EPS_SNN_BN = 1e-4   # bntt / resize-path BatchNorm eps (eps=0.0001 in the module)
EPS_DEC_BN = 1e-5   # decoder nn.BatchNorm1d default eps

ACT_DTYPE = jnp.bfloat16     # inter-layer activation storage dtype


def _vmem_limit_bytes():
    # Generation-aware VMEM budget (v7x has 64 MiB/TC, v5e/v6e have 128 MiB).
    try:
        cap = int(pltpu.get_tpu_info().vmem_capacity_bytes)
        return min((cap * 3) // 4, 100 * 1024 * 1024)
    except Exception:
        return 48 * 1024 * 1024


_COMPILER_PARAMS = pltpu.CompilerParams(
    dimension_semantics=("parallel",),          # output-channel-block grid axis
    vmem_limit_bytes=_vmem_limit_bytes(),
)


# ---------------------------------------------------------------------------
# In-kernel helper: 3-tap shifts on the flattened time axis with zeros at
# per-batch segment boundaries (one shared (1, N) iota mask).
# ---------------------------------------------------------------------------

def _taps(x, l_seg):
    """x: (C, N) f32, time flattened batch-major on lanes, segment length l_seg.
    Returns (x[t-1], x[t+1]) with zeros across segment boundaries."""
    _, n = x.shape
    t = lax.broadcasted_iota(jnp.int32, (1, n), 1) % l_seg
    xm = jnp.where(t == 0, 0.0, pltpu.roll(x, shift=1, axis=1))
    xp = jnp.where(t == l_seg - 1, 0.0, pltpu.roll(x, shift=n - 1, axis=1))
    return xm, xp


# ---------------------------------------------------------------------------
# Fused per-layer kernels (one pallas_call per layer)
# ---------------------------------------------------------------------------

def _layer_s1_kernel(x_ref, w0_ref, w1_ref, w2_ref, g_ref, b_ref, o_ref,
                     *, l_seg, has_skip, eps):
    """Conv1d(k=3,s=1,p=1) -> train-mode BatchNorm -> (identity-skip avg) -> ReLU.
    Grid axis = output-channel block; x_ref holds the full (Cin, N) slab."""
    x = x_ref[...].astype(jnp.float32)
    xm, xp = _taps(x, l_seg)
    w0 = w0_ref[...]
    w1 = w1_ref[...]
    w2 = w2_ref[...]
    if x_ref.shape[0] == 1:
        # Cin == 1 (first layer): outer-product broadcast on the VPU instead of
        # a degenerate K=1 MXU matmul.
        y = w0 * xm + w1 * x + w2 * xp
    else:
        # three accumulating dots -> no (3*Cin, N) sublane-concat copy in VMEM
        y = (jnp.dot(w0, xm, preferred_element_type=jnp.float32)
             + jnp.dot(w1, x, preferred_element_type=jnp.float32)
             + jnp.dot(w2, xp, preferred_element_type=jnp.float32))
    # train-mode batch statistics over the whole flattened B*L slab
    mean = jnp.mean(y, axis=1, keepdims=True)
    var = jnp.mean(jnp.square(y - mean), axis=1, keepdims=True)
    scale = g_ref[...] * lax.rsqrt(var + eps)
    out = (y - mean) * scale + b_ref[...]
    if has_skip:
        # identity skip == this layer's input (Cin == Cout here); take the
        # channel block matching this grid step.
        cblk = o_ref.shape[0]
        start = pl.multiple_of(pl.program_id(0) * cblk, 8)
        skip = x_ref[pl.ds(start, cblk), :].astype(jnp.float32)
        out = (out + skip) * 0.5
    o_ref[...] = jnp.maximum(out, 0.0).astype(o_ref.dtype)


def _layer_s2_kernel(xe_ref, xo_ref, w0_ref, w1_ref, w2_ref, wr_ref,
                     g_ref, b_ref, gr_ref, br_ref, o_ref, *, l_out, eps):
    """Conv1d(k=3,s=2,p=1) fused with the 1x1/stride-2 skip-resize conv, both
    train-mode BatchNorms, the skip average, and ReLU.
    xe = x[2t], xo = x[2t+1] (pre-split in the wrapper)."""
    xe = xe_ref[...].astype(jnp.float32)
    xo = xo_ref[...].astype(jnp.float32)
    n = xe.shape[1]
    t = lax.broadcasted_iota(jnp.int32, (1, n), 1) % l_out
    xm = jnp.where(t == 0, 0.0, pltpu.roll(xo, shift=1, axis=1))       # x[2t-1]
    y = (jnp.dot(w0_ref[...], xm, preferred_element_type=jnp.float32)
         + jnp.dot(w1_ref[...], xe, preferred_element_type=jnp.float32)
         + jnp.dot(w2_ref[...], xo, preferred_element_type=jnp.float32))
    r = jnp.dot(wr_ref[...], xe, preferred_element_type=jnp.float32)   # resize
    my = jnp.mean(y, axis=1, keepdims=True)
    vy = jnp.mean(jnp.square(y - my), axis=1, keepdims=True)
    mr = jnp.mean(r, axis=1, keepdims=True)
    vr = jnp.mean(jnp.square(r - mr), axis=1, keepdims=True)
    yn = (y - my) * (g_ref[...] * lax.rsqrt(vy + eps)) + b_ref[...]
    rn = (r - mr) * (gr_ref[...] * lax.rsqrt(vr + eps)) + br_ref[...]
    o_ref[...] = jnp.maximum((yn + rn) * 0.5, 0.0).astype(o_ref.dtype)


def _decoder_kernel(x_ref, w1_ref, w3_ref, w2_ref, w0_ref, g_ref, b_ref,
                    he_ref, ho_ref, *, l_seg, eps):
    """ConvTranspose1d(k=4,s=2,p=1) -> train-mode BatchNorm -> ReLU, fused.
    Emits the even/odd output phases as two lane-dense slabs."""
    x = x_ref[...].astype(jnp.float32)
    xm, xp = _taps(x, l_seg)
    # y[2t]   = W1.x[t] + W3.x[t-1];   y[2t+1] = W2.x[t] + W0.x[t+1]
    ye = (jnp.dot(w1_ref[...], x, preferred_element_type=jnp.float32)
          + jnp.dot(w3_ref[...], xm, preferred_element_type=jnp.float32))
    yo = (jnp.dot(w2_ref[...], x, preferred_element_type=jnp.float32)
          + jnp.dot(w0_ref[...], xp, preferred_element_type=jnp.float32))
    n = x.shape[1]
    mean = (jnp.sum(ye, axis=1, keepdims=True)
            + jnp.sum(yo, axis=1, keepdims=True)) / (2.0 * n)
    var = (jnp.sum(jnp.square(ye - mean), axis=1, keepdims=True)
           + jnp.sum(jnp.square(yo - mean), axis=1, keepdims=True)) / (2.0 * n)
    scale = g_ref[...] * lax.rsqrt(var + eps)
    shift = b_ref[...] - mean * scale
    he_ref[...] = jnp.maximum(ye * scale + shift, 0.0).astype(he_ref.dtype)
    ho_ref[...] = jnp.maximum(yo * scale + shift, 0.0).astype(ho_ref.dtype)


def _decoder_final_kernel(x_ref, w1_ref, w3_ref, w2_ref, w0_ref, g_ref, b_ref,
                          wf_ref, fe_ref, fo_ref, *, l_seg, eps):
    """Last ConvTranspose stage -> BN -> ReLU -> final 1x1 conv, fully fused so
    the (nFilters, B*L) decoder output never touches HBM."""
    x = x_ref[...].astype(jnp.float32)
    xm, xp = _taps(x, l_seg)
    ye = (jnp.dot(w1_ref[...], x, preferred_element_type=jnp.float32)
          + jnp.dot(w3_ref[...], xm, preferred_element_type=jnp.float32))
    yo = (jnp.dot(w2_ref[...], x, preferred_element_type=jnp.float32)
          + jnp.dot(w0_ref[...], xp, preferred_element_type=jnp.float32))
    n = x.shape[1]
    mean = (jnp.sum(ye, axis=1, keepdims=True)
            + jnp.sum(yo, axis=1, keepdims=True)) / (2.0 * n)
    var = (jnp.sum(jnp.square(ye - mean), axis=1, keepdims=True)
           + jnp.sum(jnp.square(yo - mean), axis=1, keepdims=True)) / (2.0 * n)
    scale = g_ref[...] * lax.rsqrt(var + eps)
    shift = b_ref[...] - mean * scale
    he = jnp.maximum(ye * scale + shift, 0.0)
    ho = jnp.maximum(yo * scale + shift, 0.0)
    wf = wf_ref[...]                                   # (Cout, 1)
    fe_ref[...] = jnp.sum(wf * he, axis=0, keepdims=True)
    fo_ref[...] = jnp.sum(wf * ho, axis=0, keepdims=True)


# ---------------------------------------------------------------------------
# pallas_call wrappers
# ---------------------------------------------------------------------------

def _full_spec(shape):
    nd = len(shape)
    return pl.BlockSpec(tuple(shape), lambda c: (0,) * nd)


def _cblk_spec(shape, nblk):
    """Block an array along its leading (channel) axis into `nblk` blocks."""
    blk = (shape[0] // nblk,) + tuple(shape[1:])
    nd = len(shape)
    return pl.BlockSpec(blk, lambda c: (c,) + (0,) * (nd - 1))


def _num_cblocks(cout):
    # extent-2 parallel axis (keeps both v7x TensorCores busy) when the channel
    # block still satisfies the 8-sublane divisibility constraint.
    return 2 if cout % 16 == 0 else 1


def layer_s1(x, w0, w1, w2, gamma, beta, *, l_seg, has_skip, eps=EPS_SNN_BN):
    cin, n = x.shape
    cout = w0.shape[0]
    nblk = _num_cblocks(cout)
    return pl.pallas_call(
        functools.partial(_layer_s1_kernel, l_seg=l_seg, has_skip=has_skip, eps=eps),
        grid=(nblk,),
        in_specs=[_full_spec(x.shape),
                  _cblk_spec(w0.shape, nblk), _cblk_spec(w1.shape, nblk),
                  _cblk_spec(w2.shape, nblk),
                  _cblk_spec(gamma.shape, nblk), _cblk_spec(beta.shape, nblk)],
        out_specs=_cblk_spec((cout, n), nblk),
        out_shape=jax.ShapeDtypeStruct((cout, n), ACT_DTYPE),
        compiler_params=_COMPILER_PARAMS,
        cost_estimate=pl.CostEstimate(
            flops=int(2 * cout * 3 * cin * n + 12 * cout * n),
            transcendentals=int(cout),
            bytes_accessed=int(x.dtype.itemsize * cin * n + 2 * cout * n)),
    )(x, w0, w1, w2, gamma, beta)


def layer_s2(x, w0, w1, w2, wr, gamma, beta, gr, br, *, l_seg_in, eps=EPS_SNN_BN):
    cin, n = x.shape
    cout = w0.shape[0]
    l_out = l_seg_in // 2
    nout = n // 2
    # TODO(synk): de-interleave in-kernel (strided lane reads) instead of these
    #             XLA slices to save one activation read+write at the 2 strided layers.
    xe = x[:, 0::2]
    xo = x[:, 1::2]
    nblk = _num_cblocks(cout)
    return pl.pallas_call(
        functools.partial(_layer_s2_kernel, l_out=l_out, eps=eps),
        grid=(nblk,),
        in_specs=[_full_spec(xe.shape), _full_spec(xo.shape),
                  _cblk_spec(w0.shape, nblk), _cblk_spec(w1.shape, nblk),
                  _cblk_spec(w2.shape, nblk), _cblk_spec(wr.shape, nblk),
                  _cblk_spec(gamma.shape, nblk), _cblk_spec(beta.shape, nblk),
                  _cblk_spec(gr.shape, nblk), _cblk_spec(br.shape, nblk)],
        out_specs=_cblk_spec((cout, nout), nblk),
        out_shape=jax.ShapeDtypeStruct((cout, nout), ACT_DTYPE),
        compiler_params=_COMPILER_PARAMS,
        cost_estimate=pl.CostEstimate(
            flops=int(2 * cout * 4 * cin * nout + 20 * cout * nout),
            transcendentals=int(2 * cout),
            bytes_accessed=int(2 * 2 * cin * nout + 2 * cout * nout)),
    )(xe, xo, w0, w1, w2, wr, gamma, beta, gr, br)


def decoder_stage(x, w1, w3, w2, w0, gamma, beta, *, l_seg, eps=EPS_DEC_BN):
    cin, n = x.shape
    cout = w1.shape[0]
    nblk = _num_cblocks(cout)
    he, ho = pl.pallas_call(
        functools.partial(_decoder_kernel, l_seg=l_seg, eps=eps),
        grid=(nblk,),
        in_specs=[_full_spec(x.shape),
                  _cblk_spec(w1.shape, nblk), _cblk_spec(w3.shape, nblk),
                  _cblk_spec(w2.shape, nblk), _cblk_spec(w0.shape, nblk),
                  _cblk_spec(gamma.shape, nblk), _cblk_spec(beta.shape, nblk)],
        out_specs=[_cblk_spec((cout, n), nblk), _cblk_spec((cout, n), nblk)],
        out_shape=[jax.ShapeDtypeStruct((cout, n), ACT_DTYPE),
                   jax.ShapeDtypeStruct((cout, n), ACT_DTYPE)],
        compiler_params=_COMPILER_PARAMS,
        cost_estimate=pl.CostEstimate(
            flops=int(2 * cout * 4 * cin * n + 24 * cout * n),
            transcendentals=int(cout),
            bytes_accessed=int(2 * cin * n + 2 * 2 * cout * n)),
    )(x, w1, w3, w2, w0, gamma, beta)
    return he, ho


def decoder_final(x, w1, w3, w2, w0, gamma, beta, wf, *, l_seg, eps=EPS_DEC_BN):
    cin, n = x.shape
    cout = w1.shape[0]
    fe, fo = pl.pallas_call(
        functools.partial(_decoder_final_kernel, l_seg=l_seg, eps=eps),
        grid=(1,),
        in_specs=[_full_spec(x.shape),
                  _full_spec(w1.shape), _full_spec(w3.shape),
                  _full_spec(w2.shape), _full_spec(w0.shape),
                  _full_spec(gamma.shape), _full_spec(beta.shape),
                  _full_spec(wf.shape)],
        out_specs=[_full_spec((1, n)), _full_spec((1, n))],
        out_shape=[jax.ShapeDtypeStruct((1, n), jnp.float32),
                   jax.ShapeDtypeStruct((1, n), jnp.float32)],
        compiler_params=_COMPILER_PARAMS,
        cost_estimate=pl.CostEstimate(
            flops=int(2 * cout * 4 * cin * n + 4 * cout * n + 24 * cout * n),
            transcendentals=int(cout),
            bytes_accessed=int(2 * cin * n + 4 * 2 * n)),
    )(x, w1, w3, w2, w0, gamma, beta, wf)
    return fe, fo


# ---------------------------------------------------------------------------
# Deterministic parameter construction (mirrors SResnet1D.__init__ shapes)
# ---------------------------------------------------------------------------

def _xavier_uniform(key, shape, fan_in, fan_out, gain):
    bound = gain * math.sqrt(6.0 / (fan_in + fan_out))
    return jax.random.uniform(key, shape, jnp.float32, -bound, bound)


def _spectral_normalize(w, dim=0):
    # TODO(synk): PyTorch spectral_norm uses 1-step power iteration with a
    #             random u; we use the exact top singular value (its fixed point).
    wn = np.asarray(w)
    if dim != 0:
        wn = np.moveaxis(wn, dim, 0)
    sigma = np.linalg.svd(wn.reshape(wn.shape[0], -1), compute_uv=False)[0]
    return jnp.asarray(np.asarray(w) / sigma)


def init_params(key, n=1, n_filters=8):
    keys = iter(jax.random.split(key, 64))
    params = {'convs': [], 'resize': [], 'decoder': []}

    def make_conv3(cin, cout, stride):
        w = _xavier_uniform(next(keys), (cout, cin, 3), cin * 3, cout * 3, gain=2.0)
        w = _spectral_normalize(w, dim=0)
        return {'w0': w[:, :, 0], 'w1': w[:, :, 1], 'w2': w[:, :, 2],
                'gamma': jnp.ones((cout, 1), jnp.float32),
                'beta': jnp.zeros((cout, 1), jnp.float32),
                'stride': stride, 'cin': cin, 'cout': cout}

    params['convs'].append(make_conv3(1, n_filters, 1))            # conv1
    for block in range(3):
        for layer in range(2 * n):
            if block != 0 and layer == 0:
                stride, cin = 2, n_filters * 2 ** (block - 1)
            else:
                stride, cin = 1, n_filters * 2 ** block
            params['convs'].append(make_conv3(cin, n_filters * 2 ** block, stride))

    def make_conv1x1(cin, cout):
        w = _xavier_uniform(next(keys), (cout, cin, 1), cin, cout, gain=2.0)
        w = _spectral_normalize(w, dim=0)
        return {'w': w[:, :, 0],                                    # (Cout, Cin)
                'gamma': jnp.ones((cout, 1), jnp.float32),
                'beta': jnp.zeros((cout, 1), jnp.float32)}

    params['resize'].append(make_conv1x1(n_filters, n_filters * 2))
    params['resize'].append(make_conv1x1(n_filters * 2, n_filters * 4))

    def make_convT(cin, cout):
        bound = 1.0 / math.sqrt(cin * 4)
        w = jax.random.uniform(next(keys), (cin, cout, 4), jnp.float32, -bound, bound)
        w = _spectral_normalize(w, dim=1)   # spectral_norm uses dim=1 for ConvTranspose
        wt = jnp.transpose(w, (1, 0, 2))                            # (Cout, Cin, 4)
        return {'w0': wt[:, :, 0], 'w1': wt[:, :, 1],
                'w2': wt[:, :, 2], 'w3': wt[:, :, 3],
                'gamma': jnp.ones((cout, 1), jnp.float32),
                'beta': jnp.zeros((cout, 1), jnp.float32)}

    params['decoder'].append(make_convT(n_filters * 4, n_filters * 2))
    params['decoder'].append(make_convT(n_filters * 2, n_filters))

    w = _xavier_uniform(next(keys), (1, n_filters, 1), n_filters, 1, gain=2.0)
    w = _spectral_normalize(w, dim=0)
    params['final_w'] = w[0, :, 0].reshape(n_filters, 1)            # (nF, 1)
    return params


# ---------------------------------------------------------------------------
# Forward pass (mirrors SResnet1D.forward; `t` is unused by the module too)
# ---------------------------------------------------------------------------

def sresnet1d_forward(params, inp, t=None):
    del t  # unused by the PyTorch forward as well
    if inp.ndim == 2:
        inp = inp[:, None, :]                              # (B, 1, L)
    b, _, l = inp.shape
    # flatten to the (C, B*L) slab layout (free metadata reshape)
    x = inp.reshape(1, b * l).astype(jnp.float32)
    l_seg = l

    idx1x1 = 0
    for i, cv in enumerate(params['convs']):
        if cv['stride'] == 1:
            x = layer_s1(x, cv['w0'], cv['w1'], cv['w2'], cv['gamma'], cv['beta'],
                         l_seg=l_seg, has_skip=(i > 0))
        else:
            rz = params['resize'][idx1x1]
            idx1x1 += 1
            x = layer_s2(x, cv['w0'], cv['w1'], cv['w2'], rz['w'],
                         cv['gamma'], cv['beta'], rz['gamma'], rz['beta'],
                         l_seg_in=l_seg)
            l_seg //= 2

    # decoder stage 1: ConvTranspose1d -> BN -> ReLU (fused); interleave the
    # even/odd phases with a cheap XLA stack+reshape.
    d1 = params['decoder'][0]
    he, ho = decoder_stage(x, d1['w1'], d1['w3'], d1['w2'], d1['w0'],
                           d1['gamma'], d1['beta'], l_seg=l_seg)
    c1, n1 = he.shape
    x = jnp.stack([he, ho], axis=-1).reshape(c1, 2 * n1)
    l_seg *= 2

    # decoder stage 2 + final 1x1 conv, fully fused
    d2 = params['decoder'][1]
    fe, fo = decoder_final(x, d2['w1'], d2['w3'], d2['w2'], d2['w0'],
                           d2['gamma'], d2['beta'], params['final_w'],
                           l_seg=l_seg)
    n2 = fe.shape[1]
    out = jnp.stack([fe, fo], axis=-1).reshape(1, 2 * n2)
    return out.reshape(b, 1, l)                            # (B, 1, L) like PyTorch


if __name__ == "__main__":
    key = jax.random.PRNGKey(0)
    pkey, xkey = jax.random.split(key)

    n = 1              # small (module default n=6)
    n_filters = 8      # small (module default nFilters=32)
    batch, seq_len = 2, 512   # seq stays a multiple of 128 at every resolution

    params = init_params(pkey, n=n, n_filters=n_filters)
    x = jax.random.normal(xkey, (batch, seq_len), jnp.float32)   # audio (B, L)
    t = jnp.zeros((batch,), jnp.int32)                           # diffusion step (unused)

    run = jax.jit(lambda inp, tt: sresnet1d_forward(params, inp, tt))
    out = run(x, t)
    out = jax.block_until_ready(out)
    assert out.shape == (batch, 1, seq_len), out.shape
    assert bool(jnp.all(jnp.isfinite(out)))
    print("KERNEL_OK")
</pallas_src>

<mosaic_0001>
module attributes {stable_mosaic.version = 11 : i64} {
  func.func @_layer_s1_kernel(%arg0: i32, %arg1: memref<1x1024xf32, #tpu.memory_space<vmem>>, %arg2: memref<8x1xf32, #tpu.memory_space<vmem>>, %arg3: memref<8x1xf32, #tpu.memory_space<vmem>>, %arg4: memref<8x1xf32, #tpu.memory_space<vmem>>, %arg5: memref<8x1xf32, #tpu.memory_space<vmem>>, %arg6: memref<8x1xf32, #tpu.memory_space<vmem>>, %arg7: memref<8x1024xbf16, #tpu.memory_space<vmem>>) attributes {dimension_semantics = [#tpu.dimension_semantics<parallel>], iteration_bounds = array<i64: 1>, scalar_prefetch = 0 : i64, scratch_operands = 0 : i64, tpu.core_type = #tpu.core_type<tc>, window_params = [{pipeline_mode = #tpu.pipeline_mode<synchronous>, transform_indices = @transform_0, window_bounds = array<i64: 1, 1024>}, {transform_indices = @transform_1, window_bounds = array<i64: 8, 1>}, {transform_indices = @transform_2, window_bounds = array<i64: 8, 1>}, {transform_indices = @transform_3, window_bounds = array<i64: 8, 1>}, {transform_indices = @transform_4, window_bounds = array<i64: 8, 1>}, {transform_indices = @transform_5, window_bounds = array<i64: 8, 1>}, {transform_indices = @transform_6, window_bounds = array<i64: 8, 1024>}]} {
    %c0 = arith.constant 0 : index
    %c0_0 = arith.constant 0 : index
    %0 = vector.load %arg1[%c0, %c0_0] : memref<1x1024xf32, #tpu.memory_space<vmem>>, vector<1x1024xf32>
    %1 = tpu.iota {dimensions = array<i32: 1>} : vector<1x1024xi32>
    %c512_i32 = arith.constant 512 : i32
    %c0_i32 = arith.constant 0 : i32
    %2 = arith.cmpi eq, %c512_i32, %c0_i32 : i32
    %c1_i32 = arith.constant 1 : i32
    %3 = arith.select %2, %c1_i32, %c512_i32 : i32
    %4 = vector.broadcast %3 : i32 to vector<1x1024xi32>
    %5 = arith.remsi %1, %4 : vector<1x1024xi32>
    %c0_i32_1 = arith.constant 0 : i32
    %6 = vector.broadcast %c0_i32_1 : i32 to vector<1x1024xi32>
    %7 = arith.cmpi ne, %5, %6 : vector<1x1024xi32>
    %c0_i32_2 = arith.constant 0 : i32
    %8 = vector.broadcast %c0_i32_2 : i32 to vector<1x1024xi32>
    %9 = arith.cmpi slt, %5, %8 : vector<1x1024xi32>
    %c0_i32_3 = arith.constant 0 : i32
    %10 = arith.cmpi slt, %3, %c0_i32_3 : i32
    %11 = vector.broadcast %10 : i1 to vector<1x1024xi1>
    %12 = vector.broadcast %11 : vector<1x1024xi1> to vector<1x1024xi1>
    %13 = arith.xori %9, %12 : vector<1x1024xi1>
    %14 = arith.andi %13, %7 : vector<1x1024xi1>
    %15 = vector.broadcast %3 : i32 to vector<1x1024xi32>
    %16 = arith.addi %5, %15 : vector<1x1024xi32>
    %17 = arith.select %14, %16, %5 : vector<1x1024xi1>, vector<1x1024xi32>
    %c0_i32_4 = arith.constant 0 : i32
    %18 = vector.broadcast %c0_i32_4 : i32 to vector<1x1024xi32>
    %19 = arith.cmpi eq, %17, %18 : vector<1x1024xi32>
    %c1_i32_5 = arith.constant 1 : i32
    %20 = tpu.dynamic_rotate %0 by %c1_i32_5 dim 1 : vector<1x1024xf32>, i32 -> vector<1x1024xf32>
    %cst = arith.constant 0.000000e+00 : f32
    %21 = vector.broadcast %cst : f32 to vector<1x1024xf32>
    %22 = arith.select %19, %21, %20 : vector<1x1024xi1>, vector<1x1024xf32>
    %c511_i32 = arith.constant 511 : i32
    %23 = vector.broadcast %c511_i32 : i32 to vector<1x1024xi32>
    %24 = arith.cmpi eq, %17, %23 : vector<1x1024xi32>
    %c1023_i32 = arith.constant 1023 : i32
    %25 = tpu.dynamic_rotate %0 by %c1023_i32 dim 1 : vector<1x1024xf32>, i32 -> vector<1x1024xf32>
    %cst_6 = arith.constant 0.000000e+00 : f32
    %26 = vector.broadcast %cst_6 : f32 to vector<1x1024xf32>
    %27 = arith.select %24, %26, %25 : vector<1x1024xi1>, vector<1x1024xf32>
    %c0_7 = arith.constant 0 : index
    %c0_8 = arith.constant 0 : index
    %28 = vector.load %arg2[%c0_7, %c0_8] : memref<8x1xf32, #tpu.memory_space<vmem>>, vector<8x1xf32>
    %c0_9 = arith.constant 0 : index
    %c0_10 = arith.constant 0 : index
    %29 = vector.load %arg3[%c0_9, %c0_10] : memref<8x1xf32, #tpu.memory_space<vmem>>, vector<8x1xf32>
    %c0_11 = arith.constant 0 : index
    %c0_12 = arith.constant 0 : index
    %30 = vector.load %arg4[%c0_11, %c0_12] : memref<8x1xf32, #tpu.memory_space<vmem>>, vector<8x1xf32>
    %31 = vector.broadcast %28 : vector<8x1xf32> to vector<8x1024xf32>
    %32 = vector.broadcast %22 : vector<1x1024xf32> to vector<8x1024xf32>
    %33 = arith.mulf %31, %32 : vector<8x1024xf32>
    %34 = vector.broadcast %29 : vector<8x1xf32> to vector<8x1024xf32>
    %35 = vector.broadcast %0 : vector<1x1024xf32> to vector<8x1024xf32>
    %36 = arith.mulf %34, %35 : vector<8x1024xf32>
    %37 = arith.addf %33, %36 : vector<8x1024xf32>
    %38 = vector.broadcast %30 : vector<8x1xf32> to vector<8x1024xf32>
    %39 = vector.broadcast %27 : vector<1x1024xf32> to vector<8x1024xf32>
    %40 = arith.mulf %38, %39 : vector<8x1024xf32>
    %41 = arith.addf %37, %40 : vector<8x1024xf32>
    %cst_13 = arith.constant dense<0.000000e+00> : vector<8xf32>
    %42 = vector.multi_reduction <add>, %41, %cst_13 [1] : vector<8x1024xf32> to vector<8xf32>
    %43 = vector.shape_cast %42 : vector<8xf32> to vector<8x1xf32>
    %cst_14 = arith.constant 1.024000e+03 : f32
    %44 = vector.broadcast %cst_14 : f32 to vector<8x1xf32>
    %45 = arith.divf %43, %44 : vector<8x1xf32>
    %46 = vector.broadcast %45 : vector<8x1xf32> to vector<8x1024xf32>
    %47 = arith.subf %41, %46 : vector<8x1024xf32>
    %48 = arith.mulf %47, %47 : vector<8x1024xf32>
    %cst_15 = arith.constant dense<0.000000e+00> : vector<8xf32>
    %49 = vector.multi_reduction <add>, %48, %cst_15 [1] : vector<8x1024xf32> to vector<8xf32>
    %50 = vector.shape_cast %49 : vector<8xf32> to vector<8x1xf32>
    %cst_16 = arith.constant 1.024000e+03 : f32
    %51 = vector.broadcast %cst_16 : f32 to vector<8x1xf32>
    %52 = arith.divf %50, %51 : vector<8x1xf32>
    %c0_17 = arith.constant 0 : index
    %c0_18 = arith.constant 0 : index
    %53 = vector.load %arg5[%c0_17, %c0_18] : memref<8x1xf32, #tpu.memory_space<vmem>>, vector<8x1xf32>
    %cst_19 = arith.constant 9.99999974E-5 : f32
    %54 = vector.broadcast %cst_19 : f32 to vector<8x1xf32>
    %55 = arith.addf %52, %54 : vector<8x1xf32>
    %56 = math.rsqrt %55 : vector<8x1xf32>
    %57 = arith.mulf %53, %56 : vector<8x1xf32>
    %58 = vector.broadcast %45 : vector<8x1xf32> to vector<8x1024xf32>
    %59 = arith.subf %41, %58 : vector<8x1024xf32>
    %60 = vector.broadcast %57 : vector<8x1xf32> to vector<8x1024xf32>
    %61 = arith.mulf %59, %60 : vector<8x1024xf32>
    %c0_20 = arith.constant 0 : index
    %c0_21 = arith.constant 0 : index
    %62 = vector.load %arg6[%c0_20, %c0_21] : memref<8x1xf32, #tpu.memory_space<vmem>>, vector<8x1xf32>
    %63 = vector.broadcast %62 : vector<8x1xf32> to vector<8x1024xf32>
    %64 = arith.addf %61, %63 : vector<8x1024xf32>
    %cst_22 = arith.constant 0.000000e+00 : f32
    %65 = vector.broadcast %cst_22 : f32 to vector<8x1024xf32>
    %66 = arith.maximumf %64, %65 : vector<8x1024xf32>
    %67 = arith.truncf %66 : vector<8x1024xf32> to vector<8x1024xbf16>
    %c0_23 = arith.constant 0 : index
    %c0_24 = arith.constant 0 : index
    %68 = vector.load %arg7[%c0_23, %c0_24] : memref<8x1024xbf16, #tpu.memory_space<vmem>>, vector<8x1024xbf16>
    tpu.vector_store %arg7[%c0_23, %c0_24], %67 {strides = array<i32>} : memref<8x1024xbf16, #tpu.memory_space<vmem>>, vector<8x1024xbf16>,
    return
  }
  func.func @transform_0(%arg0: i32) -> (i32, i32) {
    %c0_i32 = arith.constant 0 : i32
    %c0_i32_0 = arith.constant 0 : i32
    %c0_i32_1 = arith.constant 0 : i32
    return %c0_i32, %c0_i32_0 : i32, i32
  }
  func.func @transform_1(%arg0: i32) -> (i32, i32) {
    %c0_i32 = arith.constant 0 : i32
    %c0_i32_0 = arith.constant 0 : i32
    return %arg0, %c0_i32 : i32, i32
  }
  func.func @transform_2(%arg0: i32) -> (i32, i32) {
    %c0_i32 = arith.constant 0 : i32
    %c0_i32_0 = arith.constant 0 : i32
    return %arg0, %c0_i32 : i32, i32
  }
  func.func @transform_3(%arg0: i32) -> (i32, i32) {
    %c0_i32 = arith.constant 0 : i32
    %c0_i32_0 = arith.constant 0 : i32
    return %arg0, %c0_i32 : i32, i32
  }
  func.func @transform_4(%arg0: i32) -> (i32, i32) {
    %c0_i32 = arith.constant 0 : i32
    %c0_i32_0 = arith.constant 0 : i32
    return %arg0, %c0_i32 : i32, i32
  }
  func.func @transform_5(%arg0: i32) -> (i32, i32) {
    %c0_i32 = arith.constant 0 : i32
    %c0_i32_0 = arith.constant 0 : i32
    return %arg0, %c0_i32 : i32, i32
  }
  func.func @transform_6(%arg0: i32) -> (i32, i32) {
    %c0_i32 = arith.constant 0 : i32
    %c0_i32_0 = arith.constant 0 : i32
    return %arg0, %c0_i32 : i32, i32
  }
}

module attributes {stable_mosaic.version = 11 : i64} {
  func.func @_layer_s1_kernel(%arg0: i32, %arg1: memref<8x1024xbf16, #tpu.memory_space<vmem>>, %arg2: memref<8x8xf32, #tpu.memory_space<vmem>>, %arg3: memref<8x8xf32, #tpu.memory_space<vmem>>, %arg4: memref<8x8xf32, #tpu.memory_space<vmem>>, %arg5: memref<8x1xf32, #tpu.memory_space<vmem>>, %arg6: memref<8x1xf32, #tpu.memory_space<vmem>>, %arg7: memref<8x1024xbf16, #tpu.memory_space<vmem>>) attributes {dimension_semantics = [#tpu.dimension_semantics<parallel>], iteration_bounds = array<i64: 1>, scalar_prefetch = 0 : i64, scratch_operands = 0 : i64, tpu.core_type = #tpu.core_type<tc>, window_params = [{pipeline_mode = #tpu.pipeline_mode<synchronous>, transform_indices = @transform_0, window_bounds = array<i64: 8, 1024>}, {transform_indices = @transform_1, window_bounds = array<i64: 8, 8>}, {transform_indices = @transform_2, window_bounds = array<i64: 8, 8>}, {transform_indices = @transform_3, window_bounds = array<i64: 8, 8>}, {transform_indices = @transform_4, window_bounds = array<i64: 8, 1>}, {transform_indices = @transform_5, window_bounds = array<i64: 8, 1>}, {transform_indices = @transform_6, window_bounds = array<i64: 8, 1024>}]} {
    %c0 = arith.constant 0 : index
    %c0_0 = arith.constant 0 : index
    %0 = vector.load %arg1[%c0, %c0_0] : memref<8x1024xbf16, #tpu.memory_space<vmem>>, vector<8x1024xbf16>
    %1 = arith.extf %0 : vector<8x1024xbf16> to vector<8x1024xf32>
    %2 = tpu.iota {dimensions = array<i32: 1>} : vector<1x1024xi32>
    %c512_i32 = arith.constant 512 : i32
    %c0_i32 = arith.constant 0 : i32
    %3 = arith.cmpi eq, %c512_i32, %c0_i32 : i32
    %c1_i32 = arith.constant 1 : i32
    %4 = arith.select %3, %c1_i32, %c512_i32 : i32
    %5 = vector.broadcast %4 : i32 to vector<1x1024xi32>
    %6 = arith.remsi %2, %5 : vector<1x1024xi32>
    %c0_i32_1 = arith.constant 0 : i32
    %7 = vector.broadcast %c0_i32_1 : i32 to vector<1x1024xi32>
    %8 = arith.cmpi ne, %6, %7 : vector<1x1024xi32>
    %c0_i32_2 = arith.constant 0 : i32
    %9 = vector.broadcast %c0_i32_2 : i32 to vector<1x1024xi32>
    %10 = arith.cmpi slt, %6, %9 : vector<1x1024xi32>
    %c0_i32_3 = arith.constant 0 : i32
    %11 = arith.cmpi slt, %4, %c0_i32_3 : i32
    %12 = vector.broadcast %11 : i1 to vector<1x1024xi1>
    %13 = vector.broadcast %12 : vector<1x1024xi1> to vector<1x1024xi1>
    %14 = arith.xori %10, %13 : vector<1x1024xi1>
    %15 = arith.andi %14, %8 : vector<1x1024xi1>
    %16 = vector.broadcast %4 : i32 to vector<1x1024xi32>
    %17 = arith.addi %6, %16 : vector<1x1024xi32>
    %18 = arith.select %15, %17, %6 : vector<1x1024xi1>, vector<1x1024xi32>
    %c0_i32_4 = arith.constant 0 : i32
    %19 = vector.broadcast %c0_i32_4 : i32 to vector<1x1024xi32>
    %20 = arith.cmpi eq, %18, %19 : vector<1x1024xi32>
    %c1_i32_5 = arith.constant 1 : i32
    %21 = tpu.dynamic_rotate %1 by %c1_i32_5 dim 1 : vector<8x1024xf32>, i32 -> vector<8x1024xf32>
    %cst = arith.constant 0.000000e+00 : f32
    %22 = vector.shape_cast %20 : vector<1x1024xi1> to vector<1x1024xi1>
    %23 = vector.broadcast %22 : vector<1x1024xi1> to vector<8x1024xi1>
    %24 = vector.broadcast %cst : f32 to vector<8x1024xf32>
    %25 = arith.select %23, %24, %21 : vector<8x1024xi1>, vector<8x1024xf32>
    %c511_i32 = arith.constant 511 : i32
    %26 = vector.broadcast %c511_i32 : i32 to vector<1x1024xi32>
    %27 = arith.cmpi eq, %18, %26 : vector<1x1024xi32>
    %c1023_i32 = arith.constant 1023 : i32
    %28 = tpu.dynamic_rotate %1 by %c1023_i32 dim 1 : vector<8x1024xf32>, i32 -> vector<8x1024xf32>
    %cst_6 = arith.constant 0.000000e+00 : f32
    %29 = vector.shape_cast %27 : vector<1x1024xi1> to vector<1x1024xi1>
    %30 = vector.broadcast %29 : vector<1x1024xi1> to vector<8x1024xi1>
    %31 = vector.broadcast %cst_6 : f32 to vector<8x1024xf32>
    %32 = arith.select %30, %31, %28 : vector<8x1024xi1>, vector<8x1024xf32>
    %c0_7 = arith.constant 0 : index
    %c0_8 = arith.constant 0 : index
    %33 = vector.load %arg2[%c0_7, %c0_8] : memref<8x8xf32, #tpu.memory_space<vmem>>, vector<8x8xf32>
    %c0_9 = arith.constant 0 : index
    %c0_10 = arith.constant 0 : index
    %34 = vector.load %arg3[%c0_9, %c0_10] : memref<8x8xf32, #tpu.memory_space<vmem>>, vector<8x8xf32>
    %c0_11 = arith.constant 0 : index
    %c0_12 = arith.constant 0 : index
    %35 = vector.load %arg4[%c0_11, %c0_12] : memref<8x8xf32, #tpu.memory_space<vmem>>, vector<8x8xf32>
    %cst_13 = arith.constant dense<0.000000e+00> : vector<8x1024xf32>
    %36 = tpu.matmul %33, %25, %cst_13 {dimension_numbers = #tpu.dot_dimension_numbers<[1], [0], [0], [1], [0, 0, 1, 1], [], []>} : vector<8x8xf32>, vector<8x1024xf32>, vector<8x1024xf32> -> vector<8x1024xf32>
    %cst_14 = arith.constant dense<0.000000e+00> : vector<8x1024xf32>
    %37 = tpu.matmul %34, %1, %cst_14 {dimension_numbers = #tpu.dot_dimension_numbers<[1], [0], [0], [1], [0, 0, 1, 1], [], []>} : vector<8x8xf32>, vector<8x1024xf32>, vector<8x1024xf32> -> vector<8x1024xf32>
    %38 = arith.addf %36, %37 : vector<8x1024xf32>
    %cst_15 = arith.constant dense<0.000000e+00> : vector<8x1024xf32>
    %39 = tpu.matmul %35, %32, %cst_15 {dimension_numbers = #tpu.dot_dimension_numbers<[1], [0], [0], [1], [0, 0, 1, 1], [], []>} : vector<8x8xf32>, vector<8x1024xf32>, vector<8x1024xf32> -> vector<8x1024xf32>
    %40 = arith.addf %38, %39 : vector<8x1024xf32>
    %cst_16 = arith.constant dense<0.000000e+00> : vector<8xf32>
    %41 = vector.multi_reduction <add>, %40, %cst_16 [1] : vector<8x1024xf32> to vector<8xf32>
    %42 = vector.shape_cast %41 : vector<8xf32> to vector<8x1xf32>
    %cst_17 = arith.constant 1.024000e+03 : f32
    %43 = vector.broadcast %cst_17 : f32 to vector<8x1xf32>
    %44 = arith.divf %42, %43 : vector<8x1xf32>
    %45 = vector.broadcast %44 : vector<8x1xf32> to vector<8x1024xf32>
    %46 = arith.subf %40, %45 : vector<8x1024xf32>
    %47 = arith.mulf %46, %46 : vector<8x1024xf32>
    %cst_18 = arith.constant dense<0.000000e+00> : vector<8xf32>
    %48 = vector.multi_reduction <add>, %47, %cst_18 [1] : vector<8x1024xf32> to vector<8xf32>
    %49 = vector.shape_cast %48 : vector<8xf32> to vector<8x1xf32>
    %cst_19 = arith.constant 1.024000e+03 : f32
    %50 = vector.broadcast %cst_19 : f32 to vector<8x1xf32>
    %51 = arith.divf %49, %50 : vector<8x1xf32>
    %c0_20 = arith.constant 0 : index
    %c0_21 = arith.constant 0 : index
    %52 = vector.load %arg5[%c0_20, %c0_21] : memref<8x1xf32, #tpu.memory_space<vmem>>, vector<8x1xf32>
    %cst_22 = arith.constant 9.99999974E-5 : f32
    %53 = vector.broadcast %cst_22 : f32 to vector<8x1xf32>
    %54 = arith.addf %51, %53 : vector<8x1xf32>
    %55 = math.rsqrt %54 : vector<8x1xf32>
    %56 = arith.mulf %52, %55 : vector<8x1xf32>
    %57 = vector.broadcast %44 : vector<8x1xf32> to vector<8x1024xf32>
    %58 = arith.subf %40, %57 : vector<8x1024xf32>
    %59 = vector.broadcast %56 : vector<8x1xf32> to vector<8x1024xf32>
    %60 = arith.mulf %58, %59 : vector<8x1024xf32>
    %c0_23 = arith.constant 0 : index
    %c0_24 = arith.constant 0 : index
    %61 = vector.load %arg6[%c0_23, %c0_24] : memref<8x1xf32, #tpu.memory_space<vmem>>, vector<8x1xf32>
    %62 = vector.broadcast %61 : vector<8x1xf32> to vector<8x1024xf32>
    %63 = arith.addf %60, %62 : vector<8x1024xf32>
    %c8_i32 = arith.constant 8 : i32
    %64 = arith.muli %arg0, %c8_i32 : i32
    %65 = tpu.assume_multiple %64, 8 : i32
    %66 = arith.index_cast %65 : i32 to index
    %c0_25 = arith.constant 0 : index
    %67 = vector.load %arg1[%66, %c0_25] : memref<8x1024xbf16, #tpu.memory_space<vmem>>, vector<8x1024xbf16>
    %68 = arith.extf %67 : vector<8x1024xbf16> to vector<8x1024xf32>
    %69 = arith.addf %63, %68 : vector<8x1024xf32>
    %cst_26 = arith.constant 5.000000e-01 : f32
    %70 = vector.broadcast %cst_26 : f32 to vector<8x1024xf32>
    %71 = arith.mulf %69, %70 : vector<8x1024xf32>
    %cst_27 = arith.constant 0.000000e+00 : f32
    %72 = vector.broadcast %cst_27 : f32 to vector<8x1024xf32>
    %73 = arith.maximumf %71, %72 : vector<8x1024xf32>
    %74 = arith.truncf %73 : vector<8x1024xf32> to vector<8x1024xbf16>
    %c0_28 = arith.constant 0 : index
    %c0_29 = arith.constant 0 : index
    %75 = vector.load %arg7[%c0_28, %c0_29] : memref<8x1024xbf16, #tpu.memory_space<vmem>>, vector<8x1024xbf16>
    tpu.vector_store %arg7[%c0_28, %c0_29], %74 {strides = array<i32>} : memref<8x1024xbf16, #tpu.memory_space<vmem>>, vector<8x1024xbf16>,
    return
  }
  func.func @transform_0(%arg0: i32) -> (i32, i32) {
    %c0_i32 = arith.constant 0 : i32
    %c0_i32_0 = arith.constant 0 : i32
    %c0_i32_1 = arith.constant 0 : i32
    return %c0_i32, %c0_i32_0 : i32, i32
  }
  func.func @transform_1(%arg0: i32) -> (i32, i32) {
    %c0_i32 = arith.constant 0 : i32
    %c0_i32_0 = arith.constant 0 : i32
    return %arg0, %c0_i32 : i32, i32
  }
  func.func @transform_2(%arg0: i32) -> (i32, i32) {
    %c0_i32 = arith.constant 0 : i32
    %c0_i32_0 = arith.constant 0 : i32
    return %arg0, %c0_i32 : i32, i32
  }
  func.func @transform_3(%arg0: i32) -> (i32, i32) {
    %c0_i32 = arith.constant 0 : i32
    %c0_i32_0 = arith.constant 0 : i32
    return %arg0, %c0_i32 : i32, i32
  }
  func.func @transform_4(%arg0: i32) -> (i32, i32) {
    %c0_i32 = arith.constant 0 : i32
    %c0_i32_0 = arith.constant 0 : i32
    return %arg0, %c0_i32 : i32, i32
  }
  func.func @transform_5(%arg0: i32) -> (i32, i32) {
    %c0_i32 = arith.constant 0 : i32
    %c0_i32_0 = arith.constant 0 : i32
    return %arg0, %c0_i32 : i32, i32
  }
  func.func @transform_6(%arg0: i32) -> (i32, i32) {
    %c0_i32 = arith.constant 0 : i32
    %c0_i32_0 = arith.constant 0 : i32
    return %arg0, %c0_i32 : i32, i32
  }
}

module attributes {stable_mosaic.version = 11 : i64} {
  func.func @_layer_s2_kernel(%arg0: i32, %arg1: memref<8x512xbf16, #tpu.memory_space<vmem>>, %arg2: memref<8x512xbf16, #tpu.memory_space<vmem>>, %arg3: memref<8x8xf32, #tpu.memory_space<vmem>>, %arg4: memref<8x8xf32, #tpu.memory_space<vmem>>, %arg5: memref<8x8xf32, #tpu.memory_space<vmem>>, %arg6: memref<8x8xf32, #tpu.memory_space<vmem>>, %arg7: memref<8x1xf32, #tpu.memory_space<vmem>>, %arg8: memref<8x1xf32, #tpu.memory_space<vmem>>, %arg9: memref<8x1xf32, #tpu.memory_space<vmem>>, %arg10: memref<8x1xf32, #tpu.memory_space<vmem>>, %arg11: memref<8x512xbf16, #tpu.memory_space<vmem>>) attributes {dimension_semantics = [#tpu.dimension_semantics<parallel>], iteration_bounds = array<i64: 2>, scalar_prefetch = 0 : i64, scratch_operands = 0 : i64, tpu.core_type = #tpu.core_type<tc>, window_params = [{pipeline_mode = #tpu.pipeline_mode<synchronous>, transform_indices = @transform_0, window_bounds = array<i64: 8, 512>}, {pipeline_mode = #tpu.pipeline_mode<synchronous>, transform_indices = @transform_1, window_bounds = array<i64: 8, 512>}, {transform_indices = @transform_2, window_bounds = array<i64: 8, 8>}, {transform_indices = @transform_3, window_bounds = array<i64: 8, 8>}, {transform_indices = @transform_4, window_bounds = array<i64: 8, 8>}, {transform_indices = @transform_5, window_bounds = array<i64: 8, 8>}, {transform_indices = @transform_6, window_bounds = array<i64: 8, 1>}, {transform_indices = @transform_7, window_bounds = array<i64: 8, 1>}, {transform_indices = @transform_8, window_bounds = array<i64: 8, 1>}, {transform_indices = @transform_9, window_bounds = array<i64: 8, 1>}, {transform_indices = @transform_10, window_bounds = array<i64: 8, 512>}]} {
    %c0 = arith.constant 0 : index
    %c0_0 = arith.constant 0 : index
    %0 = vector.load %arg1[%c0, %c0_0] : memref<8x512xbf16, #tpu.memory_space<vmem>>, vector<8x512xbf16>
    %1 = arith.extf %0 : vector<8x512xbf16> to vector<8x512xf32>
    %c0_1 = arith.constant 0 : index
    %c0_2 = arith.constant 0 : index
    %2 = vector.load %arg2[%c0_1, %c0_2] : memref<8x512xbf16, #tpu.memory_space<vmem>>, vector<8x512xbf16>
    %3 = arith.extf %2 : vector<8x512xbf16> to vector<8x512xf32>
    %4 = tpu.iota {dimensions = array<i32: 1>} : vector<1x512xi32>
    %c256_i32 = arith.constant 256 : i32
    %c0_i32 = arith.constant 0 : i32
    %5 = arith.cmpi eq, %c256_i32, %c0_i32 : i32
    %c1_i32 = arith.constant 1 : i32
    %6 = arith.select %5, %c1_i32, %c256_i32 : i32
    %7 = vector.broadcast %6 : i32 to vector<1x512xi32>
    %8 = arith.remsi %4, %7 : vector<1x512xi32>
    %c0_i32_3 = arith.constant 0 : i32
    %9 = vector.broadcast %c0_i32_3 : i32 to vector<1x512xi32>
    %10 = arith.cmpi ne, %8, %9 : vector<1x512xi32>
    %c0_i32_4 = arith.constant 0 : i32
    %11 = vector.broadcast %c0_i32_4 : i32 to vector<1x512xi32>
    %12 = arith.cmpi slt, %8, %11 : vector<1x512xi32>
    %c0_i32_5 = arith.constant 0 : i32
    %13 = arith.cmpi slt, %6, %c0_i32_5 : i32
    %14 = vector.broadcast %13 : i1 to vector<1x512xi1>
    %15 = vector.broadcast %14 : vector<1x512xi1> to vector<1x512xi1>
    %16 = arith.xori %12, %15 : vector<1x512xi1>
    %17 = arith.andi %16, %10 : vector<1x512xi1>
    %18 = vector.broadcast %6 : i32 to vector<1x512xi32>
    %19 = arith.addi %8, %18 : vector<1x512xi32>
    %20 = arith.select %17, %19, %8 : vector<1x512xi1>, vector<1x512xi32>
    %c0_i32_6 = arith.constant 0 : i32
    %21 = vector.broadcast %c0_i32_6 : i32 to vector<1x512xi32>
    %22 = arith.cmpi eq, %20, %21 : vector<1x512xi32>
    %c1_i32_7 = arith.constant 1 : i32
    %23 = tpu.dynamic_rotate %3 by %c1_i32_7 dim 1 : vector<8x512xf32>, i32 -> vector<8x512xf32>
    %cst = arith.constant 0.000000e+00 : f32
    %24 = vector.shape_cast %22 : vector<1x512xi1> to vector<1x512xi1>
    %25 = vector.broadcast %24 : vector<1x512xi1> to vector<8x512xi1>
    %26 = vector.broadcast %cst : f32 to vector<8x512xf32>
    %27 = arith.select %25, %26, %23 : vector<8x512xi1>, vector<8x512xf32>
    %c0_8 = arith.constant 0 : index
    %c0_9 = arith.constant 0 : index
    %28 = vector.load %arg3[%c0_8, %c0_9] : memref<8x8xf32, #tpu.memory_space<vmem>>, vector<8x8xf32>
    %cst_10 = arith.constant dense<0.000000e+00> : vector<8x512xf32>
    %29 = tpu.matmul %28, %27, %cst_10 {dimension_numbers = #tpu.dot_dimension_numbers<[1], [0], [0], [1], [0, 0, 1, 1], [], []>} : vector<8x8xf32>, vector<8x512xf32>, vector<8x512xf32> -> vector<8x512xf32>
    %c0_11 = arith.constant 0 : index
    %c0_12 = arith.constant 0 : index
    %30 = vector.load %arg4[%c0_11, %c0_12] : memref<8x8xf32, #tpu.memory_space<vmem>>, vector<8x8xf32>
    %cst_13 = arith.constant dense<0.000000e+00> : vector<8x512xf32>
    %31 = tpu.matmul %30, %1, %cst_13 {dimension_numbers = #tpu.dot_dimension_numbers<[1], [0], [0], [1], [0, 0, 1, 1], [], []>} : vector<8x8xf32>, vector<8x512xf32>, vector<8x512xf32> -> vector<8x512xf32>
    %32 = arith.addf %29, %31 : vector<8x512xf32>
    %c0_14 = arith.constant 0 : index
    %c0_15 = arith.constant 0 : index
    %33 = vector.load %arg5[%c0_14, %c0_15] : memref<8x8xf32, #tpu.memory_space<vmem>>, vector<8x8xf32>
    %cst_16 = arith.constant dense<0.000000e+00> : vector<8x512xf32>
    %34 = tpu.matmul %33, %3, %cst_16 {dimension_numbers = #tpu.dot_dimension_numbers<[1], [0], [0], [1], [0, 0, 1, 1], [], []>} : vector<8x8xf32>, vector<8x512xf32>, vector<8x512xf32> -> vector<8x512xf32>
    %35 = arith.addf %32, %34 : vector<8x512xf32>
    %c0_17 = arith.constant 0 : index
    %c0_18 = arith.constant 0 : index
    %36 = vector.load %arg6[%c0_17, %c0_18] : memref<8x8xf32, #tpu.memory_space<vmem>>, vector<8x8xf32>
    %cst_19 = arith.constant dense<0.000000e+00> : vector<8x512xf32>
    %37 = tpu.matmul %36, %1, %cst_19 {dimension_numbers = #tpu.dot_dimension_numbers<[1], [0], [0], [1], [0, 0, 1, 1], [], []>} : vector<8x8xf32>, vector<8x512xf32>, vector<8x512xf32> -> vector<8x512xf32>
    %cst_20 = arith.constant dense<0.000000e+00> : vector<8xf32>
    %38 = vector.multi_reduction <add>, %35, %cst_20 [1] : vector<8x512xf32> to vector<8xf32>
    %39 = vector.shape_cast %38 : vector<8xf32> to vector<8x1xf32>
    %cst_21 = arith.constant 5.120000e+02 : f32
    %40 = vector.broadcast %cst_21 : f32 to vector<8x1xf32>
    %41 = arith.divf %39, %40 : vector<8x1xf32>
    %42 = vector.broadcast %41 : vector<8x1xf32> to vector<8x512xf32>
    %43 = arith.subf %35, %42 : vector<8x512xf32>
    %44 = arith.mulf %43, %43 : vector<8x512xf32>
    %cst_22 = arith.constant dense<0.000000e+00> : vector<8xf32>
    %45 = vector.multi_reduction <add>, %44, %cst_22 [1] : vector<8x512xf32> to vector<8xf32>
    %46 = vector.shape_cast %45 : vector<8xf32> to vector<8x1xf32>
    %cst_23 = arith.constant 5.120000e+02 : f32
    %47 = vector.broadcast %cst_23 : f32 to vector<8x1xf32>
    %48 = arith.divf %46, %47 : vector<8x1xf32>
    %cst_24 = arith.constant dense<0.000000e+00> : vector<8xf32>
    %49 = vector.multi_reduction <add>, %37, %cst_24 [1] : vector<8x512xf32> to vector<8xf32>
    %50 = vector.shape_cast %49 : vector<8xf32> to vector<8x1xf32>
    %cst_25 = arith.constant 5.120000e+02 : f32
    %51 = vector.broadcast %cst_25 : f32 to vector<8x1xf32>
    %52 = arith.divf %50, %51 : vector<8x1xf32>
    %53 = vector.broadcast %52 : vector<8x1xf32> to vector<8x512xf32>
    %54 = arith.subf %37, %53 : vector<8x512xf32>
    %55 = arith.mulf %54, %54 : vector<8x512xf32>
    %cst_26 = arith.constant dense<0.000000e+00> : vector<8xf32>
    %56 = vector.multi_reduction <add>, %55, %cst_26 [1] : vector<8x512xf32> to vector<8xf32>
    %57 = vector.shape_cast %56 : vector<8xf32> to vector<8x1xf32>
    %cst_27 = arith.constant 5.120000e+02 : f32
    %58 = vector.broadcast %cst_27 : f32 to vector<8x1xf32>
    %59 = arith.divf %57, %58 : vector<8x1xf32>
    %60 = vector.broadcast %41 : vector<8x1xf32> to vector<8x512xf32>
    %61 = arith.subf %35, %60 : vector<8x512xf32>
    %c0_28 = arith.constant 0 : index
    %c0_29 = arith.constant 0 : index
    %62 = vector.load %arg7[%c0_28, %c0_29] : memref<8x1xf32, #tpu.memory_space<vmem>>, vector<8x1xf32>
    %cst_30 = arith.constant 9.99999974E-5 : f32
    %63 = vector.broadcast %cst_30 : f32 to vector<8x1xf32>
    %64 = arith.addf %48, %63 : vector<8x1xf32>
    %65 = math.rsqrt %64 : vector<8x1xf32>
    %66 = arith.mulf %62, %65 : vector<8x1xf32>
    %67 = vector.broadcast %66 : vector<8x1xf32> to vector<8x512xf32>
    %68 = arith.mulf %61, %67 : vector<8x512xf32>
    %c0_31 = arith.constant 0 : index
    %c0_32 = arith.constant 0 : index
    %69 = vector.load %arg8[%c0_31, %c0_32] : memref<8x1xf32, #tpu.memory_space<vmem>>, vector<8x1xf32>
    %70 = vector.broadcast %69 : vector<8x1xf32> to vector<8x512xf32>
    %71 = arith.addf %68, %70 : vector<8x512xf32>
    %72 = vector.broadcast %52 : vector<8x1xf32> to vector<8x512xf32>
    %73 = arith.subf %37, %72 : vector<8x512xf32>
    %c0_33 = arith.constant 0 : index
    %c0_34 = arith.constant 0 : index
    %74 = vector.load %arg9[%c0_33, %c0_34] : memref<8x1xf32, #tpu.memory_space<vmem>>, vector<8x1xf32>
    %cst_35 = arith.constant 9.99999974E-5 : f32
    %75 = vector.broadcast %cst_35 : f32 to vector<8x1xf32>
    %76 = arith.addf %59, %75 : vector<8x1xf32>
    %77 = math.rsqrt %76 : vector<8x1xf32>
    %78 = arith.mulf %74, %77 : vector<8x1xf32>
    %79 = vector.broadcast %78 : vector<8x1xf32> to vector<8x512xf32>
    %80 = arith.mulf %73, %79 : vector<8x512xf32>
    %c0_36 = arith.constant 0 : index
    %c0_37 = arith.constant 0 : index
    %81 = vector.load %arg10[%c0_36, %c0_37] : memref<8x1xf32, #tpu.memory_space<vmem>>, vector<8x1xf32>
    %82 = vector.broadcast %81 : vector<8x1xf32> to vector<8x512xf32>
    %83 = arith.addf %80, %82 : vector<8x512xf32>
    %84 = arith.addf %71, %83 : vector<8x512xf32>
    %cst_38 = arith.constant 5.000000e-01 : f32
    %85 = vector.broadcast %cst_38 : f32 to vector<8x512xf32>
    %86 = arith.mulf %84, %85 : vector<8x512xf32>
    %cst_39 = arith.constant 0.000000e+00 : f32
    %87 = vector.broadcast %cst_39 : f32 to vector<8x512xf32>
    %88 = arith.maximumf %86, %87 : vector<8x512xf32>
    %89 = arith.truncf %88 : vector<8x512xf32> to vector<8x512xbf16>
    %c0_40 = arith.constant 0 : index
    %c0_41 = arith.constant 0 : index
    %90 = vector.load %arg11[%c0_40, %c0_41] : memref<8x512xbf16, #tpu.memory_space<vmem>>, vector<8x512xbf16>
    tpu.vector_store %arg11[%c0_40, %c0_41], %89 {strides = array<i32>} : memref<8x512xbf16, #tpu.memory_space<vmem>>, vector<8x512xbf16>,
    return
  }
  func.func @transform_0(%arg0: i32) -> (i32, i32) {
    %c0_i32 = arith.constant 0 : i32
    %c0_i32_0 = arith.constant 0 : i32
    %c0_i32_1 = arith.constant 0 : i32
    return %c0_i32, %c0_i32_0 : i32, i32
  }
  func.func @transform_1(%arg0: i32) -> (i32, i32) {
    %c0_i32 = arith.constant 0 : i32
    %c0_i32_0 = arith.constant 0 : i32
    %c0_i32_1 = arith.constant 0 : i32
    return %c0_i32, %c0_i32_0 : i32, i32
  }
  func.func @transform_2(%arg0: i32) -> (i32, i32) {
    %c0_i32 = arith.constant 0 : i32
    %c0_i32_0 = arith.constant 0 : i32
    return %arg0, %c0_i32 : i32, i32
  }
  func.func @transform_3(%arg0: i32) -> (i32, i32) {
    %c0_i32 = arith.constant 0 : i32
    %c0_i32_0 = arith.constant 0 : i32
    return %arg0, %c0_i32 : i32, i32
  }
  func.func @transform_4(%arg0: i32) -> (i32, i32) {
    %c0_i32 = arith.constant 0 : i32
    %c0_i32_0 = arith.constant 0 : i32
    return %arg0, %c0_i32 : i32, i32
  }
  func.func @transform_5(%arg0: i32) -> (i32, i32) {
    %c0_i32 = arith.constant 0 : i32
    %c0_i32_0 = arith.constant 0 : i32
    return %arg0, %c0_i32 : i32, i32
  }
  func.func @transform_6(%arg0: i32) -> (i32, i32) {
    %c0_i32 = arith.constant 0 : i32
    %c0_i32_0 = arith.constant 0 : i32
    return %arg0, %c0_i32 : i32, i32
  }
  func.func @transform_7(%arg0: i32) -> (i32, i32) {
    %c0_i32 = arith.constant 0 : i32
    %c0_i32_0 = arith.constant 0 : i32
    return %arg0, %c0_i32 : i32, i32
  }
  func.func @transform_8(%arg0: i32) -> (i32, i32) {
    %c0_i32 = arith.constant 0 : i32
    %c0_i32_0 = arith.constant 0 : i32
    return %arg0, %c0_i32 : i32, i32
  }
  func.func @transform_9(%arg0: i32) -> (i32, i32) {
    %c0_i32 = arith.constant 0 : i32
    %c0_i32_0 = arith.constant 0 : i32
    return %arg0, %c0_i32 : i32, i32
  }
  func.func @transform_10(%arg0: i32) -> (i32, i32) {
    %c0_i32 = arith.constant 0 : i32
    %c0_i32_0 = arith.constant 0 : i32
    return %arg0, %c0_i32 : i32, i32
  }
}

module attributes {stable_mosaic.version = 11 : i64} {
  func.func @_layer_s1_kernel(%arg0: i32, %arg1: memref<16x512xbf16, #tpu.memory_space<vmem>>, %arg2: memref<8x16xf32, #tpu.memory_space<vmem>>, %arg3: memref<8x16xf32, #tpu.memory_space<vmem>>, %arg4: memref<8x16xf32, #tpu.memory_space<vmem>>, %arg5: memref<8x1xf32, #tpu.memory_space<vmem>>, %arg6: memref<8x1xf32, #tpu.memory_space<vmem>>, %arg7: memref<8x512xbf16, #tpu.memory_space<vmem>>) attributes {dimension_semantics = [#tpu.dimension_semantics<parallel>], iteration_bounds = array<i64: 2>, scalar_prefetch = 0 : i64, scratch_operands = 0 : i64, tpu.core_type = #tpu.core_type<tc>, window_params = [{pipeline_mode = #tpu.pipeline_mode<synchronous>, transform_indices = @transform_0, window_bounds = array<i64: 16, 512>}, {transform_indices = @transform_1, window_bounds = array<i64: 8, 16>}, {transform_indices = @transform_2, window_bounds = array<i64: 8, 16>}, {transform_indices = @transform_3, window_bounds = array<i64: 8, 16>}, {transform_indices = @transform_4, window_bounds = array<i64: 8, 1>}, {transform_indices = @transform_5, window_bounds = array<i64: 8, 1>}, {transform_indices = @transform_6, window_bounds = array<i64: 8, 512>}]} {
    %c0 = arith.constant 0 : index
    %c0_0 = arith.constant 0 : index
    %0 = vector.load %arg1[%c0, %c0_0] : memref<16x512xbf16, #tpu.memory_space<vmem>>, vector<16x512xbf16>
    %1 = arith.extf %0 : vector<16x512xbf16> to vector<16x512xf32>
    %2 = tpu.iota {dimensions = array<i32: 1>} : vector<1x512xi32>
    %c256_i32 = arith.constant 256 : i32
    %c0_i32 = arith.constant 0 : i32
    %3 = arith.cmpi eq, %c256_i32, %c0_i32 : i32
    %c1_i32 = arith.constant 1 : i32
    %4 = arith.select %3, %c1_i32, %c256_i32 : i32
    %5 = vector.broadcast %4 : i32 to vector<1x512xi32>
    %6 = arith.remsi %2, %5 : vector<1x512xi32>
    %c0_i32_1 = arith.constant 0 : i32
    %7 = vector.broadcast %c0_i32_1 : i32 to vector<1x512xi32>
    %8 = arith.cmpi ne, %6, %7 : vector<1x512xi32>
    %c0_i32_2 = arith.constant 0 : i32
    %9 = vector.broadcast %c0_i32_2 : i32 to vector<1x512xi32>
    %10 = arith.cmpi slt, %6, %9 : vector<1x512xi32>
    %c0_i32_3 = arith.constant 0 : i32
    %11 = arith.cmpi slt, %4, %c0_i32_3 : i32
    %12 = vector.broadcast %11 : i1 to vector<1x512xi1>
    %13 = vector.broadcast %12 : vector<1x512xi1> to vector<1x512xi1>
    %14 = arith.xori %10, %13 : vector<1x512xi1>
    %15 = arith.andi %14, %8 : vector<1x512xi1>
    %16 = vector.broadcast %4 : i32 to vector<1x512xi32>
    %17 = arith.addi %6, %16 : vector<1x512xi32>
    %18 = arith.select %15, %17, %6 : vector<1x512xi1>, vector<1x512xi32>
    %c0_i32_4 = arith.constant 0 : i32
    %19 = vector.broadcast %c0_i32_4 : i32 to vector<1x512xi32>
    %20 = arith.cmpi eq, %18, %19 : vector<1x512xi32>
    %c1_i32_5 = arith.constant 1 : i32
    %21 = tpu.dynamic_rotate %1 by %c1_i32_5 dim 1 : vector<16x512xf32>, i32 -> vector<16x512xf32>
    %cst = arith.constant 0.000000e+00 : f32
    %22 = vector.shape_cast %20 : vector<1x512xi1> to vector<1x512xi1>
    %23 = vector.broadcast %22 : vector<1x512xi1> to vector<16x512xi1>
    %24 = vector.broadcast %cst : f32 to vector<16x512xf32>
    %25 = arith.select %23, %24, %21 : vector<16x512xi1>, vector<16x512xf32>
    %c255_i32 = arith.constant 255 : i32
    %26 = vector.broadcast %c255_i32 : i32 to vector<1x512xi32>
    %27 = arith.cmpi eq, %18, %26 : vector<1x512xi32>
    %c511_i32 = arith.constant 511 : i32
    %28 = tpu.dynamic_rotate %1 by %c511_i32 dim 1 : vector<16x512xf32>, i32 -> vector<16x512xf32>
    %cst_6 = arith.constant 0.000000e+00 : f32
    %29 = vector.shape_cast %27 : vector<1x512xi1> to vector<1x512xi1>
    %30 = vector.broadcast %29 : vector<1x512xi1> to vector<16x512xi1>
    %31 = vector.broadcast %cst_6 : f32 to vector<16x512xf32>
    %32 = arith.select %30, %31, %28 : vector<16x512xi1>, vector<16x512xf32>
    %c0_7 = arith.constant 0 : index
    %c0_8 = arith.constant 0 : index
    %33 = vector.load %arg2[%c0_7, %c0_8] : memref<8x16xf32, #tpu.memory_space<vmem>>, vector<8x16xf32>
    %c0_9 = arith.constant 0 : index
    %c0_10 = arith.constant 0 : index
    %34 = vector.load %arg3[%c0_9, %c0_10] : memref<8x16xf32, #tpu.memory_space<vmem>>, vector<8x16xf32>
    %c0_11 = arith.constant 0 : index
    %c0_12 = arith.constant 0 : index
    %35 = vector.load %arg4[%c0_11, %c0_12] : memref<8x16xf32, #tpu.memory_space<vmem>>, vector<8x16xf32>
    %cst_13 = arith.constant dense<0.000000e+00> : vector<8x512xf32>
    %36 = tpu.matmul %33, %25, %cst_13 {dimension_numbers = #tpu.dot_dimension_numbers<[1], [0], [0], [1], [0, 0, 1, 1], [], []>} : vector<8x16xf32>, vector<16x512xf32>, vector<8x512xf32> -> vector<8x512xf32>
    %cst_14 = arith.constant dense<0.000000e+00> : vector<8x512xf32>
    %37 = tpu.matmul %34, %1, %cst_14 {dimension_numbers = #tpu.dot_dimension_numbers<[1], [0], [0], [1], [0, 0, 1, 1], [], []>} : vector<8x16xf32>, vector<16x512xf32>, vector<8x512xf32> -> vector<8x512xf32>
    %38 = arith.addf %36, %37 : vector<8x512xf32>
    %cst_15 = arith.constant dense<0.000000e+00> : vector<8x512xf32>
    %39 = tpu.matmul %35, %32, %cst_15 {dimension_numbers = #tpu.dot_dimension_numbers<[1], [0], [0], [1], [0, 0, 1, 1], [], []>} : vector<8x16xf32>, vector<16x512xf32>, vector<8x512xf32> -> vector<8x512xf32>
    %40 = arith.addf %38, %39 : vector<8x512xf32>
    %cst_16 = arith.constant dense<0.000000e+00> : vector<8xf32>
    %41 = vector.multi_reduction <add>, %40, %cst_16 [1] : vector<8x512xf32> to vector<8xf32>
    %42 = vector.shape_cast %41 : vector<8xf32> to vector<8x1xf32>
    %cst_17 = arith.constant 5.120000e+02 : f32
    %43 = vector.broadcast %cst_17 : f32 to vector<8x1xf32>
    %44 = arith.divf %42, %43 : vector<8x1xf32>
    %45 = vector.broadcast %44 : vector<8x1xf32> to vector<8x512xf32>
    %46 = arith.subf %40, %45 : vector<8x512xf32>
    %47 = arith.mulf %46, %46 : vector<8x512xf32>
    %cst_18 = arith.constant dense<0.000000e+00> : vector<8xf32>
    %48 = vector.multi_reduction <add>, %47, %cst_18 [1] : vector<8x512xf32> to vector<8xf32>
    %49 = vector.shape_cast %48 : vector<8xf32> to vector<8x1xf32>
    %cst_19 = arith.constant 5.120000e+02 : f32
    %50 = vector.broadcast %cst_19 : f32 to vector<8x1xf32>
    %51 = arith.divf %49, %50 : vector<8x1xf32>
    %c0_20 = arith.constant 0 : index
    %c0_21 = arith.constant 0 : index
    %52 = vector.load %arg5[%c0_20, %c0_21] : memref<8x1xf32, #tpu.memory_space<vmem>>, vector<8x1xf32>
    %cst_22 = arith.constant 9.99999974E-5 : f32
    %53 = vector.broadcast %cst_22 : f32 to vector<8x1xf32>
    %54 = arith.addf %51, %53 : vector<8x1xf32>
    %55 = math.rsqrt %54 : vector<8x1xf32>
    %56 = arith.mulf %52, %55 : vector<8x1xf32>
    %57 = vector.broadcast %44 : vector<8x1xf32> to vector<8x512xf32>
    %58 = arith.subf %40, %57 : vector<8x512xf32>
    %59 = vector.broadcast %56 : vector<8x1xf32> to vector<8x512xf32>
    %60 = arith.mulf %58, %59 : vector<8x512xf32>
    %c0_23 = arith.constant 0 : index
    %c0_24 = arith.constant 0 : index
    %61 = vector.load %arg6[%c0_23, %c0_24] : memref<8x1xf32, #tpu.memory_space<vmem>>, vector<8x1xf32>
    %62 = vector.broadcast %61 : vector<8x1xf32> to vector<8x512xf32>
    %63 = arith.addf %60, %62 : vector<8x512xf32>
    %c8_i32 = arith.constant 8 : i32
    %64 = arith.muli %arg0, %c8_i32 : i32
    %65 = tpu.assume_multiple %64, 8 : i32
    %66 = arith.index_cast %65 : i32 to index
    %c0_25 = arith.constant 0 : index
    %67 = vector.load %arg1[%66, %c0_25] : memref<16x512xbf16, #tpu.memory_space<vmem>>, vector<8x512xbf16>
    %68 = arith.extf %67 : vector<8x512xbf16> to vector<8x512xf32>
    %69 = arith.addf %63, %68 : vector<8x512xf32>
    %cst_26 = arith.constant 5.000000e-01 : f32
    %70 = vector.broadcast %cst_26 : f32 to vector<8x512xf32>
    %71 = arith.mulf %69, %70 : vector<8x512xf32>
    %cst_27 = arith.constant 0.000000e+00 : f32
    %72 = vector.broadcast %cst_27 : f32 to vector<8x512xf32>
    %73 = arith.maximumf %71, %72 : vector<8x512xf32>
    %74 = arith.truncf %73 : vector<8x512xf32> to vector<8x512xbf16>
    %c0_28 = arith.constant 0 : index
    %c0_29 = arith.constant 0 : index
    %75 = vector.load %arg7[%c0_28, %c0_29] : memref<8x512xbf16, #tpu.memory_space<vmem>>, vector<8x512xbf16>
    tpu.vector_store %arg7[%c0_28, %c0_29], %74 {strides = array<i32>} : memref<8x512xbf16, #tpu.memory_space<vmem>>, vector<8x512xbf16>,
    return
  }
  func.func @transform_0(%arg0: i32) -> (i32, i32) {
    %c0_i32 = arith.constant 0 : i32
    %c0_i32_0 = arith.constant 0 : i32
    %c0_i32_1 = arith.constant 0 : i32
    return %c0_i32, %c0_i32_0 : i32, i32
  }
  func.func @transform_1(%arg0: i32) -> (i32, i32) {
    %c0_i32 = arith.constant 0 : i32
    %c0_i32_0 = arith.constant 0 : i32
    return %arg0, %c0_i32 : i32, i32
  }
  func.func @transform_2(%arg0: i32) -> (i32, i32) {
    %c0_i32 = arith.constant 0 : i32
    %c0_i32_0 = arith.constant 0 : i32
    return %arg0, %c0_i32 : i32, i32
  }
  func.func @transform_3(%arg0: i32) -> (i32, i32) {
    %c0_i32 = arith.constant 0 : i32
    %c0_i32_0 = arith.constant 0 : i32
    return %arg0, %c0_i32 : i32, i32
  }
  func.func @transform_4(%arg0: i32) -> (i32, i32) {
    %c0_i32 = arith.constant 0 : i32
    %c0_i32_0 = arith.constant 0 : i32
    return %arg0, %c0_i32 : i32, i32
  }
  func.func @transform_5(%arg0: i32) -> (i32, i32) {
    %c0_i32 = arith.constant 0 : i32
    %c0_i32_0 = arith.constant 0 : i32
    return %arg0, %c0_i32 : i32, i32
  }
  func.func @transform_6(%arg0: i32) -> (i32, i32) {
    %c0_i32 = arith.constant 0 : i32
    %c0_i32_0 = arith.constant 0 : i32
    return %arg0, %c0_i32 : i32, i32
  }
}

module attributes {stable_mosaic.version = 11 : i64} {
  func.func @_layer_s2_kernel(%arg0: i32, %arg1: memref<16x256xbf16, #tpu.memory_space<vmem>>, %arg2: memref<16x256xbf16, #tpu.memory_space<vmem>>, %arg3: memref<16x16xf32, #tpu.memory_space<vmem>>, %arg4: memref<16x16xf32, #tpu.memory_space<vmem>>, %arg5: memref<16x16xf32, #tpu.memory_space<vmem>>, %arg6: memref<16x16xf32, #tpu.memory_space<vmem>>, %arg7: memref<16x1xf32, #tpu.memory_space<vmem>>, %arg8: memref<16x1xf32, #tpu.memory_space<vmem>>, %arg9: memref<16x1xf32, #tpu.memory_space<vmem>>, %arg10: memref<16x1xf32, #tpu.memory_space<vmem>>, %arg11: memref<16x256xbf16, #tpu.memory_space<vmem>>) attributes {dimension_semantics = [#tpu.dimension_semantics<parallel>], iteration_bounds = array<i64: 2>, scalar_prefetch = 0 : i64, scratch_operands = 0 : i64, tpu.core_type = #tpu.core_type<tc>, window_params = [{pipeline_mode = #tpu.pipeline_mode<synchronous>, transform_indices = @transform_0, window_bounds = array<i64: 16, 256>}, {pipeline_mode = #tpu.pipeline_mode<synchronous>, transform_indices = @transform_1, window_bounds = array<i64: 16, 256>}, {transform_indices = @transform_2, window_bounds = array<i64: 16, 16>}, {transform_indices = @transform_3, window_bounds = array<i64: 16, 16>}, {transform_indices = @transform_4, window_bounds = array<i64: 16, 16>}, {transform_indices = @transform_5, window_bounds = array<i64: 16, 16>}, {transform_indices = @transform_6, window_bounds = array<i64: 16, 1>}, {transform_indices = @transform_7, window_bounds = array<i64: 16, 1>}, {transform_indices = @transform_8, window_bounds = array<i64: 16, 1>}, {transform_indices = @transform_9, window_bounds = array<i64: 16, 1>}, {transform_indices = @transform_10, window_bounds = array<i64: 16, 256>}]} {
    %c0 = arith.constant 0 : index
    %c0_0 = arith.constant 0 : index
    %0 = vector.load %arg1[%c0, %c0_0] : memref<16x256xbf16, #tpu.memory_space<vmem>>, vector<16x256xbf16>
    %1 = arith.extf %0 : vector<16x256xbf16> to vector<16x256xf32>
    %c0_1 = arith.constant 0 : index
    %c0_2 = arith.constant 0 : index
    %2 = vector.load %arg2[%c0_1, %c0_2] : memref<16x256xbf16, #tpu.memory_space<vmem>>, vector<16x256xbf16>
    %3 = arith.extf %2 : vector<16x256xbf16> to vector<16x256xf32>
    %4 = tpu.iota {dimensions = array<i32: 1>} : vector<1x256xi32>
    %c128_i32 = arith.constant 128 : i32
    %c0_i32 = arith.constant 0 : i32
    %5 = arith.cmpi eq, %c128_i32, %c0_i32 : i32
    %c1_i32 = arith.constant 1 : i32
    %6 = arith.select %5, %c1_i32, %c128_i32 : i32
    %7 = vector.broadcast %6 : i32 to vector<1x256xi32>
    %8 = arith.remsi %4, %7 : vector<1x256xi32>
    %c0_i32_3 = arith.constant 0 : i32
    %9 = vector.broadcast %c0_i32_3 : i32 to vector<1x256xi32>
    %10 = arith.cmpi ne, %8, %9 : vector<1x256xi32>
    %c0_i32_4 = arith.constant 0 : i32
    %11 = vector.broadcast %c0_i32_4 : i32 to vector<1x256xi32>
    %12 = arith.cmpi slt, %8, %11 : vector<1x256xi32>
    %c0_i32_5 = arith.constant 0 : i32
    %13 = arith.cmpi slt, %6, %c0_i32_5 : i32
    %14 = vector.broadcast %13 : i1 to vector<1x256xi1>
    %15 = vector.broadcast %14 : vector<1x256xi1> to vector<1x256xi1>
    %16 = arith.xori %12, %15 : vector<1x256xi1>
    %17 = arith.andi %16, %10 : vector<1x256xi1>
    %18 = vector.broadcast %6 : i32 to vector<1x256xi32>
    %19 = arith.addi %8, %18 : vector<1x256xi32>
    %20 = arith.select %17, %19, %8 : vector<1x256xi1>, vector<1x256xi32>
    %c0_i32_6 = arith.constant 0 : i32
    %21 = vector.broadcast %c0_i32_6 : i32 to vector<1x256xi32>
    %22 = arith.cmpi eq, %20, %21 : vector<1x256xi32>
    %c1_i32_7 = arith.constant 1 : i32
    %23 = tpu.dynamic_rotate %3 by %c1_i32_7 dim 1 : vector<16x256xf32>, i32 -> vector<16x256xf32>
    %cst = arith.constant 0.000000e+00 : f32
    %24 = vector.shape_cast %22 : vector<1x256xi1> to vector<1x256xi1>
    %25 = vector.broadcast %24 : vector<1x256xi1> to vector<16x256xi1>
    %26 = vector.broadcast %cst : f32 to vector<16x256xf32>
    %27 = arith.select %25, %26, %23 : vector<16x256xi1>, vector<16x256xf32>
    %c0_8 = arith.constant 0 : index
    %c0_9 = arith.constant 0 : index
    %28 = vector.load %arg3[%c0_8, %c0_9] : memref<16x16xf32, #tpu.memory_space<vmem>>, vector<16x16xf32>
    %cst_10 = arith.constant dense<0.000000e+00> : vector<16x256xf32>
    %29 = tpu.matmul %28, %27, %cst_10 {dimension_numbers = #tpu.dot_dimension_numbers<[1], [0], [0], [1], [0, 0, 1, 1], [], []>} : vector<16x16xf32>, vector<16x256xf32>, vector<16x256xf32> -> vector<16x256xf32>
    %c0_11 = arith.constant 0 : index
    %c0_12 = arith.constant 0 : index
    %30 = vector.load %arg4[%c0_11, %c0_12] : memref<16x16xf32, #tpu.memory_space<vmem>>, vector<16x16xf32>
    %cst_13 = arith.constant dense<0.000000e+00> : vector<16x256xf32>
    %31 = tpu.matmul %30, %1, %cst_13 {dimension_numbers = #tpu.dot_dimension_numbers<[1], [0], [0], [1], [0, 0, 1, 1], [], []>} : vector<16x16xf32>, vector<16x256xf32>, vector<16x256xf32> -> vector<16x256xf32>
    %32 = arith.addf %29, %31 : vector<16x256xf32>
    %c0_14 = arith.constant 0 : index
    %c0_15 = arith.constant 0 : index
    %33 = vector.load %arg5[%c0_14, %c0_15] : memref<16x16xf32, #tpu.memory_space<vmem>>, vector<16x16xf32>
    %cst_16 = arith.constant dense<0.000000e+00> : vector<16x256xf32>
    %34 = tpu.matmul %33, %3, %cst_16 {dimension_numbers = #tpu.dot_dimension_numbers<[1], [0], [0], [1], [0, 0, 1, 1], [], []>} : vector<16x16xf32>, vector<16x256xf32>, vector<16x256xf32> -> vector<16x256xf32>
    %35 = arith.addf %32, %34 : vector<16x256xf32>
    %c0_17 = arith.constant 0 : index
    %c0_18 = arith.constant 0 : index
    %36 = vector.load %arg6[%c0_17, %c0_18] : memref<16x16xf32, #tpu.memory_space<vmem>>, vector<16x16xf32>
    %cst_19 = arith.constant dense<0.000000e+00> : vector<16x256xf32>
    %37 = tpu.matmul %36, %1, %cst_19 {dimension_numbers = #tpu.dot_dimension_numbers<[1], [0], [0], [1], [0, 0, 1, 1], [], []>} : vector<16x16xf32>, vector<16x256xf32>, vector<16x256xf32> -> vector<16x256xf32>
    %cst_20 = arith.constant dense<0.000000e+00> : vector<16xf32>
    %38 = vector.multi_reduction <add>, %35, %cst_20 [1] : vector<16x256xf32> to vector<16xf32>
    %39 = vector.shape_cast %38 : vector<16xf32> to vector<16x1xf32>
    %cst_21 = arith.constant 2.560000e+02 : f32
    %40 = vector.broadcast %cst_21 : f32 to vector<16x1xf32>
    %41 = arith.divf %39, %40 : vector<16x1xf32>
    %42 = vector.broadcast %41 : vector<16x1xf32> to vector<16x256xf32>
    %43 = arith.subf %35, %42 : vector<16x256xf32>
    %44 = arith.mulf %43, %43 : vector<16x256xf32>
    %cst_22 = arith.constant dense<0.000000e+00> : vector<16xf32>
    %45 = vector.multi_reduction <add>, %44, %cst_22 [1] : vector<16x256xf32> to vector<16xf32>
    %46 = vector.shape_cast %45 : vector<16xf32> to vector<16x1xf32>
    %cst_23 = arith.constant 2.560000e+02 : f32
    %47 = vector.broadcast %cst_23 : f32 to vector<16x1xf32>
    %48 = arith.divf %46, %47 : vector<16x1xf32>
    %cst_24 = arith.constant dense<0.000000e+00> : vector<16xf32>
    %49 = vector.multi_reduction <add>, %37, %cst_24 [1] : vector<16x256xf32> to vector<16xf32>
    %50 = vector.shape_cast %49 : vector<16xf32> to vector<16x1xf32>
    %cst_25 = arith.constant 2.560000e+02 : f32
    %51 = vector.broadcast %cst_25 : f32 to vector<16x1xf32>
    %52 = arith.divf %50, %51 : vector<16x1xf32>
    %53 = vector.broadcast %52 : vector<16x1xf32> to vector<16x256xf32>
    %54 = arith.subf %37, %53 : vector<16x256xf32>
    %55 = arith.mulf %54, %54 : vector<16x256xf32>
    %cst_26 = arith.constant dense<0.000000e+00> : vector<16xf32>
    %56 = vector.multi_reduction <add>, %55, %cst_26 [1] : vector<16x256xf32> to vector<16xf32>
    %57 = vector.shape_cast %56 : vector<16xf32> to vector<16x1xf32>
    %cst_27 = arith.constant 2.560000e+02 : f32
    %58 = vector.broadcast %cst_27 : f32 to vector<16x1xf32>
    %59 = arith.divf %57, %58 : vector<16x1xf32>
    %60 = vector.broadcast %41 : vector<16x1xf32> to vector<16x256xf32>
    %61 = arith.subf %35, %60 : vector<16x256xf32>
    %c0_28 = arith.constant 0 : index
    %c0_29 = arith.constant 0 : index
    %62 = vector.load %arg7[%c0_28, %c0_29] : memref<16x1xf32, #tpu.memory_space<vmem>>, vector<16x1xf32>
    %cst_30 = arith.constant 9.99999974E-5 : f32
    %63 = vector.broadcast %cst_30 : f32 to vector<16x1xf32>
    %64 = arith.addf %48, %63 : vector<16x1xf32>
    %65 = math.rsqrt %64 : vector<16x1xf32>
    %66 = arith.mulf %62, %65 : vector<16x1xf32>
    %67 = vector.broadcast %66 : vector<16x1xf32> to vector<16x256xf32>
    %68 = arith.mulf %61, %67 : vector<16x256xf32>
    %c0_31 = arith.constant 0 : index
    %c0_32 = arith.constant 0 : index
    %69 = vector.load %arg8[%c0_31, %c0_32] : memref<16x1xf32, #tpu.memory_space<vmem>>, vector<16x1xf32>
    %70 = vector.broadcast %69 : vector<16x1xf32> to vector<16x256xf32>
    %71 = arith.addf %68, %70 : vector<16x256xf32>
    %72 = vector.broadcast %52 : vector<16x1xf32> to vector<16x256xf32>
    %73 = arith.subf %37, %72 : vector<16x256xf32>
    %c0_33 = arith.constant 0 : index
    %c0_34 = arith.constant 0 : index
    %74 = vector.load %arg9[%c0_33, %c0_34] : memref<16x1xf32, #tpu.memory_space<vmem>>, vector<16x1xf32>
    %cst_35 = arith.constant 9.99999974E-5 : f32
    %75 = vector.broadcast %cst_35 : f32 to vector<16x1xf32>
    %76 = arith.addf %59, %75 : vector<16x1xf32>
    %77 = math.rsqrt %76 : vector<16x1xf32>
    %78 = arith.mulf %74, %77 : vector<16x1xf32>
    %79 = vector.broadcast %78 : vector<16x1xf32> to vector<16x256xf32>
    %80 = arith.mulf %73, %79 : vector<16x256xf32>
    %c0_36 = arith.constant 0 : index
    %c0_37 = arith.constant 0 : index
    %81 = vector.load %arg10[%c0_36, %c0_37] : memref<16x1xf32, #tpu.memory_space<vmem>>, vector<16x1xf32>
    %82 = vector.broadcast %81 : vector<16x1xf32> to vector<16x256xf32>
    %83 = arith.addf %80, %82 : vector<16x256xf32>
    %84 = arith.addf %71, %83 : vector<16x256xf32>
    %cst_38 = arith.constant 5.000000e-01 : f32
    %85 = vector.broadcast %cst_38 : f32 to vector<16x256xf32>
    %86 = arith.mulf %84, %85 : vector<16x256xf32>
    %cst_39 = arith.constant 0.000000e+00 : f32
    %87 = vector.broadcast %cst_39 : f32 to vector<16x256xf32>
    %88 = arith.maximumf %86, %87 : vector<16x256xf32>
    %89 = arith.truncf %88 : vector<16x256xf32> to vector<16x256xbf16>
    %c0_40 = arith.constant 0 : index
    %c0_41 = arith.constant 0 : index
    %90 = vector.load %arg11[%c0_40, %c0_41] : memref<16x256xbf16, #tpu.memory_space<vmem>>, vector<16x256xbf16>
    tpu.vector_store %arg11[%c0_40, %c0_41], %89 {strides = array<i32>} : memref<16x256xbf16, #tpu.memory_space<vmem>>, vector<16x256xbf16>,
    return
  }
  func.func @transform_0(%arg0: i32) -> (i32, i32) {
    %c0_i32 = arith.constant 0 : i32
    %c0_i32_0 = arith.constant 0 : i32
    %c0_i32_1 = arith.constant 0 : i32
    return %c0_i32, %c0_i32_0 : i32, i32
  }
  func.func @transform_1(%arg0: i32) -> (i32, i32) {
    %c0_i32 = arith.constant 0 : i32
    %c0_i32_0 = arith.constant 0 : i32
    %c0_i32_1 = arith.constant 0 : i32
    return %c0_i32, %c0_i32_0 : i32, i32
  }
  func.func @transform_2(%arg0: i32) -> (i32, i32) {
    %c0_i32 = arith.constant 0 : i32
    %c0_i32_0 = arith.constant 0 : i32
    return %arg0, %c0_i32 : i32, i32
  }
  func.func @transform_3(%arg0: i32) -> (i32, i32) {
    %c0_i32 = arith.constant 0 : i32
    %c0_i32_0 = arith.constant 0 : i32
    return %arg0, %c0_i32 : i32, i32
  }
  func.func @transform_4(%arg0: i32) -> (i32, i32) {
    %c0_i32 = arith.constant 0 : i32
    %c0_i32_0 = arith.constant 0 : i32
    return %arg0, %c0_i32 : i32, i32
  }
  func.func @transform_5(%arg0: i32) -> (i32, i32) {
    %c0_i32 = arith.constant 0 : i32
    %c0_i32_0 = arith.constant 0 : i32
    return %arg0, %c0_i32 : i32, i32
  }
  func.func @transform_6(%arg0: i32) -> (i32, i32) {
    %c0_i32 = arith.constant 0 : i32
    %c0_i32_0 = arith.constant 0 : i32
    return %arg0, %c0_i32 : i32, i32
  }
  func.func @transform_7(%arg0: i32) -> (i32, i32) {
    %c0_i32 = arith.constant 0 : i32
    %c0_i32_0 = arith.constant 0 : i32
    return %arg0, %c0_i32 : i32, i32
  }
  func.func @transform_8(%arg0: i32) -> (i32, i32) {
    %c0_i32 = arith.constant 0 : i32
    %c0_i32_0 = arith.constant 0 : i32
    return %arg0, %c0_i32 : i32, i32
  }
  func.func @transform_9(%arg0: i32) -> (i32, i32) {
    %c0_i32 = arith.constant 0 : i32
    %c0_i32_0 = arith.constant 0 : i32
    return %arg0, %c0_i32 : i32, i32
  }
  func.func @transform_10(%arg0: i32) -> (i32, i32) {
    %c0_i32 = arith.constant 0 : i32
    %c0_i32_0 = arith.constant 0 : i32
    return %arg0, %c0_i32 : i32, i32
  }
}

module attributes {stable_mosaic.version = 11 : i64} {
  func.func @_layer_s1_kernel(%arg0: i32, %arg1: memref<32x256xbf16, #tpu.memory_space<vmem>>, %arg2: memref<16x32xf32, #tpu.memory_space<vmem>>, %arg3: memref<16x32xf32, #tpu.memory_space<vmem>>, %arg4: memref<16x32xf32, #tpu.memory_space<vmem>>, %arg5: memref<16x1xf32, #tpu.memory_space<vmem>>, %arg6: memref<16x1xf32, #tpu.memory_space<vmem>>, %arg7: memref<16x256xbf16, #tpu.memory_space<vmem>>) attributes {dimension_semantics = [#tpu.dimension_semantics<parallel>], iteration_bounds = array<i64: 2>, scalar_prefetch = 0 : i64, scratch_operands = 0 : i64, tpu.core_type = #tpu.core_type<tc>, window_params = [{pipeline_mode = #tpu.pipeline_mode<synchronous>, transform_indices = @transform_0, window_bounds = array<i64: 32, 256>}, {transform_indices = @transform_1, window_bounds = array<i64: 16, 32>}, {transform_indices = @transform_2, window_bounds = array<i64: 16, 32>}, {transform_indices = @transform_3, window_bounds = array<i64: 16, 32>}, {transform_indices = @transform_4, window_bounds = array<i64: 16, 1>}, {transform_indices = @transform_5, window_bounds = array<i64: 16, 1>}, {transform_indices = @transform_6, window_bounds = array<i64: 16, 256>}]} {
    %c0 = arith.constant 0 : index
    %c0_0 = arith.constant 0 : index
    %0 = vector.load %arg1[%c0, %c0_0] : memref<32x256xbf16, #tpu.memory_space<vmem>>, vector<32x256xbf16>
    %1 = arith.extf %0 : vector<32x256xbf16> to vector<32x256xf32>
    %2 = tpu.iota {dimensions = array<i32: 1>} : vector<1x256xi32>
    %c128_i32 = arith.constant 128 : i32
    %c0_i32 = arith.constant 0 : i32
    %3 = arith.cmpi eq, %c128_i32, %c0_i32 : i32
    %c1_i32 = arith.constant 1 : i32
    %4 = arith.select %3, %c1_i32, %c128_i32 : i32
    %5 = vector.broadcast %4 : i32 to vector<1x256xi32>
    %6 = arith.remsi %2, %5 : vector<1x256xi32>
    %c0_i32_1 = arith.constant 0 : i32
    %7 = vector.broadcast %c0_i32_1 : i32 to vector<1x256xi32>
    %8 = arith.cmpi ne, %6, %7 : vector<1x256xi32>
    %c0_i32_2 = arith.constant 0 : i32
    %9 = vector.broadcast %c0_i32_2 : i32 to vector<1x256xi32>
    %10 = arith.cmpi slt, %6, %9 : vector<1x256xi32>
    %c0_i32_3 = arith.constant 0 : i32
    %11 = arith.cmpi slt, %4, %c0_i32_3 : i32
    %12 = vector.broadcast %11 : i1 to vector<1x256xi1>
    %13 = vector.broadcast %12 : vector<1x256xi1> to vector<1x256xi1>
    %14 = arith.xori %10, %13 : vector<1x256xi1>
    %15 = arith.andi %14, %8 : vector<1x256xi1>
    %16 = vector.broadcast %4 : i32 to vector<1x256xi32>
    %17 = arith.addi %6, %16 : vector<1x256xi32>
    %18 = arith.select %15, %17, %6 : vector<1x256xi1>, vector<1x256xi32>
    %c0_i32_4 = arith.constant 0 : i32
    %19 = vector.broadcast %c0_i32_4 : i32 to vector<1x256xi32>
    %20 = arith.cmpi eq, %18, %19 : vector<1x256xi32>
    %c1_i32_5 = arith.constant 1 : i32
    %21 = tpu.dynamic_rotate %1 by %c1_i32_5 dim 1 : vector<32x256xf32>, i32 -> vector<32x256xf32>
    %cst = arith.constant 0.000000e+00 : f32
    %22 = vector.shape_cast %20 : vector<1x256xi1> to vector<1x256xi1>
    %23 = vector.broadcast %22 : vector<1x256xi1> to vector<32x256xi1>
    %24 = vector.broadcast %cst : f32 to vector<32x256xf32>
    %25 = arith.select %23, %24, %21 : vector<32x256xi1>, vector<32x256xf32>
    %c127_i32 = arith.constant 127 : i32
    %26 = vector.broadcast %c127_i32 : i32 to vector<1x256xi32>
    %27 = arith.cmpi eq, %18, %26 : vector<1x256xi32>
    %c255_i32 = arith.constant 255 : i32
    %28 = tpu.dynamic_rotate %1 by %c255_i32 dim 1 : vector<32x256xf32>, i32 -> vector<32x256xf32>
    %cst_6 = arith.constant 0.000000e+00 : f32
    %29 = vector.shape_cast %27 : vector<1x256xi1> to vector<1x256xi1>
    %30 = vector.broadcast %29 : vector<1x256xi1> to vector<32x256xi1>
    %31 = vector.broadcast %cst_6 : f32 to vector<32x256xf32>
    %32 = arith.select %30, %31, %28 : vector<32x256xi1>, vector<32x256xf32>
    %c0_7 = arith.constant 0 : index
    %c0_8 = arith.constant 0 : index
    %33 = vector.load %arg2[%c0_7, %c0_8] : memref<16x32xf32, #tpu.memory_space<vmem>>, vector<16x32xf32>
    %c0_9 = arith.constant 0 : index
    %c0_10 = arith.constant 0 : index
    %34 = vector.load %arg3[%c0_9, %c0_10] : memref<16x32xf32, #tpu.memory_space<vmem>>, vector<16x32xf32>
    %c0_11 = arith.constant 0 : index
    %c0_12 = arith.constant 0 : index
    %35 = vector.load %arg4[%c0_11, %c0_12] : memref<16x32xf32, #tpu.memory_space<vmem>>, vector<16x32xf32>
    %cst_13 = arith.constant dense<0.000000e+00> : vector<16x256xf32>
    %36 = tpu.matmul %33, %25, %cst_13 {dimension_numbers = #tpu.dot_dimension_numbers<[1], [0], [0], [1], [0, 0, 1, 1], [], []>} : vector<16x32xf32>, vector<32x256xf32>, vector<16x256xf32> -> vector<16x256xf32>
    %cst_14 = arith.constant dense<0.000000e+00> : vector<16x256xf32>
    %37 = tpu.matmul %34, %1, %cst_14 {dimension_numbers = #tpu.dot_dimension_numbers<[1], [0], [0], [1], [0, 0, 1, 1], [], []>} : vector<16x32xf32>, vector<32x256xf32>, vector<16x256xf32> -> vector<16x256xf32>
    %38 = arith.addf %36, %37 : vector<16x256xf32>
    %cst_15 = arith.constant dense<0.000000e+00> : vector<16x256xf32>
    %39 = tpu.matmul %35, %32, %cst_15 {dimension_numbers = #tpu.dot_dimension_numbers<[1], [0], [0], [1], [0, 0, 1, 1], [], []>} : vector<16x32xf32>, vector<32x256xf32>, vector<16x256xf32> -> vector<16x256xf32>
    %40 = arith.addf %38, %39 : vector<16x256xf32>
    %cst_16 = arith.constant dense<0.000000e+00> : vector<16xf32>
    %41 = vector.multi_reduction <add>, %40, %cst_16 [1] : vector<16x256xf32> to vector<16xf32>
    %42 = vector.shape_cast %41 : vector<16xf32> to vector<16x1xf32>
    %cst_17 = arith.constant 2.560000e+02 : f32
    %43 = vector.broadcast %cst_17 : f32 to vector<16x1xf32>
    %44 = arith.divf %42, %43 : vector<16x1xf32>
    %45 = vector.broadcast %44 : vector<16x1xf32> to vector<16x256xf32>
    %46 = arith.subf %40, %45 : vector<16x256xf32>
    %47 = arith.mulf %46, %46 : vector<16x256xf32>
    %cst_18 = arith.constant dense<0.000000e+00> : vector<16xf32>
    %48 = vector.multi_reduction <add>, %47, %cst_18 [1] : vector<16x256xf32> to vector<16xf32>
    %49 = vector.shape_cast %48 : vector<16xf32> to vector<16x1xf32>
    %cst_19 = arith.constant 2.560000e+02 : f32
    %50 = vector.broadcast %cst_19 : f32 to vector<16x1xf32>
    %51 = arith.divf %49, %50 : vector<16x1xf32>
    %c0_20 = arith.constant 0 : index
    %c0_21 = arith.constant 0 : index
    %52 = vector.load %arg5[%c0_20, %c0_21] : memref<16x1xf32, #tpu.memory_space<vmem>>, vector<16x1xf32>
    %cst_22 = arith.constant 9.99999974E-5 : f32
    %53 = vector.broadcast %cst_22 : f32 to vector<16x1xf32>
    %54 = arith.addf %51, %53 : vector<16x1xf32>
    %55 = math.rsqrt %54 : vector<16x1xf32>
    %56 = arith.mulf %52, %55 : vector<16x1xf32>
    %57 = vector.broadcast %44 : vector<16x1xf32> to vector<16x256xf32>
    %58 = arith.subf %40, %57 : vector<16x256xf32>
    %59 = vector.broadcast %56 : vector<16x1xf32> to vector<16x256xf32>
    %60 = arith.mulf %58, %59 : vector<16x256xf32>
    %c0_23 = arith.constant 0 : index
    %c0_24 = arith.constant 0 : index
    %61 = vector.load %arg6[%c0_23, %c0_24] : memref<16x1xf32, #tpu.memory_space<vmem>>, vector<16x1xf32>
    %62 = vector.broadcast %61 : vector<16x1xf32> to vector<16x256xf32>
    %63 = arith.addf %60, %62 : vector<16x256xf32>
    %c16_i32 = arith.constant 16 : i32
    %64 = arith.muli %arg0, %c16_i32 : i32
    %65 = tpu.assume_multiple %64, 8 : i32
    %66 = arith.index_cast %65 : i32 to index
    %c0_25 = arith.constant 0 : index
    %67 = vector.load %arg1[%66, %c0_25] : memref<32x256xbf16, #tpu.memory_space<vmem>>, vector<16x256xbf16>
    %68 = arith.extf %67 : vector<16x256xbf16> to vector<16x256xf32>
    %69 = arith.addf %63, %68 : vector<16x256xf32>
    %cst_26 = arith.constant 5.000000e-01 : f32
    %70 = vector.broadcast %cst_26 : f32 to vector<16x256xf32>
    %71 = arith.mulf %69, %70 : vector<16x256xf32>
    %cst_27 = arith.constant 0.000000e+00 : f32
    %72 = vector.broadcast %cst_27 : f32 to vector<16x256xf32>
    %73 = arith.maximumf %71, %72 : vector<16x256xf32>
    %74 = arith.truncf %73 : vector<16x256xf32> to vector<16x256xbf16>
    %c0_28 = arith.constant 0 : index
    %c0_29 = arith.constant 0 : index
    %75 = vector.load %arg7[%c0_28, %c0_29] : memref<16x256xbf16, #tpu.memory_space<vmem>>, vector<16x256xbf16>
    tpu.vector_store %arg7[%c0_28, %c0_29], %74 {strides = array<i32>} : memref<16x256xbf16, #tpu.memory_space<vmem>>, vector<16x256xbf16>,
    return
  }
  func.func @transform_0(%arg0: i32) -> (i32, i32) {
    %c0_i32 = arith.constant 0 : i32
    %c0_i32_0 = arith.constant 0 : i32
    %c0_i32_1 = arith.constant 0 : i32
    return %c0_i32, %c0_i32_0 : i32, i32
  }
  func.func @transform_1(%arg0: i32) -> (i32, i32) {
    %c0_i32 = arith.constant 0 : i32
    %c0_i32_0 = arith.constant 0 : i32
    return %arg0, %c0_i32 : i32, i32
  }
  func.func @transform_2(%arg0: i32) -> (i32, i32) {
    %c0_i32 = arith.constant 0 : i32
    %c0_i32_0 = arith.constant 0 : i32
    return %arg0, %c0_i32 : i32, i32
  }
  func.func @transform_3(%arg0: i32) -> (i32, i32) {
    %c0_i32 = arith.constant 0 : i32
    %c0_i32_0 = arith.constant 0 : i32
    return %arg0, %c0_i32 : i32, i32
  }
  func.func @transform_4(%arg0: i32) -> (i32, i32) {
    %c0_i32 = arith.constant 0 : i32
    %c0_i32_0 = arith.constant 0 : i32
    return %arg0, %c0_i32 : i32, i32
  }
  func.func @transform_5(%arg0: i32) -> (i32, i32) {
    %c0_i32 = arith.constant 0 : i32
    %c0_i32_0 = arith.constant 0 : i32
    return %arg0, %c0_i32 : i32, i32
  }
  func.func @transform_6(%arg0: i32) -> (i32, i32) {
    %c0_i32 = arith.constant 0 : i32
    %c0_i32_0 = arith.constant 0 : i32
    return %arg0, %c0_i32 : i32, i32
  }
}

module attributes {stable_mosaic.version = 11 : i64} {
  func.func @_decoder_kernel(%arg0: i32, %arg1: memref<32x256xbf16, #tpu.memory_space<vmem>>, %arg2: memref<8x32xf32, #tpu.memory_space<vmem>>, %arg3: memref<8x32xf32, #tpu.memory_space<vmem>>, %arg4: memref<8x32xf32, #tpu.memory_space<vmem>>, %arg5: memref<8x32xf32, #tpu.memory_space<vmem>>, %arg6: memref<8x1xf32, #tpu.memory_space<vmem>>, %arg7: memref<8x1xf32, #tpu.memory_space<vmem>>, %arg8: memref<8x256xbf16, #tpu.memory_space<vmem>>, %arg9: memref<8x256xbf16, #tpu.memory_space<vmem>>) attributes {dimension_semantics = [#tpu.dimension_semantics<parallel>], iteration_bounds = array<i64: 2>, scalar_prefetch = 0 : i64, scratch_operands = 0 : i64, tpu.core_type = #tpu.core_type<tc>, window_params = [{pipeline_mode = #tpu.pipeline_mode<synchronous>, transform_indices = @transform_0, window_bounds = array<i64: 32, 256>}, {transform_indices = @transform_1, window_bounds = array<i64: 8, 32>}, {transform_indices = @transform_2, window_bounds = array<i64: 8, 32>}, {transform_indices = @transform_3, window_bounds = array<i64: 8, 32>}, {transform_indices = @transform_4, window_bounds = array<i64: 8, 32>}, {transform_indices = @transform_5, window_bounds = array<i64: 8, 1>}, {transform_indices = @transform_6, window_bounds = array<i64: 8, 1>}, {transform_indices = @transform_7, window_bounds = array<i64: 8, 256>}, {transform_indices = @transform_8, window_bounds = array<i64: 8, 256>}]} {
    %c0 = arith.constant 0 : index
    %c0_0 = arith.constant 0 : index
    %0 = vector.load %arg1[%c0, %c0_0] : memref<32x256xbf16, #tpu.memory_space<vmem>>, vector<32x256xbf16>
    %1 = arith.extf %0 : vector<32x256xbf16> to vector<32x256xf32>
    %2 = tpu.iota {dimensions = array<i32: 1>} : vector<1x256xi32>
    %c128_i32 = arith.constant 128 : i32
    %c0_i32 = arith.constant 0 : i32
    %3 = arith.cmpi eq, %c128_i32, %c0_i32 : i32
    %c1_i32 = arith.constant 1 : i32
    %4 = arith.select %3, %c1_i32, %c128_i32 : i32
    %5 = vector.broadcast %4 : i32 to vector<1x256xi32>
    %6 = arith.remsi %2, %5 : vector<1x256xi32>
    %c0_i32_1 = arith.constant 0 : i32
    %7 = vector.broadcast %c0_i32_1 : i32 to vector<1x256xi32>
    %8 = arith.cmpi ne, %6, %7 : vector<1x256xi32>
    %c0_i32_2 = arith.constant 0 : i32
    %9 = vector.broadcast %c0_i32_2 : i32 to vector<1x256xi32>
    %10 = arith.cmpi slt, %6, %9 : vector<1x256xi32>
    %c0_i32_3 = arith.constant 0 : i32
    %11 = arith.cmpi slt, %4, %c0_i32_3 : i32
    %12 = vector.broadcast %11 : i1 to vector<1x256xi1>
    %13 = vector.broadcast %12 : vector<1x256xi1> to vector<1x256xi1>
    %14 = arith.xori %10, %13 : vector<1x256xi1>
    %15 = arith.andi %14, %8 : vector<1x256xi1>
    %16 = vector.broadcast %4 : i32 to vector<1x256xi32>
    %17 = arith.addi %6, %16 : vector<1x256xi32>
    %18 = arith.select %15, %17, %6 : vector<1x256xi1>, vector<1x256xi32>
    %c0_i32_4 = arith.constant 0 : i32
    %19 = vector.broadcast %c0_i32_4 : i32 to vector<1x256xi32>
    %20 = arith.cmpi eq, %18, %19 : vector<1x256xi32>
    %c1_i32_5 = arith.constant 1 : i32
    %21 = tpu.dynamic_rotate %1 by %c1_i32_5 dim 1 : vector<32x256xf32>, i32 -> vector<32x256xf32>
    %cst = arith.constant 0.000000e+00 : f32
    %22 = vector.shape_cast %20 : vector<1x256xi1> to vector<1x256xi1>
    %23 = vector.broadcast %22 : vector<1x256xi1> to vector<32x256xi1>
    %24 = vector.broadcast %cst : f32 to vector<32x256xf32>
    %25 = arith.select %23, %24, %21 : vector<32x256xi1>, vector<32x256xf32>
    %c127_i32 = arith.constant 127 : i32
    %26 = vector.broadcast %c127_i32 : i32 to vector<1x256xi32>
    %27 = arith.cmpi eq, %18, %26 : vector<1x256xi32>
    %c255_i32 = arith.constant 255 : i32
    %28 = tpu.dynamic_rotate %1 by %c255_i32 dim 1 : vector<32x256xf32>, i32 -> vector<32x256xf32>
    %cst_6 = arith.constant 0.000000e+00 : f32
    %29 = vector.shape_cast %27 : vector<1x256xi1> to vector<1x256xi1>
    %30 = vector.broadcast %29 : vector<1x256xi1> to vector<32x256xi1>
    %31 = vector.broadcast %cst_6 : f32 to vector<32x256xf32>
    %32 = arith.select %30, %31, %28 : vector<32x256xi1>, vector<32x256xf32>
    %c0_7 = arith.constant 0 : index
    %c0_8 = arith.constant 0 : index
    %33 = vector.load %arg2[%c0_7, %c0_8] : memref<8x32xf32, #tpu.memory_space<vmem>>, vector<8x32xf32>
    %cst_9 = arith.constant dense<0.000000e+00> : vector<8x256xf32>
    %34 = tpu.matmul %33, %1, %cst_9 {dimension_numbers = #tpu.dot_dimension_numbers<[1], [0], [0], [1], [0, 0, 1, 1], [], []>} : vector<8x32xf32>, vector<32x256xf32>, vector<8x256xf32> -> vector<8x256xf32>
    %c0_10 = arith.constant 0 : index
    %c0_11 = arith.constant 0 : index
    %35 = vector.load %arg3[%c0_10, %c0_11] : memref<8x32xf32, #tpu.memory_space<vmem>>, vector<8x32xf32>
    %cst_12 = arith.constant dense<0.000000e+00> : vector<8x256xf32>
    %36 = tpu.matmul %35, %25, %cst_12 {dimension_numbers = #tpu.dot_dimension_numbers<[1], [0], [0], [1], [0, 0, 1, 1], [], []>} : vector<8x32xf32>, vector<32x256xf32>, vector<8x256xf32> -> vector<8x256xf32>
    %37 = arith.addf %34, %36 : vector<8x256xf32>
    %c0_13 = arith.constant 0 : index
    %c0_14 = arith.constant 0 : index
    %38 = vector.load %arg4[%c0_13, %c0_14] : memref<8x32xf32, #tpu.memory_space<vmem>>, vector<8x32xf32>
    %cst_15 = arith.constant dense<0.000000e+00> : vector<8x256xf32>
    %39 = tpu.matmul %38, %1, %cst_15 {dimension_numbers = #tpu.dot_dimension_numbers<[1], [0], [0], [1], [0, 0, 1, 1], [], []>} : vector<8x32xf32>, vector<32x256xf32>, vector<8x256xf32> -> vector<8x256xf32>
    %c0_16 = arith.constant 0 : index
    %c0_17 = arith.constant 0 : index
    %40 = vector.load %arg5[%c0_16, %c0_17] : memref<8x32xf32, #tpu.memory_space<vmem>>, vector<8x32xf32>
    %cst_18 = arith.constant dense<0.000000e+00> : vector<8x256xf32>
    %41 = tpu.matmul %40, %32, %cst_18 {dimension_numbers = #tpu.dot_dimension_numbers<[1], [0], [0], [1], [0, 0, 1, 1], [], []>} : vector<8x32xf32>, vector<32x256xf32>, vector<8x256xf32> -> vector<8x256xf32>
    %42 = arith.addf %39, %41 : vector<8x256xf32>
    %cst_19 = arith.constant dense<0.000000e+00> : vector<8xf32>
    %43 = vector.multi_reduction <add>, %37, %cst_19 [1] : vector<8x256xf32> to vector<8xf32>
    %44 = vector.shape_cast %43 : vector<8xf32> to vector<8x1xf32>
    %cst_20 = arith.constant dense<0.000000e+00> : vector<8xf32>
    %45 = vector.multi_reduction <add>, %42, %cst_20 [1] : vector<8x256xf32> to vector<8xf32>
    %46 = vector.shape_cast %45 : vector<8xf32> to vector<8x1xf32>
    %47 = arith.addf %44, %46 : vector<8x1xf32>
    %cst_21 = arith.constant 5.120000e+02 : f32
    %48 = vector.broadcast %cst_21 : f32 to vector<8x1xf32>
    %49 = arith.divf %47, %48 : vector<8x1xf32>
    %50 = vector.broadcast %49 : vector<8x1xf32> to vector<8x256xf32>
    %51 = arith.subf %37, %50 : vector<8x256xf32>
    %52 = arith.mulf %51, %51 : vector<8x256xf32>
    %cst_22 = arith.constant dense<0.000000e+00> : vector<8xf32>
    %53 = vector.multi_reduction <add>, %52, %cst_22 [1] : vector<8x256xf32> to vector<8xf32>
    %54 = vector.shape_cast %53 : vector<8xf32> to vector<8x1xf32>
    %55 = vector.broadcast %49 : vector<8x1xf32> to vector<8x256xf32>
    %56 = arith.subf %42, %55 : vector<8x256xf32>
    %57 = arith.mulf %56, %56 : vector<8x256xf32>
    %cst_23 = arith.constant dense<0.000000e+00> : vector<8xf32>
    %58 = vector.multi_reduction <add>, %57, %cst_23 [1] : vector<8x256xf32> to vector<8xf32>
    %59 = vector.shape_cast %58 : vector<8xf32> to vector<8x1xf32>
    %60 = arith.addf %54, %59 : vector<8x1xf32>
    %cst_24 = arith.constant 5.120000e+02 : f32
    %61 = vector.broadcast %cst_24 : f32 to vector<8x1xf32>
    %62 = arith.divf %60, %61 : vector<8x1xf32>
    %c0_25 = arith.constant 0 : index
    %c0_26 = arith.constant 0 : index
    %63 = vector.load %arg6[%c0_25, %c0_26] : memref<8x1xf32, #tpu.memory_space<vmem>>, vector<8x1xf32>
    %cst_27 = arith.constant 9.99999974E-6 : f32
    %64 = vector.broadcast %cst_27 : f32 to vector<8x1xf32>
    %65 = arith.addf %62, %64 : vector<8x1xf32>
    %66 = math.rsqrt %65 : vector<8x1xf32>
    %67 = arith.mulf %63, %66 : vector<8x1xf32>
    %c0_28 = arith.constant 0 : index
    %c0_29 = arith.constant 0 : index
    %68 = vector.load %arg7[%c0_28, %c0_29] : memref<8x1xf32, #tpu.memory_space<vmem>>, vector<8x1xf32>
    %69 = arith.mulf %49, %67 : vector<8x1xf32>
    %70 = arith.subf %68, %69 : vector<8x1xf32>
    %71 = vector.broadcast %67 : vector<8x1xf32> to vector<8x256xf32>
    %72 = arith.mulf %37, %71 : vector<8x256xf32>
    %73 = vector.broadcast %70 : vector<8x1xf32> to vector<8x256xf32>
    %74 = arith.addf %72, %73 : vector<8x256xf32>
    %cst_30 = arith.constant 0.000000e+00 : f32
    %75 = vector.broadcast %cst_30 : f32 to vector<8x256xf32>
    %76 = arith.maximumf %74, %75 : vector<8x256xf32>
    %77 = arith.truncf %76 : vector<8x256xf32> to vector<8x256xbf16>
    %c0_31 = arith.constant 0 : index
    %c0_32 = arith.constant 0 : index
    %78 = vector.load %arg8[%c0_31, %c0_32] : memref<8x256xbf16, #tpu.memory_space<vmem>>, vector<8x256xbf16>
    tpu.vector_store %arg8[%c0_31, %c0_32], %77 {strides = array<i32>} : memref<8x256xbf16, #tpu.memory_space<vmem>>, vector<8x256xbf16>,
    %79 = vector.broadcast %67 : vector<8x1xf32> to vector<8x256xf32>
    %80 = arith.mulf %42, %79 : vector<8x256xf32>
    %81 = vector.broadcast %70 : vector<8x1xf32> to vector<8x256xf32>
    %82 = arith.addf %80, %81 : vector<8x256xf32>
    %cst_33 = arith.constant 0.000000e+00 : f32
    %83 = vector.broadcast %cst_33 : f32 to vector<8x256xf32>
    %84 = arith.maximumf %82, %83 : vector<8x256xf32>
    %85 = arith.truncf %84 : vector<8x256xf32> to vector<8x256xbf16>
    %c0_34 = arith.constant 0 : index
    %c0_35 = arith.constant 0 : index
    %86 = vector.load %arg9[%c0_34, %c0_35] : memref<8x256xbf16, #tpu.memory_space<vmem>>, vector<8x256xbf16>
    tpu.vector_store %arg9[%c0_34, %c0_35], %85 {strides = array<i32>} : memref<8x256xbf16, #tpu.memory_space<vmem>>, vector<8x256xbf16>,
    return
  }
  func.func @transform_0(%arg0: i32) -> (i32, i32) {
    %c0_i32 = arith.constant 0 : i32
    %c0_i32_0 = arith.constant 0 : i32
    %c0_i32_1 = arith.constant 0 : i32
    return %c0_i32, %c0_i32_0 : i32, i32
  }
  func.func @transform_1(%arg0: i32) -> (i32, i32) {
    %c0_i32 = arith.constant 0 : i32
    %c0_i32_0 = arith.constant 0 : i32
    return %arg0, %c0_i32 : i32, i32
  }
  func.func @transform_2(%arg0: i32) -> (i32, i32) {
    %c0_i32 = arith.constant 0 : i32
    %c0_i32_0 = arith.constant 0 : i32
    return %arg0, %c0_i32 : i32, i32
  }
  func.func @transform_3(%arg0: i32) -> (i32, i32) {
    %c0_i32 = arith.constant 0 : i32
    %c0_i32_0 = arith.constant 0 : i32
    return %arg0, %c0_i32 : i32, i32
  }
  func.func @transform_4(%arg0: i32) -> (i32, i32) {
    %c0_i32 = arith.constant 0 : i32
    %c0_i32_0 = arith.constant 0 : i32
    return %arg0, %c0_i32 : i32, i32
  }
  func.func @transform_5(%arg0: i32) -> (i32, i32) {
    %c0_i32 = arith.constant 0 : i32
    %c0_i32_0 = arith.constant 0 : i32
    return %arg0, %c0_i32 : i32, i32
  }
  func.func @transform_6(%arg0: i32) -> (i32, i32) {
    %c0_i32 = arith.constant 0 : i32
    %c0_i32_0 = arith.constant 0 : i32
    return %arg0, %c0_i32 : i32, i32
  }
  func.func @transform_7(%arg0: i32) -> (i32, i32) {
    %c0_i32 = arith.constant 0 : i32
    %c0_i32_0 = arith.constant 0 : i32
    return %arg0, %c0_i32 : i32, i32
  }
  func.func @transform_8(%arg0: i32) -> (i32, i32) {
    %c0_i32 = arith.constant 0 : i32
    %c0_i32_0 = arith.constant 0 : i32
    return %arg0, %c0_i32 : i32, i32
  }
}

module attributes {stable_mosaic.version = 11 : i64} {
  func.func @_decoder_final_kernel(%arg0: i32, %arg1: memref<16x512xbf16, #tpu.memory_space<vmem>>, %arg2: memref<8x16xf32, #tpu.memory_space<vmem>>, %arg3: memref<8x16xf32, #tpu.memory_space<vmem>>, %arg4: memref<8x16xf32, #tpu.memory_space<vmem>>, %arg5: memref<8x16xf32, #tpu.memory_space<vmem>>, %arg6: memref<8x1xf32, #tpu.memory_space<vmem>>, %arg7: memref<8x1xf32, #tpu.memory_space<vmem>>, %arg8: memref<8x1xf32, #tpu.memory_space<vmem>>, %arg9: memref<1x512xf32, #tpu.memory_space<vmem>>, %arg10: memref<1x512xf32, #tpu.memory_space<vmem>>) attributes {dimension_semantics = [#tpu.dimension_semantics<parallel>], iteration_bounds = array<i64: 1>, scalar_prefetch = 0 : i64, scratch_operands = 0 : i64, tpu.core_type = #tpu.core_type<tc>, window_params = [{pipeline_mode = #tpu.pipeline_mode<synchronous>, transform_indices = @transform_0, window_bounds = array<i64: 16, 512>}, {pipeline_mode = #tpu.pipeline_mode<synchronous>, transform_indices = @transform_1, window_bounds = array<i64: 8, 16>}, {pipeline_mode = #tpu.pipeline_mode<synchronous>, transform_indices = @transform_2, window_bounds = array<i64: 8, 16>}, {pipeline_mode = #tpu.pipeline_mode<synchronous>, transform_indices = @transform_3, window_bounds = array<i64: 8, 16>}, {pipeline_mode = #tpu.pipeline_mode<synchronous>, transform_indices = @transform_4, window_bounds = array<i64: 8, 16>}, {pipeline_mode = #tpu.pipeline_mode<synchronous>, transform_indices = @transform_5, window_bounds = array<i64: 8, 1>}, {pipeline_mode = #tpu.pipeline_mode<synchronous>, transform_indices = @transform_6, window_bounds = array<i64: 8, 1>}, {pipeline_mode = #tpu.pipeline_mode<synchronous>, transform_indices = @transform_7, window_bounds = array<i64: 8, 1>}, {pipeline_mode = #tpu.pipeline_mode<synchronous>, transform_indices = @transform_8, window_bounds = array<i64: 1, 512>}, {pipeline_mode = #tpu.pipeline_mode<synchronous>, transform_indices = @transform_9, window_bounds = array<i64: 1, 512>}]} {
    %c0 = arith.constant 0 : index
    %c0_0 = arith.constant 0 : index
    %0 = vector.load %arg1[%c0, %c0_0] : memref<16x512xbf16, #tpu.memory_space<vmem>>, vector<16x512xbf16>
    %1 = arith.extf %0 : vector<16x512xbf16> to vector<16x512xf32>
    %2 = tpu.iota {dimensions = array<i32: 1>} : vector<1x512xi32>
    %c256_i32 = arith.constant 256 : i32
    %c0_i32 = arith.constant 0 : i32
    %3 = arith.cmpi eq, %c256_i32, %c0_i32 : i32
    %c1_i32 = arith.constant 1 : i32
    %4 = arith.select %3, %c1_i32, %c256_i32 : i32
    %5 = vector.broadcast %4 : i32 to vector<1x512xi32>
    %6 = arith.remsi %2, %5 : vector<1x512xi32>
    %c0_i32_1 = arith.constant 0 : i32
    %7 = vector.broadcast %c0_i32_1 : i32 to vector<1x512xi32>
    %8 = arith.cmpi ne, %6, %7 : vector<1x512xi32>
    %c0_i32_2 = arith.constant 0 : i32
    %9 = vector.broadcast %c0_i32_2 : i32 to vector<1x512xi32>
    %10 = arith.cmpi slt, %6, %9 : vector<1x512xi32>
    %c0_i32_3 = arith.constant 0 : i32
    %11 = arith.cmpi slt, %4, %c0_i32_3 : i32
    %12 = vector.broadcast %11 : i1 to vector<1x512xi1>
    %13 = vector.broadcast %12 : vector<1x512xi1> to vector<1x512xi1>
    %14 = arith.xori %10, %13 : vector<1x512xi1>
    %15 = arith.andi %14, %8 : vector<1x512xi1>
    %16 = vector.broadcast %4 : i32 to vector<1x512xi32>
    %17 = arith.addi %6, %16 : vector<1x512xi32>
    %18 = arith.select %15, %17, %6 : vector<1x512xi1>, vector<1x512xi32>
    %c0_i32_4 = arith.constant 0 : i32
    %19 = vector.broadcast %c0_i32_4 : i32 to vector<1x512xi32>
    %20 = arith.cmpi eq, %18, %19 : vector<1x512xi32>
    %c1_i32_5 = arith.constant 1 : i32
    %21 = tpu.dynamic_rotate %1 by %c1_i32_5 dim 1 : vector<16x512xf32>, i32 -> vector<16x512xf32>
    %cst = arith.constant 0.000000e+00 : f32
    %22 = vector.shape_cast %20 : vector<1x512xi1> to vector<1x512xi1>
    %23 = vector.broadcast %22 : vector<1x512xi1> to vector<16x512xi1>
    %24 = vector.broadcast %cst : f32 to vector<16x512xf32>
    %25 = arith.select %23, %24, %21 : vector<16x512xi1>, vector<16x512xf32>
    %c255_i32 = arith.constant 255 : i32
    %26 = vector.broadcast %c255_i32 : i32 to vector<1x512xi32>
    %27 = arith.cmpi eq, %18, %26 : vector<1x512xi32>
    %c511_i32 = arith.constant 511 : i32
    %28 = tpu.dynamic_rotate %1 by %c511_i32 dim 1 : vector<16x512xf32>, i32 -> vector<16x512xf32>
    %cst_6 = arith.constant 0.000000e+00 : f32
    %29 = vector.shape_cast %27 : vector<1x512xi1> to vector<1x512xi1>
    %30 = vector.broadcast %29 : vector<1x512xi1> to vector<16x512xi1>
    %31 = vector.broadcast %cst_6 : f32 to vector<16x512xf32>
    %32 = arith.select %30, %31, %28 : vector<16x512xi1>, vector<16x512xf32>
    %c0_7 = arith.constant 0 : index
    %c0_8 = arith.constant 0 : index
    %33 = vector.load %arg2[%c0_7, %c0_8] : memref<8x16xf32, #tpu.memory_space<vmem>>, vector<8x16xf32>
    %cst_9 = arith.constant dense<0.000000e+00> : vector<8x512xf32>
    %34 = tpu.matmul %33, %1, %cst_9 {dimension_numbers = #tpu.dot_dimension_numbers<[1], [0], [0], [1], [0, 0, 1, 1], [], []>} : vector<8x16xf32>, vector<16x512xf32>, vector<8x512xf32> -> vector<8x512xf32>
    %c0_10 = arith.constant 0 : index
    %c0_11 = arith.constant 0 : index
    %35 = vector.load %arg3[%c0_10, %c0_11] : memref<8x16xf32, #tpu.memory_space<vmem>>, vector<8x16xf32>
    %cst_12 = arith.constant dense<0.000000e+00> : vector<8x512xf32>
    %36 = tpu.matmul %35, %25, %cst_12 {dimension_numbers = #tpu.dot_dimension_numbers<[1], [0], [0], [1], [0, 0, 1, 1], [], []>} : vector<8x16xf32>, vector<16x512xf32>, vector<8x512xf32> -> vector<8x512xf32>
    %37 = arith.addf %34, %36 : vector<8x512xf32>
    %c0_13 = arith.constant 0 : index
    %c0_14 = arith.constant 0 : index
    %38 = vector.load %arg4[%c0_13, %c0_14] : memref<8x16xf32, #tpu.memory_space<vmem>>, vector<8x16xf32>
    %cst_15 = arith.constant dense<0.000000e+00> : vector<8x512xf32>
    %39 = tpu.matmul %38, %1, %cst_15 {dimension_numbers = #tpu.dot_dimension_numbers<[1], [0], [0], [1], [0, 0, 1, 1], [], []>} : vector<8x16xf32>, vector<16x512xf32>, vector<8x512xf32> -> vector<8x512xf32>
    %c0_16 = arith.constant 0 : index
    %c0_17 = arith.constant 0 : index
    %40 = vector.load %arg5[%c0_16, %c0_17] : memref<8x16xf32, #tpu.memory_space<vmem>>, vector<8x16xf32>
    %cst_18 = arith.constant dense<0.000000e+00> : vector<8x512xf32>
    %41 = tpu.matmul %40, %32, %cst_18 {dimension_numbers = #tpu.dot_dimension_numbers<[1], [0], [0], [1], [0, 0, 1, 1], [], []>} : vector<8x16xf32>, vector<16x512xf32>, vector<8x512xf32> -> vector<8x512xf32>
    %42 = arith.addf %39, %41 : vector<8x512xf32>
    %cst_19 = arith.constant dense<0.000000e+00> : vector<8xf32>
    %43 = vector.multi_reduction <add>, %37, %cst_19 [1] : vector<8x512xf32> to vector<8xf32>
    %44 = vector.shape_cast %43 : vector<8xf32> to vector<8x1xf32>
    %cst_20 = arith.constant dense<0.000000e+00> : vector<8xf32>
    %45 = vector.multi_reduction <add>, %42, %cst_20 [1] : vector<8x512xf32> to vector<8xf32>
    %46 = vector.shape_cast %45 : vector<8xf32> to vector<8x1xf32>
    %47 = arith.addf %44, %46 : vector<8x1xf32>
    %cst_21 = arith.constant 1.024000e+03 : f32
    %48 = vector.broadcast %cst_21 : f32 to vector<8x1xf32>
    %49 = arith.divf %47, %48 : vector<8x1xf32>
    %50 = vector.broadcast %49 : vector<8x1xf32> to vector<8x512xf32>
    %51 = arith.subf %37, %50 : vector<8x512xf32>
    %52 = arith.mulf %51, %51 : vector<8x512xf32>
    %cst_22 = arith.constant dense<0.000000e+00> : vector<8xf32>
    %53 = vector.multi_reduction <add>, %52, %cst_22 [1] : vector<8x512xf32> to vector<8xf32>
    %54 = vector.shape_cast %53 : vector<8xf32> to vector<8x1xf32>
    %55 = vector.broadcast %49 : vector<8x1xf32> to vector<8x512xf32>
    %56 = arith.subf %42, %55 : vector<8x512xf32>
    %57 = arith.mulf %56, %56 : vector<8x512xf32>
    %cst_23 = arith.constant dense<0.000000e+00> : vector<8xf32>
    %58 = vector.multi_reduction <add>, %57, %cst_23 [1] : vector<8x512xf32> to vector<8xf32>
    %59 = vector.shape_cast %58 : vector<8xf32> to vector<8x1xf32>
    %60 = arith.addf %54, %59 : vector<8x1xf32>
    %cst_24 = arith.constant 1.024000e+03 : f32
    %61 = vector.broadcast %cst_24 : f32 to vector<8x1xf32>
    %62 = arith.divf %60, %61 : vector<8x1xf32>
    %c0_25 = arith.constant 0 : index
    %c0_26 = arith.constant 0 : index
    %63 = vector.load %arg6[%c0_25, %c0_26] : memref<8x1xf32, #tpu.memory_space<vmem>>, vector<8x1xf32>
    %cst_27 = arith.constant 9.99999974E-6 : f32
    %64 = vector.broadcast %cst_27 : f32 to vector<8x1xf32>
    %65 = arith.addf %62, %64 : vector<8x1xf32>
    %66 = math.rsqrt %65 : vector<8x1xf32>
    %67 = arith.mulf %63, %66 : vector<8x1xf32>
    %c0_28 = arith.constant 0 : index
    %c0_29 = arith.constant 0 : index
    %68 = vector.load %arg7[%c0_28, %c0_29] : memref<8x1xf32, #tpu.memory_space<vmem>>, vector<8x1xf32>
    %69 = arith.mulf %49, %67 : vector<8x1xf32>
    %70 = arith.subf %68, %69 : vector<8x1xf32>
    %71 = vector.broadcast %67 : vector<8x1xf32> to vector<8x512xf32>
    %72 = arith.mulf %37, %71 : vector<8x512xf32>
    %73 = vector.broadcast %70 : vector<8x1xf32> to vector<8x512xf32>
    %74 = arith.addf %72, %73 : vector<8x512xf32>
    %cst_30 = arith.constant 0.000000e+00 : f32
    %75 = vector.broadcast %cst_30 : f32 to vector<8x512xf32>
    %76 = arith.maximumf %74, %75 : vector<8x512xf32>
    %77 = vector.broadcast %67 : vector<8x1xf32> to vector<8x512xf32>
    %78 = arith.mulf %42, %77 : vector<8x512xf32>
    %79 = vector.broadcast %70 : vector<8x1xf32> to vector<8x512xf32>
    %80 = arith.addf %78, %79 : vector<8x512xf32>
    %cst_31 = arith.constant 0.000000e+00 : f32
    %81 = vector.broadcast %cst_31 : f32 to vector<8x512xf32>
    %82 = arith.maximumf %80, %81 : vector<8x512xf32>
    %c0_32 = arith.constant 0 : index
    %c0_33 = arith.constant 0 : index
    %83 = vector.load %arg8[%c0_32, %c0_33] : memref<8x1xf32, #tpu.memory_space<vmem>>, vector<8x1xf32>
    %84 = vector.broadcast %83 : vector<8x1xf32> to vector<8x512xf32>
    %85 = arith.mulf %84, %76 : vector<8x512xf32>
    %cst_34 = arith.constant dense<0.000000e+00> : vector<512xf32>
    %86 = vector.multi_reduction <add>, %85, %cst_34 [0] : vector<8x512xf32> to vector<512xf32>
    %87 = vector.shape_cast %86 : vector<512xf32> to vector<1x512xf32>
    %c0_35 = arith.constant 0 : index
    %c0_36 = arith.constant 0 : index
    %88 = vector.load %arg9[%c0_35, %c0_36] : memref<1x512xf32, #tpu.memory_space<vmem>>, vector<1x512xf32>
    tpu.vector_store %arg9[%c0_35, %c0_36], %87 {strides = array<i32>} : memref<1x512xf32, #tpu.memory_space<vmem>>, vector<1x512xf32>,
    %89 = vector.broadcast %83 : vector<8x1xf32> to vector<8x512xf32>
    %90 = arith.mulf %89, %82 : vector<8x512xf32>
    %cst_37 = arith.constant dense<0.000000e+00> : vector<512xf32>
    %91 = vector.multi_reduction <add>, %90, %cst_37 [0] : vector<8x512xf32> to vector<512xf32>
    %92 = vector.shape_cast %91 : vector<512xf32> to vector<1x512xf32>
    %c0_38 = arith.constant 0 : index
    %c0_39 = arith.constant 0 : index
    %93 = vector.load %arg10[%c0_38, %c0_39] : memref<1x512xf32, #tpu.memory_space<vmem>>, vector<1x512xf32>
    tpu.vector_store %arg10[%c0_38, %c0_39], %92 {strides = array<i32>} : memref<1x512xf32, #tpu.memory_space<vmem>>, vector<1x512xf32>,
    return
  }
  func.func @transform_0(%arg0: i32) -> (i32, i32) {
    %c0_i32 = arith.constant 0 : i32
    %c0_i32_0 = arith.constant 0 : i32
    %c0_i32_1 = arith.constant 0 : i32
    return %c0_i32, %c0_i32_0 : i32, i32
  }
  func.func @transform_1(%arg0: i32) -> (i32, i32) {
    %c0_i32 = arith.constant 0 : i32
    %c0_i32_0 = arith.constant 0 : i32
    %c0_i32_1 = arith.constant 0 : i32
    return %c0_i32, %c0_i32_0 : i32, i32
  }
  func.func @transform_2(%arg0: i32) -> (i32, i32) {
    %c0_i32 = arith.constant 0 : i32
    %c0_i32_0 = arith.constant 0 : i32
    %c0_i32_1 = arith.constant 0 : i32
    return %c0_i32, %c0_i32_0 : i32, i32
  }
  func.func @transform_3(%arg0: i32) -> (i32, i32) {
    %c0_i32 = arith.constant 0 : i32
    %c0_i32_0 = arith.constant 0 : i32
    %c0_i32_1 = arith.constant 0 : i32
    return %c0_i32, %c0_i32_0 : i32, i32
  }
  func.func @transform_4(%arg0: i32) -> (i32, i32) {
    %c0_i32 = arith.constant 0 : i32
    %c0_i32_0 = arith.constant 0 : i32
    %c0_i32_1 = arith.constant 0 : i32
    return %c0_i32, %c0_i32_0 : i32, i32
  }
  func.func @transform_5(%arg0: i32) -> (i32, i32) {
    %c0_i32 = arith.constant 0 : i32
    %c0_i32_0 = arith.constant 0 : i32
    %c0_i32_1 = arith.constant 0 : i32
    return %c0_i32, %c0_i32_0 : i32, i32
  }
  func.func @transform_6(%arg0: i32) -> (i32, i32) {
    %c0_i32 = arith.constant 0 : i32
    %c0_i32_0 = arith.constant 0 : i32
    %c0_i32_1 = arith.constant 0 : i32
    return %c0_i32, %c0_i32_0 : i32, i32
  }
  func.func @transform_7(%arg0: i32) -> (i32, i32) {
    %c0_i32 = arith.constant 0 : i32
    %c0_i32_0 = arith.constant 0 : i32
    %c0_i32_1 = arith.constant 0 : i32
    return %c0_i32, %c0_i32_0 : i32, i32
  }
  func.func @transform_8(%arg0: i32) -> (i32, i32) {
    %c0_i32 = arith.constant 0 : i32
    %c0_i32_0 = arith.constant 0 : i32
    %c0_i32_1 = arith.constant 0 : i32
    return %c0_i32, %c0_i32_0 : i32, i32
  }
  func.func @transform_9(%arg0: i32) -> (i32, i32) {
    %c0_i32 = arith.constant 0 : i32
    %c0_i32_0 = arith.constant 0 : i32
    %c0_i32_1 = arith.constant 0 : i32
    return %c0_i32, %c0_i32_0 : i32, i32
  }
}

</mosaic_0001>

<bundles_post_ra>
// kernel: _lambda_.9
= control target key start
LH: loop header
LB: loop body
LE: loop exit
PB: predicated region body
PF: predicated region fallthrough
CT: control target
= control target key end

     0   :  { %v416_v1 = vmov 0   ;;  %s417_s23 = smov 1   ;;  %s418_s24 = smov 127   ;;  %v24_v19 = vlaneseq  ;;  %s623_s0 = inlined_call_operand.vmem [shape: f32[1,1024], index: 0, kind: input, shape index: {}]   ;;  %s624_s1 = inlined_call_operand.vmem [shape: f32[8,1], index: 1, kind: input, shape index: {}]   ;;  %s625_s2 = inlined_call_operand.vmem [shape: f32[8,1], index: 2, kind: input, shape index: {}]   ;;  %s626_s3 = inlined_call_operand.vmem [shape: f32[8,1], index: 3, kind: input, shape index: {}]   ;;  %s627_s4 = inlined_call_operand.vmem [shape: f32[8,1], index: 4, kind: input, shape index: {}]   ;;  %s628_s5 = inlined_call_operand.vmem [shape: f32[8,1], index: 5, kind: input, shape index: {}]   ;;  %s629_s6 = inlined_call_operand.vmem [shape: bf16[8,1024], index: 6, kind: output, shape index: {}]  }
   0x1   :  { %v23_v0 = vld [vmem:[%s623_s0] sm:$0xff]  ;;  %409 = vset.pattern.permute.xlu1 %v416_v1  ;;  %410 = vset.pattern.permute.xlu2 %v416_v1 }
   0x2   :  { %v458_v2 = vperm.slane %v23_v0, 1  ;;  %v460_v3 = vperm.slane %v23_v0, 0  ;;  %411 = vset.pattern.permute.xlu0 %v416_v1  ;;  %v465_v4 = vperm.slane %v23_v0, 2  ;;  %v467_v5 = vperm.slane %v23_v0, 7  ;;  %v228_v6 = vld [vmem:[%s624_s1] sm:$0xff] }
   0x3   :  { %v229_v7 = vld [vmem:[%s625_s2] sm:$0xff]  ;;  %v479_v8 = vperm.slane %v23_v0, 3  ;;  %v481_v9 = vperm.slane %v23_v0, 4  ;;  %v489_v11 = vperm.slane %v23_v0, 5  ;;  %v493_v12 = vperm.slane %v23_v0, 6 }
   0x4   :  { %156 = vrot.lane.b32.xlu1 %v458_v2, %s417_s23  ;;  %154 = vrot.lane.b32.xlu0 %v460_v3, %s417_s23  ;;  %v230_v10 = vld [vmem:[%s626_s3] sm:$0xff]  ;;  %v505_v21 = vand.u32 127, %v24_v19 }
   0x5   :  { %195 = vrot.lane.b32.xlu2 %v460_v3, %s418_s24 }
   0x6   :  { %v37_v22 = vand.u32 511, %v505_v21  ;;  %vm170_vm0 = vcmp.lt.s32.totalorder %v505_v21, 1  ;;  %v29_v27 = vadd.s32 512, %v505_v21  ;;  %v28_v29 = vadd.s32 384, %v505_v21 }
   0x7   :  { %vm211_vm2 = vcmp.lt.s32.totalorder %v505_v21, 127 }
   0x8   :  { %vm129_vm1 = vcmp.eq.s32.totalorder %v37_v22, 0  ;;  %v65_v34 = vand.u32 511, %v29_v27  ;;  %v58_v36 = vand.u32 511, %v28_v29 }
   0xa   :  { %vm529_vm3 = vcmp.eq.s32.totalorder %v65_v34, 0  ;;  %vm540_vm4 = vcmp.eq.s32.totalorder %v58_v36, 511 }
   0xc   :  { %158 = vrot.lane.b32.xlu1 %v465_v4, %s417_s23  ;;  %168 = vrot.lane.b32.xlu0 %v467_v5, %s417_s23 }
   0xd   :  { %197 = vrot.lane.b32.xlu2 %v458_v2, %s418_s24 }
  0x14   :  { %233 = vperm.xlu1 %409, %v228_v6   ;;  %199 = vrot.lane.b32.xlu0 %v465_v4, %s418_s24 }
  0x15   :  { %254 = vperm.xlu2 %410, %v229_v7  }
  0x1c   :  { %201 = vrot.lane.b32.xlu1 %v479_v8, %s418_s24  ;;  %160 = vrot.lane.b32.xlu0 %v479_v8, %s417_s23 }
  0x1d   :  { %162 = vrot.lane.b32.xlu2 %v481_v9, %s417_s23 }
  0x24   :  { %275 = vperm.xlu1 %409, %v230_v10   ;;  %203 = vrot.lane.b32.xlu0 %v481_v9, %s418_s24 }
  0x25   :  { %164 = vrot.lane.b32.xlu2 %v489_v11, %s417_s23 }
  0x2c   :  { %166 = vrot.lane.b32.xlu1 %v493_v12, %s417_s23  ;;  %205 = vrot.lane.b32.xlu0 %v489_v11, %s418_s24 }
  0x2d   :  { %207 = vrot.lane.b32.xlu2 %v493_v12, %s418_s24 }
  0x34   :  { %209 = vrot.lane.b32.xlu0 %v467_v5, %s418_s24 }
  0x5f   :  { %v499_v13 = vpop.permute.xlu2 %195 }
  0x67   :  { %v198_v14 = vpop.permute.xlu2 %197 }
  0x68   :  { %v218_v35 = vsel %vm211_vm2, %v499_v13, %v198_v14 }
  0x69   :  { %v278_v42 = vperm.slane %v218_v35, 0 }
  0x6f   :  { %v503_v20 = vpop.permute.xlu2 %254 }
  0x70   :  { %v257_v40 = vmul.f32 %v503_v20, %v460_v3  ;;  %v258_v46 = vmul.f32 %v503_v20, %v458_v2  ;;  %v259_v0 = vmul.f32 %v503_v20, %v465_v4  ;;  %v260_v4 = vmul.f32 %v503_v20, %v479_v8 }
  0x71   :  { %v261_v34 = vmul.f32 %v503_v20, %v481_v9  ;;  %v262_v44 = vmul.f32 %v503_v20, %v489_v11  ;;  %v263_v50 = vmul.f32 %v503_v20, %v493_v12 }
  0x76   :  { %v157_v15 = vpop.permute.xlu1 %156  ;;  %v155_v16 = vpop.permute.xlu0 %154 }
  0x77   :  { %v163_v26 = vpop.permute.xlu2 %162  ;;  %v177_v32 = vsel %vm170_vm0, %v155_v16, %v157_v15 }
  0x78   :  { %v237_v37 = vperm.slane %v177_v32, 0 }
  0x7e   :  { %v159_v17 = vpop.permute.xlu1 %158  ;;  %v501_v18 = vpop.permute.xlu0 %168 }
  0x7f   :  { %v178_v25 = vsel %vm170_vm0, %v501_v18, %v155_v16  ;;  %v176_v41 = vsel %vm170_vm0, %v157_v15, %v159_v17  ;;  %v165_v43 = vpop.permute.xlu2 %164 }
  0x80   :  { %v179_v28 = vsel %vm129_vm1, 0.0, %v178_v25  ;;  %v238_v51 = vperm.slane %v176_v41, 0  ;;  %v173_v10 = vsel %vm170_vm0, %v163_v26, %v165_v43 }
  0x81   :  { %v236_v33 = vperm.slane %v179_v28, 0  ;;  %v241_v28 = vperm.slane %v173_v10, 0 }
  0x86   :  { %v508_v23 = vpop.permute.xlu1 %233  ;;  %v200_v24 = vpop.permute.xlu0 %199 }
  0x87   :  { %v217_v38 = vsel %vm211_vm2, %v198_v14, %v200_v24  ;;  %v244_v39 = vmul.f32 %v236_v33, %v508_v23  ;;  %v245_v45 = vmul.f32 %v237_v37, %v508_v23  ;;  %v246_v63 = vmul.f32 %v238_v51, %v508_v23  ;;  %v208_v16 = vpop.permute.xlu2 %207 }
  0x88   :  { %v279_v47 = vperm.slane %v217_v38, 0 }
  0x89   :  { %v265_v53 = vadd.f32 %v257_v40, %v244_v39  ;;  %v266_v61 = vadd.f32 %v258_v46, %v245_v45  ;;  %v267_v19 = vadd.f32 %v259_v0, %v246_v63 }
  0x8e   :  { %v202_v30 = vpop.permute.xlu1 %201  ;;  %v161_v31 = vpop.permute.xlu0 %160 }
  0x8f   :  { %v174_v48 = vsel %vm170_vm0, %v161_v31, %v163_v26  ;;  %v175_v49 = vsel %vm170_vm0, %v159_v17, %v161_v31  ;;  %v216_v55 = vsel %vm211_vm2, %v200_v24, %v202_v30  ;;  %v32_v17 = vadd.s32 896, %v505_v21 }
  0x90   :  { %v183_v59 = vsel %vm529_vm3, 0.0, %v174_v48  ;;  %v239_v60 = vperm.slane %v175_v49, 0  ;;  %v280_v1 = vperm.slane %v216_v55, 0 }
  0x91   :  { %v240_v7 = vperm.slane %v183_v59, 0  ;;  %v86_v36 = vand.u32 511, %v32_v17 }
  0x92   :  { %v247_v14 = vmul.f32 %v239_v60, %v508_v23 }
  0x93   :  { %v248_v26 = vmul.f32 %v240_v7, %v508_v23  ;;  %vm194_vm5 = vcmp.eq.s32.totalorder %v86_v36, 511 }
  0x94   :  { %v268_v31 = vadd.f32 %v260_v4, %v247_v14 }
  0x95   :  { %v269_v41 = vadd.f32 %v261_v34, %v248_v26 }
  0x96   :  { %v544_v52 = vpop.permute.xlu1 %275  ;;  %v204_v54 = vpop.permute.xlu0 %203 }
  0x97   :  { %v286_v56 = vmul.f32 %v278_v42, %v544_v52  ;;  %v287_v57 = vmul.f32 %v279_v47, %v544_v52  ;;  %v215_v58 = vsel %vm211_vm2, %v202_v30, %v204_v54  ;;  %v288_v15 = vmul.f32 %v280_v1, %v544_v52 }
  0x98   :  { %v223_v62 = vsel %vm540_vm4, 0.0, %v215_v58  ;;  %v264_v58 = vmul.f32 %v503_v20, %v467_v5  ;;  %v419_v1 = vmov 1024.0  }
  0x99   :  { %v559_v2 = vadd.f32 %v286_v56, %v265_v53  ;;  %v561_v3 = vadd.f32 %v287_v57, %v266_v61  ;;  %v281_v6 = vperm.slane %v223_v62, 0  ;;  %v296_v32 = vadd.f32 %v288_v15, %v267_v19 }
  0x9a   :  { %412 = vrcp.f32 %v419_v1 }
  0x9b   :  { %v302_v22 = vadd.f32 %v561_v3, %v559_v2  ;;  %v289_v24 = vmul.f32 %v281_v6, %v544_v52 }
  0x9d   :  { %v303_v37 = vadd.f32 %v302_v22, %v296_v32  ;;  %v297_v38 = vadd.f32 %v289_v24, %v268_v31 }
  0x9e   :  { %v167_v25 = vpop.permute.xlu1 %166  ;;  %v206_v27 = vpop.permute.xlu0 %205 }
  0x9f   :  { %v172_v29 = vsel %vm170_vm0, %v165_v43, %v167_v25  ;;  %v213_v30 = vsel %vm211_vm2, %v206_v27, %v208_v16  ;;  %v171_v8 = vsel %vm170_vm0, %v167_v25, %v501_v18  ;;  %v214_v33 = vsel %vm211_vm2, %v204_v54, %v206_v27 }
  0xa0   :  { %v282_v35 = vperm.slane %v214_v33, 0  ;;  %v242_v39 = vperm.slane %v172_v29, 0  ;;  %v283_v40 = vperm.slane %v213_v30, 0  ;;  %v243_v42 = vperm.slane %v171_v8, 0  ;;  %v413_v6 = vpop.eup %412 }
  0xa1   :  { %v249_v18 = vmul.f32 %v241_v28, %v508_v23  ;;  %v304_v46 = vadd.f32 %v303_v37, %v297_v38  ;;  %v312_v7 = vmul.f32 1024.0, %v413_v6  ;;  %vm316_vm6 = vweird.f32 %v413_v6 }
  0xa2   :  { %v290_v43 = vmul.f32 %v282_v35, %v544_v52  ;;  %v250_v9 = vmul.f32 %v242_v39, %v508_v23  ;;  %v291_v47 = vmul.f32 %v283_v40, %v544_v52  ;;  %v251_v49 = vmul.f32 %v243_v42, %v508_v23 }
  0xa3   :  { %v270_v53 = vadd.f32 %v262_v44, %v249_v18  ;;  %v313_v10 = vsub.f32 1.0, %v312_v7 }
  0xa4   :  { %v298_v45 = vadd.f32 %v290_v43, %v269_v41  ;;  %v271_v59 = vadd.f32 %v263_v50, %v250_v9  ;;  %v272_v61 = vadd.f32 %v264_v58, %v251_v49  ;;  %v371_v49 = vld [vmem:[%s628_s5] sm:$0xff] }
  0xa5   :  { %v299_v23 = vadd.f32 %v291_v47, %v270_v53  ;;  %v314_v14 = vmul.f32 %v413_v6, %v313_v10 }
  0xa6   :  { %v210_v48 = vpop.permute.xlu0 %209  ;;  %v305_v56 = vadd.f32 %v304_v46, %v298_v45  ;;  %v345_v46 = vld [vmem:[%s627_s4] sm:$0xff] }
  0xa7   :  { %v212_v51 = vsel %vm211_vm2, %v208_v16, %v210_v48  ;;  %v219_v11 = vsel %vm211_vm2, %v210_v48, %v499_v13  ;;  %v315_v5 = vadd.f32 %v413_v6, %v314_v14 }
  0xa8   :  { %v227_v54 = vsel %vm194_vm5, 0.0, %v219_v11  ;;  %v284_v55 = vperm.slane %v212_v51, 0  ;;  %v306_v63 = vadd.f32 %v305_v56, %v299_v23 }
  0xa9   :  { %v285_v57 = vperm.slane %v227_v54, 0  ;;  %v317_v20 = vsel %vm316_vm6, %v413_v6, %v315_v5 }
  0xaa   :  { %v292_v60 = vmul.f32 %v284_v55, %v544_v52 }
  0xab   :  { %v293_v12 = vmul.f32 %v285_v57, %v544_v52 }
  0xac   :  { %v300_v62 = vadd.f32 %v292_v60, %v271_v59 }
  0xad   :  { %v301_v0 = vadd.f32 %v293_v12, %v272_v61 }
  0xae   :  { %v307_v21 = vadd.f32 %v306_v63, %v300_v62 }
  0xb0   :  { %v308_v13 = vadd.f32 %v307_v21, %v301_v0 }
  0xb2   :  { %309 = vadd.xlane.f32.xlu1 %v308_v13 }
 0x125   :  { %v310_v15 = vpop.xlane.xlu1 %309 }
 0x126   :  { %v318_v16 = vmul.f32 %v317_v20, %v310_v15 }
 0x128   :  { %v319_v52 = vsub.f32 %v559_v2, %v318_v16  ;;  %v320_v17 = vsub.f32 %v561_v3, %v318_v16  ;;  %v321_v4 = vsub.f32 %v296_v32, %v318_v16  ;;  %v322_v19 = vsub.f32 %v297_v38, %v318_v16 }
 0x129   :  { %v323_v25 = vsub.f32 %v298_v45, %v318_v16  ;;  %v324_v26 = vsub.f32 %v299_v23, %v318_v16  ;;  %v325_v31 = vsub.f32 %v300_v62, %v318_v16  ;;  %v326_v34 = vsub.f32 %v301_v0, %v318_v16 }
 0x12a   :  { %v327_v22 = vmul.f32 %v319_v52, %v319_v52  ;;  %v328_v24 = vmul.f32 %v320_v17, %v320_v17  ;;  %v329_v27 = vmul.f32 %v321_v4, %v321_v4  ;;  %v330_v29 = vmul.f32 %v322_v19, %v322_v19 }
 0x12b   :  { %v331_v8 = vmul.f32 %v323_v25, %v323_v25  ;;  %v332_v35 = vmul.f32 %v324_v26, %v324_v26  ;;  %v333_v37 = vmul.f32 %v325_v31, %v325_v31  ;;  %v334_v39 = vmul.f32 %v326_v34, %v326_v34 }
 0x12c   :  { %v335_v28 = vadd.f32 %v328_v24, %v327_v22 }
 0x12e   :  { %v336_v30 = vadd.f32 %v335_v28, %v329_v27 }
 0x130   :  { %v337_v33 = vadd.f32 %v336_v30, %v330_v29 }
 0x132   :  { %v338_v36 = vadd.f32 %v337_v33, %v331_v8 }
 0x134   :  { %v339_v2 = vadd.f32 %v338_v36, %v332_v35 }
 0x136   :  { %v340_v3 = vadd.f32 %v339_v2, %v333_v37 }
 0x138   :  { %v341_v32 = vadd.f32 %v340_v3, %v334_v39 }
 0x13a   :  { %342 = vadd.xlane.f32.xlu2 %v341_v32 }
 0x1ad   :  { %v343_v38 = vpop.xlane.xlu2 %342 }
 0x1ae   :  { %v344_v40 = vmul.f32 %v343_v38, %v317_v20 }
 0x1b0   :  { %v346_v41 = vadd.f32 0.0001, %v344_v40 }
 0x1b2   :  { %414 = vrsqrt.f32 %v346_v41  ;;  %vm353_vm8 = vweird.f32 %v346_v41 }
 0x1b8   :  { %v415_v42 = vpop.eup %414 }
 0x1b9   :  { %v348_v43 = vmul.f32 %v415_v42, %v346_v41  ;;  %vm354_vm7 = vweird.f32 %v415_v42 }
 0x1ba   :  { %vm355_vm9 = vmor %vm353_vm8, %vm354_vm7 }
 0x1bb   :  { %v349_v44 = vmul.f32 %v415_v42, %v348_v43 }
 0x1bd   :  { %v350_v18 = vmul.f32 0.5, %v349_v44 }
 0x1bf   :  { %v351_v45 = vsub.f32 1.5, %v350_v18 }
 0x1c1   :  { %v352_v9 = vmul.f32 %v415_v42, %v351_v45 }
 0x1c3   :  { %v356_v47 = vsel %vm355_vm9, %v415_v42, %v352_v9 }
 0x1c4   :  { %v357_v48 = vmul.f32 %v356_v47, %v345_v46 }
 0x1c6   :  { %360 = vperm.xlu0 %411, %v357_v48  }
 0x1ce   :  { %374 = vperm.xlu0 %411, %v371_v49  }
 0x238   :  { %v361_v50 = vpop.permute.xlu0 %360 }
 0x239   :  { %v363_v51 = vmul.f32 %v361_v50, %v319_v52  ;;  %v364_v11 = vmul.f32 %v361_v50, %v320_v17  ;;  %v365_v53 = vmul.f32 %v361_v50, %v321_v4  ;;  %v366_v54 = vmul.f32 %v361_v50, %v322_v19 }
 0x23a   :  { %v367_v55 = vmul.f32 %v361_v50, %v323_v25  ;;  %v368_v56 = vmul.f32 %v361_v50, %v324_v26  ;;  %v369_v57 = vmul.f32 %v361_v50, %v325_v31  ;;  %v370_v58 = vmul.f32 %v361_v50, %v326_v34 }
 0x240   :  { %v375_v59 = vpop.permute.xlu0 %374 }
 0x241   :  { %v377_v23 = vadd.f32 %v375_v59, %v363_v51  ;;  %v378_v60 = vadd.f32 %v375_v59, %v364_v11  ;;  %v379_v12 = vadd.f32 %v375_v59, %v365_v53  ;;  %v380_v61 = vadd.f32 %v375_v59, %v366_v54 }
 0x242   :  { %v381_v62 = vadd.f32 %v375_v59, %v367_v55  ;;  %v382_v63 = vadd.f32 %v375_v59, %v368_v56  ;;  %v383_v0 = vadd.f32 %v375_v59, %v369_v57  ;;  %v384_v21 = vadd.f32 %v375_v59, %v370_v58 }
 0x243   :  { %v385_v13 = vmax.f32 %v377_v23, 0.0  ;;  %v386_v1 = vmax.f32 %v378_v60, 0.0  ;;  %v387_v6 = vmax.f32 %v379_v12, 0.0  ;;  %v388_v7 = vmax.f32 %v380_v61, 0.0 }
 0x244   :  { %v389_v10 = vmax.f32 %v381_v62, 0.0  ;;  %v390_v14 = vmax.f32 %v382_v63, 0.0  ;;  %v391_v5 = vmax.f32 %v383_v0, 0.0  ;;  %v392_v20 = vmax.f32 %v384_v21, 0.0 }
 0x245   :  { %v393_v15 = vpack.c.bf16 %v386_v1, %v385_v13  ;;  %v394_v16 = vpack.c.bf16 %v388_v7, %v387_v6 }
 0x246   :  { %v395_v52 = vpack.c.bf16 %v390_v14, %v389_v10  ;;  %v396_v17 = vpack.c.bf16 %v392_v20, %v391_v5 }
 0x247   :  { %397 = vst [vmem:[%s629_s6] sm:$0xff] %v393_v15 }
 0x248   :  { %398 = vst [vmem:[%s629_s6 + $0x8] sm:$0xff] %v394_v16 }
 0x249   :  { %399 = vst [vmem:[%s629_s6 + $0x10] sm:$0xff] %v395_v52 }
 0x24a   :  { %400 = vst [vmem:[%s629_s6 + $0x18] sm:$0xff] %v396_v17 }

// kernel: _lambda_.10
= control target key start
LH: loop header
LB: loop body
LE: loop exit
PB: predicated region body
PF: predicated region fallthrough
CT: control target
= control target key end

     0   :  { %vm257_vm0 = vcmask 64512   ;;  %v35_v20 = vlaneseq  ;;  %s1188_s0 = inlined_call_operand.vmem [shape: bf16[8,1024], index: 0, kind: input, shape index: {}]   ;;  %s1189_s2 = inlined_call_operand.vmem [shape: f32[8,8], index: 2, kind: input, shape index: {}]   ;;  %s1190_s1 = inlined_call_operand.vmem [shape: f32[8,8], index: 1, kind: input, shape index: {}]   ;;  %s1191_s3 = inlined_call_operand.vmem [shape: f32[8,8], index: 3, kind: input, shape index: {}]   ;;  %s1192_s4 = inlined_call_operand.vmem [shape: f32[8,1], index: 4, kind: input, shape index: {}]   ;;  %s1193_s5 = inlined_call_operand.vmem [shape: f32[8,1], index: 5, kind: input, shape index: {}]   ;;  %s1194_s6 = inlined_call_operand.vmem [shape: bf16[8,1024], index: 6, kind: output, shape index: {}]  }
   0x1   :  { %v25_v0 = vld [vmem:[%s1188_s0 + $0x10] sm:$0xff]  ;;  %v26_v1 = vld [vmem:[%s1188_s0 + $0x18] sm:$0xff]  ;;  %v23_v2 = vld [vmem:[%s1188_s0] sm:$0xff] }
   0x2   :  { %v1028_v3 = vunpack.c.h.bf16 %v25_v0  ;;  %v1030_v4 = vunpack.c.h.bf16 %v26_v1  ;;  %v24_v5 = vld [vmem:[%s1188_s0 + $0x8] sm:$0xff]  ;;  %v1035_v6 = vunpack.c.h.bf16 %v23_v2  ;;  %v255_v9 = vld [vmem:[%s1189_s2] sm:$0xff]  ;;  %v1051_v13 = vunpack.c.l.bf16 %v26_v1  ;;  %s980_s0 = smov 1   ;;  %s981_s2 = smov 127  }
   0x3   :  { %v1037_v7 = vunpack.c.l.bf16 %v24_v5  ;;  %v1039_v8 = vunpack.c.h.bf16 %v24_v5  ;;  %v1053_v14 = vunpack.c.l.bf16 %v25_v0  ;;  %v1055_v15 = vunpack.c.l.bf16 %v23_v2  ;;  %v1088_v27 = vld [vmem:[%s1190_s1] sm:$0xff] }
   0x4   :  { %v944_v10 = vpack.i.bf16 %v1028_v3, %v1030_v4  ;;  %296 = vmatpush.msra.mxu1 %v1035_v6  ;;  %v1080_v21 = vand.u32 127, %v35_v20 }
   0x5   :  { %v934_v11 = vpack.i.bf16 %v1037_v7, %v1035_v6  ;;  %v954_v12 = vpack.i.bf16 %v1039_v8, %v1037_v7  ;;  %316 = vmatpush.msra.mxu2 %v1037_v7  ;;  %276 = vmatpush.msra.mxu0 %v1055_v15  ;;  %v949_v16 = vpack.i.bf16 %v1053_v14, %v1051_v13 }
   0x6   :  { %945 = vrot.lane.b32.xlu1 %v944_v10, %s980_s0  ;;  %896 = vmatmul.msk.f32.vlgmr.msra.gmra.mxu2 %vm257_vm0, %v255_v9  ;;  %v939_v17 = vpack.i.bf16 %v1039_v8, %v1055_v15  ;;  %v959_v18 = vpack.i.bf16 %v1035_v6, %v1055_v15  ;;  %v964_v19 = vpack.i.bf16 %v1051_v13, %v1053_v14  ;;  %vm164_vm1 = vcmp.lt.s32.totalorder %v1080_v21, 1 }
   0x7   :  { %935 = vrot.lane.b32.xlu0 %v934_v11, %s980_s0  ;;  %955 = vrot.lane.b32.xlu2 %v954_v12, %s981_s2  ;;  %v48_v29 = vand.u32 511, %v1080_v21  ;;  %v40_v30 = vadd.s32 512, %v1080_v21  ;;  %v39_v43 = vadd.s32 384, %v1080_v21  ;;  %vm221_vm3 = vcmp.lt.s32.totalorder %v1080_v21, 127  ;;  %v256_v11 = vld [vmem:[%s1191_s3] sm:$0xff] }
   0x8   :  { %336 = vmatpush.msra.mxu3 %v1039_v8  ;;  %396 = vmatpush.msrb.mxu2 %v1051_v13  ;;  %v43_v55 = vadd.s32 896, %v1080_v21 }
   0x9   :  { %894 = vmatmul.msk.f32.vlgmr.msra.gmra.mxu0 %vm257_vm0, %v255_v9  ;;  %895 = vmatmul.msk.f32.vlgmr.msra.gmra.mxu1 %vm257_vm0, %v255_v9  ;;  %vm1097_vm2 = vcmp.ne.s32.totalorder %v48_v29, 0  ;;  %v76_v39 = vand.u32 511, %v40_v30  ;;  %v69_v54 = vand.u32 511, %v39_v43 }
   0xa   :  { %897 = vmatmul.msk.f32.vlgmr.msra.gmra.mxu3 %vm257_vm0, %v255_v9  ;;  %356 = vmatpush.msrb.mxu0 %v1053_v14  ;;  %v97_v1 = vand.u32 511, %v43_v55 }
   0xb   :  { %376 = vmatpush.msrb.mxu1 %v1028_v3  ;;  %416 = vmatpush.msrb.mxu3 %v1030_v4  ;;  %vm927_vm4 = vcmp.ne.s32.totalorder %v76_v39, 0  ;;  %vm928_vm5 = vcmp.ne.s32.totalorder %v69_v54, 511 }
   0xc   :  { %vm929_vm6 = vcmp.ne.s32.totalorder %v97_v1, 511 }
   0xe   :  { %950 = vrot.lane.b32.xlu1 %v949_v16, %s980_s0  ;;  %900 = vmatmul.msk.f32.vlgmr.msrb.gmra.mxu2 %vm257_vm0, %v255_v9 }
   0xf   :  { %940 = vrot.lane.b32.xlu0 %v939_v17, %s980_s0  ;;  %960 = vrot.lane.b32.xlu2 %v959_v18, %s981_s2 }
  0x11   :  { %898 = vmatmul.msk.f32.vlgmr.msrb.gmra.mxu0 %vm257_vm0, %v255_v9  ;;  %899 = vmatmul.msk.f32.vlgmr.msrb.gmra.mxu1 %vm257_vm0, %v255_v9 }
  0x12   :  { %901 = vmatmul.msk.f32.vlgmr.msrb.gmra.mxu3 %vm257_vm0, %v255_v9 }
  0x16   :  { %970 = vrot.lane.b32.xlu1 %v944_v10, %s981_s2 }
  0x17   :  { %965 = vrot.lane.b32.xlu0 %v964_v19, %s981_s2 }
  0x61   :  { %v1082_v22 = vpop.permute.xlu2 %955 }
  0x62   :  { %v958_v32 = vunpack.i.h.bf16 %v1082_v22  ;;  %v957_v44 = vunpack.i.l.bf16 %v1082_v22 }
  0x64   :  { %v226_v57 = vsel %vm221_vm3, %v957_v44, %v958_v32 }
  0x69   :  { %v961_v34 = vpop.permute.xlu2 %960 }
  0x6a   :  { %v963_v46 = vunpack.i.h.bf16 %v961_v34  ;;  %v962_v47 = vunpack.i.l.bf16 %v961_v34 }
  0x6c   :  { %v227_v56 = vsel %vm221_vm3, %v963_v46, %v957_v44  ;;  %v228_v59 = vsel %vm221_vm3, %v962_v47, %v963_v46 }
  0x78   :  { %v946_v23 = vpop.permute.xlu1 %945 }
  0x79   :  { %v936_v24 = vpop.permute.xlu0 %935  ;;  %v948_v35 = vunpack.i.h.bf16 %v946_v23  ;;  %v947_v40 = vunpack.i.l.bf16 %v946_v23 }
  0x7a   :  { %v938_v25 = vunpack.i.h.bf16 %v936_v24  ;;  %v937_v26 = vunpack.i.l.bf16 %v936_v24 }
  0x7c   :  { %v170_v28 = vsel %vm164_vm1, %v937_v26, %v938_v25 }
  0x7d   :  { %479 = vmatpush.msra.mxu2 %v170_v28 }
  0x7e   :  { %906 = vmatmul.msk.f32.vlgmr.msra.gmra.mxu2 %vm257_vm0, %v1088_v27 }
  0x80   :  { %v951_v31 = vpop.permute.xlu1 %950 }
  0x81   :  { %v953_v36 = vunpack.i.h.bf16 %v951_v31  ;;  %v952_v37 = vunpack.i.l.bf16 %v951_v31  ;;  %v941_v38 = vpop.permute.xlu0 %940 }
  0x82   :  { %v943_v41 = vunpack.i.h.bf16 %v941_v38  ;;  %v942_v42 = vunpack.i.l.bf16 %v941_v38 }
  0x83   :  { %v166_v45 = vsel %vm164_vm1, %v948_v35, %v952_v37  ;;  %v167_v52 = vsel %vm164_vm1, %v953_v36, %v948_v35  ;;  %v165_v53 = vsel %vm164_vm1, %v952_v37, %v947_v40 }
  0x84   :  { %v172_v48 = vsel %vm164_vm1, %v947_v40, %v942_v42  ;;  %v171_v49 = vsel %vm164_vm1, %v942_v42, %v937_v26  ;;  %v169_v50 = vsel %vm164_vm1, %v938_v25, %v943_v41  ;;  %559 = vmatpush.msrb.mxu2 %v166_v45  ;;  %v168_v51 = vsel %vm164_vm1, %v943_v41, %v953_v36 }
  0x85   :  { %903 = vmatpush.msk.msra.mxu0 %vm1097_vm2, %v172_v48  ;;  %459 = vmatpush.msra.mxu1 %v171_v49 }
  0x86   :  { %499 = vmatpush.msra.mxu3 %v169_v50  ;;  %904 = vmatmul.msk.f32.vlgmr.msra.gmra.mxu0 %vm257_vm0, %v1088_v27  ;;  %v278_v17 = vpop.f32.mrf.mxu0  ;;  %v298_v18 = vpop.f32.mrf.mxu1 }
  0x87   :  { %905 = vmatmul.msk.f32.vlgmr.msra.gmra.mxu1 %vm257_vm0, %v1088_v27  ;;  %907 = vmatmul.msk.f32.vlgmr.msra.gmra.mxu3 %vm257_vm0, %v1088_v27 }
  0x88   :  { %909 = vmatpush.msk.msrb.mxu0 %vm927_vm4, %v168_v51  ;;  %539 = vmatpush.msrb.mxu1 %v167_v52  ;;  %v971_v58 = vpop.permute.xlu1 %970 }
  0x89   :  { %912 = vmatmul.msk.f32.vlgmr.msrb.gmra.mxu2 %vm257_vm0, %v1088_v27  ;;  %579 = vmatpush.msrb.mxu3 %v165_v53  ;;  %v966_v60 = vpop.permute.xlu0 %965  ;;  %v973_v61 = vunpack.i.h.bf16 %v971_v58  ;;  %v972_v62 = vunpack.i.l.bf16 %v971_v58  ;;  %v318_v16 = vpop.f32.mrf.mxu2 }
  0x8a   :  { %v968_v63 = vunpack.i.h.bf16 %v966_v60  ;;  %v967_v0 = vunpack.i.l.bf16 %v966_v60  ;;  %622 = vmatpush.msra.mxu1 %v227_v56  ;;  %642 = vmatpush.msra.mxu2 %v226_v57 }
  0x8b   :  { %602 = vmatpush.msra.mxu0 %v228_v59  ;;  %v229_v12 = vsel %vm221_vm3, %v972_v62, %v962_v47 }
  0x8c   :  { %v225_v2 = vsel %vm221_vm3, %v958_v32, %v967_v0  ;;  %v222_v5 = vsel %vm221_vm3, %v968_v63, %v972_v62  ;;  %v224_v9 = vsel %vm221_vm3, %v967_v0, %v973_v61  ;;  %v223_v10 = vsel %vm221_vm3, %v973_v61, %v968_v63 }
  0x8d   :  { %918 = vmatpush.msk.msra.mxu3 %vm928_vm5, %v225_v2  ;;  %722 = vmatpush.msrb.mxu2 %v222_v5  ;;  %v338_v19 = vpop.f32.mrf.mxu3  ;;  %v982_v63 = vmov 1024.0  }
  0x8e   :  { %910 = vmatmul.msk.f32.vlgmr.msrb.gmra.mxu0 %vm257_vm0, %v1088_v27  ;;  %v358_v21 = vpop.f32.mrf.mxu0  ;;  %v378_v22 = vpop.f32.mrf.mxu1  ;;  %976 = vrcp.f32 %v982_v63 }
  0x8f   :  { %911 = vmatmul.msk.f32.vlgmr.msrb.gmra.mxu1 %vm257_vm0, %v1088_v27  ;;  %913 = vmatmul.msk.f32.vlgmr.msrb.gmra.mxu3 %vm257_vm0, %v1088_v27 }
  0x90   :  { %682 = vmatpush.msrb.mxu0 %v224_v9  ;;  %702 = vmatpush.msrb.mxu1 %v223_v10 }
  0x91   :  { %916 = vmatmul.msk.f32.vlgmr.msra.gmra.mxu2 %vm257_vm0, %v256_v11  ;;  %924 = vmatpush.msk.msrb.mxu3 %vm929_vm6, %v229_v12  ;;  %v398_v20 = vpop.f32.mrf.mxu2 }
  0x94   :  { %v977_v0 = vpop.eup %976 }
  0x95   :  { %v418_v23 = vpop.f32.mrf.mxu3  ;;  %v765_v1 = vmul.f32 1024.0, %v977_v0  ;;  %vm769_vm7 = vweird.f32 %v977_v0 }
  0x96   :  { %914 = vmatmul.msk.f32.vlgmr.msra.gmra.mxu0 %vm257_vm0, %v256_v11 }
  0x97   :  { %915 = vmatmul.msk.f32.vlgmr.msra.gmra.mxu1 %vm257_vm0, %v256_v11  ;;  %919 = vmatmul.msk.f32.vlgmr.msra.gmra.mxu3 %vm257_vm0, %v256_v11  ;;  %v766_v2 = vsub.f32 1.0, %v765_v1 }
  0x99   :  { %922 = vmatmul.msk.f32.vlgmr.msrb.gmra.mxu2 %vm257_vm0, %v256_v11  ;;  %v767_v5 = vmul.f32 %v977_v0, %v766_v2 }
  0x9b   :  { %v768_v9 = vadd.f32 %v977_v0, %v767_v5 }
  0x9d   :  { %v770_v10 = vsel %vm769_vm7, %v977_v0, %v768_v9 }
  0x9e   :  { %920 = vmatmul.msk.f32.vlgmr.msrb.gmra.mxu0 %vm257_vm0, %v256_v11 }
  0x9f   :  { %921 = vmatmul.msk.f32.vlgmr.msrb.gmra.mxu1 %vm257_vm0, %v256_v11  ;;  %925 = vmatmul.msk.f32.vlgmr.msrb.gmra.mxu3 %vm257_vm0, %v256_v11 }
 0x101   :  { %v481_v24 = vpop.f32.mrf.mxu2 }
 0x102   :  { %v482_v39 = vadd.f32 %v481_v24, %v318_v16 }
 0x103   :  { %v441_v25 = vpop.f32.mrf.mxu0 }
 0x104   :  { %v461_v26 = vpop.f32.mrf.mxu1  ;;  %v442_v31 = vadd.f32 %v441_v25, %v278_v17 }
 0x105   :  { %v462_v33 = vadd.f32 %v461_v26, %v298_v18 }
 0x10a   :  { %v501_v27 = vpop.f32.mrf.mxu3 }
 0x10b   :  { %v521_v28 = vpop.f32.mrf.mxu0  ;;  %v502_v41 = vadd.f32 %v501_v27, %v338_v19 }
 0x10c   :  { %v561_v29 = vpop.f32.mrf.mxu2  ;;  %v541_v30 = vpop.f32.mrf.mxu1  ;;  %v522_v43 = vadd.f32 %v521_v28, %v358_v21 }
 0x10d   :  { %v542_v50 = vadd.f32 %v541_v30, %v378_v22  ;;  %v562_v53 = vadd.f32 %v561_v29, %v398_v20 }
 0x112   :  { %v581_v32 = vpop.f32.mrf.mxu3 }
 0x113   :  { %v604_v34 = vpop.f32.mrf.mxu0  ;;  %v582_v56 = vadd.f32 %v581_v32, %v418_v23 }
 0x114   :  { %v644_v35 = vpop.f32.mrf.mxu2  ;;  %v747_v36 = vadd.f32 %v604_v34, %v442_v31  ;;  %v624_v37 = vpop.f32.mrf.mxu1 }
 0x115   :  { %v748_v38 = vadd.f32 %v624_v37, %v462_v33  ;;  %v749_v42 = vadd.f32 %v644_v35, %v482_v39  ;;  %v983_v39 = vmov 0  }
 0x116   :  { %974 = vset.pattern.permute.xlu1 %v983_v39  ;;  %975 = vset.pattern.permute.xlu0 %v983_v39 }
 0x117   :  { %v755_v40 = vadd.f32 %v748_v38, %v747_v36 }
 0x119   :  { %v756_v46 = vadd.f32 %v755_v40, %v749_v42 }
 0x11a   :  { %v664_v44 = vpop.f32.mrf.mxu3 }
 0x11b   :  { %v750_v45 = vadd.f32 %v664_v44, %v502_v41  ;;  %v684_v47 = vpop.f32.mrf.mxu0 }
 0x11c   :  { %v751_v48 = vadd.f32 %v684_v47, %v522_v43  ;;  %v704_v49 = vpop.f32.mrf.mxu1  ;;  %v724_v52 = vpop.f32.mrf.mxu2 }
 0x11d   :  { %v757_v51 = vadd.f32 %v756_v46, %v750_v45  ;;  %v752_v55 = vadd.f32 %v704_v49, %v542_v50  ;;  %v753_v57 = vadd.f32 %v724_v52, %v562_v53  ;;  %v824_v52 = vld [vmem:[%s1193_s5] sm:$0xff] }
 0x11f   :  { %v758_v54 = vadd.f32 %v757_v51, %v751_v48 }
 0x121   :  { %v759_v58 = vadd.f32 %v758_v54, %v752_v55 }
 0x122   :  { %v744_v59 = vpop.f32.mrf.mxu3 }
 0x123   :  { %v754_v60 = vadd.f32 %v744_v59, %v582_v56  ;;  %v760_v61 = vadd.f32 %v759_v58, %v753_v57 }
 0x125   :  { %v761_v62 = vadd.f32 %v760_v61, %v754_v60 }
 0x127   :  { %762 = vadd.xlane.f32.xlu2 %v761_v62 }
 0x19a   :  { %v763_v11 = vpop.xlane.xlu2 %762 }
 0x19b   :  { %v771_v12 = vmul.f32 %v770_v10, %v763_v11 }
 0x19d   :  { %v772_v16 = vsub.f32 %v747_v36, %v771_v12  ;;  %v773_v17 = vsub.f32 %v748_v38, %v771_v12  ;;  %v774_v18 = vsub.f32 %v749_v42, %v771_v12  ;;  %v775_v19 = vsub.f32 %v750_v45, %v771_v12 }
 0x19e   :  { %v776_v22 = vsub.f32 %v751_v48, %v771_v12  ;;  %v777_v25 = vsub.f32 %v752_v55, %v771_v12  ;;  %v778_v28 = vsub.f32 %v753_v57, %v771_v12  ;;  %v779_v31 = vsub.f32 %v754_v60, %v771_v12  ;;  %v798_v48 = vld [vmem:[%s1192_s4] sm:$0xff] }
 0x19f   :  { %v780_v20 = vmul.f32 %v772_v16, %v772_v16  ;;  %v781_v21 = vmul.f32 %v773_v17, %v773_v17  ;;  %v782_v23 = vmul.f32 %v774_v18, %v774_v18  ;;  %v783_v26 = vmul.f32 %v775_v19, %v775_v19 }
 0x1a0   :  { %v784_v29 = vmul.f32 %v776_v22, %v776_v22  ;;  %v785_v32 = vmul.f32 %v777_v25, %v777_v25  ;;  %v786_v34 = vmul.f32 %v778_v28, %v778_v28  ;;  %v787_v36 = vmul.f32 %v779_v31, %v779_v31 }
 0x1a1   :  { %v788_v24 = vadd.f32 %v781_v21, %v780_v20 }
 0x1a3   :  { %v789_v27 = vadd.f32 %v788_v24, %v782_v23 }
 0x1a5   :  { %v790_v30 = vadd.f32 %v789_v27, %v783_v26 }
 0x1a7   :  { %v791_v33 = vadd.f32 %v790_v30, %v784_v29 }
 0x1a9   :  { %v792_v35 = vadd.f32 %v791_v33, %v785_v32 }
 0x1ab   :  { %v793_v37 = vadd.f32 %v792_v35, %v786_v34 }
 0x1ad   :  { %v794_v38 = vadd.f32 %v793_v37, %v787_v36 }
 0x1af   :  { %795 = vadd.xlane.f32.xlu0 %v794_v38 }
 0x222   :  { %v796_v40 = vpop.xlane.xlu0 %795 }
 0x223   :  { %v797_v41 = vmul.f32 %v796_v40, %v770_v10 }
 0x225   :  { %v799_v42 = vadd.f32 0.0001, %v797_v41 }
 0x227   :  { %978 = vrsqrt.f32 %v799_v42  ;;  %vm806_vm9 = vweird.f32 %v799_v42 }
 0x22d   :  { %v979_v43 = vpop.eup %978 }
 0x22e   :  { %v801_v44 = vmul.f32 %v979_v43, %v799_v42  ;;  %vm807_vm8 = vweird.f32 %v979_v43 }
 0x22f   :  { %vm808_vm10 = vmor %vm806_vm9, %vm807_vm8 }
 0x230   :  { %v802_v45 = vmul.f32 %v979_v43, %v801_v44 }
 0x232   :  { %v803_v46 = vmul.f32 0.5, %v802_v45 }
 0x234   :  { %v804_v47 = vsub.f32 1.5, %v803_v46 }
 0x236   :  { %v805_v49 = vmul.f32 %v979_v43, %v804_v47 }
 0x238   :  { %v809_v50 = vsel %vm808_vm10, %v979_v43, %v805_v49 }
 0x239   :  { %v810_v51 = vmul.f32 %v809_v50, %v798_v48 }
 0x23b   :  { %813 = vperm.xlu1 %974, %v810_v51  }
 0x243   :  { %827 = vperm.xlu1 %974, %v824_v52  }
 0x2ad   :  { %v814_v53 = vpop.permute.xlu1 %813 }
 0x2ae   :  { %v816_v54 = vmul.f32 %v814_v53, %v772_v16  ;;  %v817_v55 = vmul.f32 %v814_v53, %v773_v17  ;;  %v818_v56 = vmul.f32 %v814_v53, %v774_v18  ;;  %v819_v57 = vmul.f32 %v814_v53, %v775_v19 }
 0x2af   :  { %v820_v58 = vmul.f32 %v814_v53, %v776_v22  ;;  %v821_v59 = vmul.f32 %v814_v53, %v777_v25  ;;  %v822_v60 = vmul.f32 %v814_v53, %v778_v28  ;;  %v823_v61 = vmul.f32 %v814_v53, %v779_v31 }
 0x2b5   :  { %v828_v62 = vpop.permute.xlu1 %827 }
 0x2b6   :  { %v830_v63 = vadd.f32 %v828_v62, %v816_v54  ;;  %v831_v0 = vadd.f32 %v828_v62, %v817_v55  ;;  %v832_v1 = vadd.f32 %v828_v62, %v818_v56  ;;  %v833_v2 = vadd.f32 %v828_v62, %v819_v57 }
 0x2b7   :  { %v834_v5 = vadd.f32 %v828_v62, %v820_v58  ;;  %v835_v9 = vadd.f32 %v828_v62, %v821_v59  ;;  %v836_v10 = vadd.f32 %v828_v62, %v822_v60  ;;  %v837_v11 = vadd.f32 %v828_v62, %v823_v61 }
 0x2b8   :  { %v856_v12 = vadd.f32 %v830_v63, %v1055_v15  ;;  %v857_v16 = vadd.f32 %v831_v0, %v1035_v6  ;;  %v858_v17 = vadd.f32 %v832_v1, %v1037_v7  ;;  %v859_v18 = vadd.f32 %v833_v2, %v1039_v8 }
 0x2b9   :  { %v860_v19 = vadd.f32 %v834_v5, %v1053_v14  ;;  %v861_v20 = vadd.f32 %v835_v9, %v1028_v3  ;;  %v862_v21 = vadd.f32 %v836_v10, %v1051_v13  ;;  %v863_v22 = vadd.f32 %v837_v11, %v1030_v4 }
 0x2ba   :  { %v864_v23 = vmul.f32 0.5, %v856_v12  ;;  %v865_v24 = vmul.f32 0.5, %v857_v16  ;;  %v866_v25 = vmul.f32 0.5, %v858_v17  ;;  %v867_v26 = vmul.f32 0.5, %v859_v18 }
 0x2bb   :  { %v868_v27 = vmul.f32 0.5, %v860_v19  ;;  %v869_v15 = vmul.f32 0.5, %v861_v20  ;;  %v870_v28 = vmul.f32 0.5, %v862_v21  ;;  %v871_v6 = vmul.f32 0.5, %v863_v22 }
 0x2bc   :  { %v872_v29 = vmax.f32 %v864_v23, 0.0  ;;  %v873_v7 = vmax.f32 %v865_v24, 0.0  ;;  %v874_v30 = vmax.f32 %v866_v25, 0.0  ;;  %v875_v8 = vmax.f32 %v867_v26, 0.0 }
 0x2bd   :  { %v876_v31 = vmax.f32 %v868_v27, 0.0  ;;  %v877_v14 = vmax.f32 %v869_v15, 0.0  ;;  %v878_v32 = vmax.f32 %v870_v28, 0.0  ;;  %v879_v3 = vmax.f32 %v871_v6, 0.0 }
 0x2be   :  { %v880_v33 = vpack.c.bf16 %v873_v7, %v872_v29  ;;  %v881_v13 = vpack.c.bf16 %v875_v8, %v874_v30 }
 0x2bf   :  { %v882_v34 = vpack.c.bf16 %v877_v14, %v876_v31  ;;  %v883_v4 = vpack.c.bf16 %v879_v3, %v878_v32 }
 0x2c0   :  { %884 = vst [vmem:[%s1194_s6] sm:$0xff] %v880_v33 }
 0x2c1   :  { %885 = vst [vmem:[%s1194_s6 + $0x8] sm:$0xff] %v881_v13 }
 0x2c2   :  { %886 = vst [vmem:[%s1194_s6 + $0x10] sm:$0xff] %v882_v34 }
 0x2c3   :  { %887 = vst [vmem:[%s1194_s6 + $0x18] sm:$0xff] %v883_v4 }

// kernel: _lambda_.12
= control target key start
LH: loop header
LB: loop body
LE: loop exit
PB: predicated region body
PF: predicated region fallthrough
CT: control target
= control target key end

     0   :  { %s1313_s13 = smov 0   ;;  %s1449_s0 = inlined_call_operand.vmem [shape: bf16[8,512], index: 0, kind: input, shape index: {}]   ;;  %s1450_s1 = inlined_call_operand.vmem [shape: bf16[8,512], index: 1, kind: input, shape index: {}]   ;;  %s1451_s2 = inlined_call_operand.vmem [shape: f32[16,8], index: 2, kind: input, shape index: {}]   ;;  %s1452_s3 = inlined_call_operand.vmem [shape: f32[16,8], index: 3, kind: input, shape index: {}]   ;;  %s1453_s4 = inlined_call_operand.vmem [shape: f32[16,8], index: 4, kind: input, shape index: {}]   ;;  %s1454_s5 = inlined_call_operand.vmem [shape: f32[16,8], index: 5, kind: input, shape index: {}]   ;;  %s1455_s6 = inlined_call_operand.vmem [shape: f32[16,1], index: 6, kind: input, shape index: {}, may-alias: {6,8}]   ;;  %s1456_s7 = inlined_call_operand.vmem [shape: f32[16,1], index: 7, kind: input, shape index: {}, may-alias: {7,9}]   ;;  %s1457_s8 = inlined_call_operand.vmem [shape: f32[16,1], index: 8, kind: input, shape index: {}, may-alias: {6,8}]   ;;  %s1458_s9 = inlined_call_operand.vmem [shape: f32[16,1], index: 9, kind: input, shape index: {}, may-alias: {7,9}]   ;;  %s1459_s10 = inlined_call_operand.vmem [shape: bf16[16,512], index: 10, kind: output, shape index: {}]  }
   0x1 LB: > { %s1177_s14 = sadd.s32 4294967295, %s1253_s13   ;;  %p1181_p0 = scmp.ge.s32.totalorder %s1253_s13, 1  ;;  %s1253_s13 = sphi %s1313_s13, %s20_s13  }
   0x2   : > { %p374_p1 = scmp.lt.s32.totalorder %s1253_s13, 3 }
   0x4   : > { %p375_p2 = pnand %p1181_p0, %p374_p1 }
   0x5   : > { %p439_p3 = scmp.lt.s32.totalorder (!%p375_p2), %s1177_s14, 1  ;;  %s1255_s22 = smov (!%p375_p2), 1  }
   0x6   : > { %378 = sbr.rel (%p375_p2) target bundleno = 693 (0x2b5), region = 60 }
   0xb   : > { %v1324_v0 = vld [vmem:[%s1450_s1] sm:$0xff]  ;;  %v1329_v1 = vld [vmem:[%s1450_s1 + $0x8] sm:$0xff]  ;;  %s1461_s14 = smov (!%p439_p3, %s1177_s14), 1  ;;  %vm572_vm0 = vcmask 64512   ;;  %v488_v15 = vlaneseq  ;;  %v1256_v63 = vmov 512.0  }
   0xc   : > { %v1334_v2 = vld [vmem:[%s1449_s0 + $0x8] sm:$0xff]  ;;  %v485_v3 = vunpack.c.h.bf16 %v1324_v0  ;;  %v486_v4 = vunpack.c.l.bf16 %v1329_v1  ;;  %s1342_s21 = sshll.u32 %s1461_s14, 3  ;;  %v487_v7 = vunpack.c.h.bf16 %v1329_v1  ;;  %v484_v8 = vunpack.c.l.bf16 %v1324_v0  ;;  %v476_v11 = vld [vmem:[%s1449_s0] sm:$0xff] }
   0xd   : > { %v480_v5 = vunpack.c.l.bf16 %v1334_v2  ;;  %s446_s25 = scalar_lea.vmem %s1452_s3, %s1342_s21  ;;  %v481_v12 = vunpack.c.h.bf16 %v1334_v2  ;;  %v478_v13 = vunpack.c.l.bf16 %v476_v11  ;;  %v479_v14 = vunpack.c.h.bf16 %v476_v11  ;;  %s442_s30 = scalar_lea.vmem %s1451_s2, %s1342_s21 }
   0xe   : > { %v1228_v6 = vpack.i.bf16 %v486_v4, %v485_v3  ;;  %v571_v9 = vld [vmem:[%s446_s25] sm:$0xff]  ;;  %v1233_v10 = vpack.i.bf16 %v484_v8, %v487_v7  ;;  %v489_v16 = vand.u32 127, %v488_v15  ;;  %s450_s15 = scalar_lea.vmem %s1453_s4, %s1342_s21  ;;  %s454_s18 = scalar_lea.vmem %s1454_s5, %s1342_s21  ;;  %1241 = vrcp.f32 %v1256_v63 }
   0xf   : > { %631 = vmatpush.msra.mxu2 %v480_v5  ;;  %651 = vmatpush.msra.mxu3 %v481_v12  ;;  %v570_v22 = vld [vmem:[%s442_s30] sm:$0xff]  ;;  %s458_s25 = scalar_lea.vmem %s1455_s6, %s1342_s21  ;;  %s466_s28 = scalar_lea.vmem %s1457_s8, %s1342_s21 }
  0x10   : > { %1229 = vrot.lane.b32.xlu0 %v1228_v6, %s1255_s22  ;;  %1194 = vmatmul.msk.f32.vlgmr.msra.gmra.mxu2 %vm572_vm0, %v571_v9  ;;  %v491_v17 = vadd.s32 256, %v489_v16  ;;  %vm553_vm1 = vcmp.lt.s32.totalorder %v489_v16, 1  ;;  %v497_v24 = vand.u32 255, %v489_v16  ;;  %v739_v31 = vld [vmem:[%s450_s15] sm:$0xff]  ;;  %s470_s11 = scalar_lea.vmem %s1458_s9, %s1342_s21 }
  0x11   : > { %591 = vmatpush.msra.mxu0 %v478_v13  ;;  %611 = vmatpush.msra.mxu1 %v479_v14  ;;  %v827_v32 = vld [vmem:[%s454_s18] sm:$0xff] }
  0x12   : > { %1192 = vmatmul.msk.f32.vlgmr.msra.gmra.mxu0 %vm572_vm0, %v571_v9  ;;  %1193 = vmatmul.msk.f32.vlgmr.msra.gmra.mxu1 %vm572_vm0, %v571_v9  ;;  %v511_v18 = vand.u32 255, %v491_v17  ;;  %vm1215_vm3 = vcmp.ne.s32.totalorder %v497_v24, 0 }
  0x13   : > { %1195 = vmatmul.msk.f32.vlgmr.msra.gmra.mxu3 %vm572_vm0, %v571_v9 }
  0x14   : > { %vm1216_vm2 = vcmp.ne.s32.totalorder %v511_v18, 0  ;;  %v1242_v0 = vpop.eup %1241 }
  0x15   : > { %v917_v1 = vmul.f32 512.0, %v1242_v0  ;;  %vm921_vm4 = vweird.f32 %v1242_v0 }
  0x17   : > { %v918_v2 = vsub.f32 1.0, %v917_v1 }
  0x18   : > { %1234 = vrot.lane.b32.xlu0 %v1233_v10, %s1255_s22  ;;  %s462_s22 = scalar_lea.vmem %s1456_s7, %s1342_s21  ;;  %s1214_s21 = sshll.u32 %s1461_s14, 4 }
  0x19   : > { %s475_s16 = scalar_lea.vmem %s1459_s10, %s1214_s21 }
  0x82   : > { %v1230_v19 = vpop.permute.xlu0 %1229 }
  0x83   : > { %v1232_v20 = vunpack.i.h.bf16 %v1230_v19  ;;  %v1231_v21 = vunpack.i.l.bf16 %v1230_v19 }
  0x85   : > { %v555_v23 = vsel %vm553_vm1, %v1231_v21, %v1232_v20 }
  0x86   : > { %1201 = vmatpush.msk.msrb.mxu2 %vm1216_vm2, %v555_v23 }
  0x87   : > { %1202 = vmatmul.msk.f32.vlgmr.msrb.gmra.mxu2 %vm572_vm0, %v570_v22 }
  0x88   : > { %798 = vmatpush.msra.mxu2 %v486_v4 }
  0x8a   : > { %886 = vmatpush.msrb.mxu2 %v480_v5  ;;  %v1235_v25 = vpop.permute.xlu0 %1234 }
  0x8b   : > { %v1237_v26 = vunpack.i.h.bf16 %v1235_v25  ;;  %v1236_v27 = vunpack.i.l.bf16 %v1235_v25 }
  0x8d   : > { %v557_v28 = vsel %vm553_vm1, %v1236_v27, %v1237_v26  ;;  %v556_v29 = vsel %vm553_vm1, %v1237_v26, %v1231_v21  ;;  %v554_v30 = vsel %vm553_vm1, %v1232_v20, %v1236_v27 }
  0x8e   : > { %1197 = vmatpush.msk.msrb.mxu0 %vm1215_vm3, %v557_v28  ;;  %694 = vmatpush.msrb.mxu1 %v556_v29 }
  0x8f   : > { %734 = vmatpush.msrb.mxu3 %v554_v30  ;;  %1198 = vmatmul.msk.f32.vlgmr.msrb.gmra.mxu0 %vm572_vm0, %v570_v22  ;;  %v593_v34 = vpop.f32.mrf.mxu0  ;;  %v613_v35 = vpop.f32.mrf.mxu1 }
  0x90   : > { %1199 = vmatmul.msk.f32.vlgmr.msrb.gmra.mxu1 %vm572_vm0, %v570_v22  ;;  %1203 = vmatmul.msk.f32.vlgmr.msrb.gmra.mxu3 %vm572_vm0, %v570_v22 }
  0x91   : > { %1206 = vmatmul.msk.f32.vlgmr.msra.gmra.mxu2 %vm572_vm0, %v739_v31  ;;  %758 = vmatpush.msra.mxu0 %v484_v8 }
  0x92   : > { %778 = vmatpush.msra.mxu1 %v485_v3  ;;  %818 = vmatpush.msra.mxu3 %v487_v7  ;;  %v919_v3 = vmul.f32 %v1242_v0, %v918_v2 }
  0x93   : > { %846 = vmatpush.msrb.mxu0 %v478_v13  ;;  %v633_v33 = vpop.f32.mrf.mxu2 }
  0x94   : > { %906 = vmatpush.msrb.mxu3 %v481_v12  ;;  %866 = vmatpush.msrb.mxu1 %v479_v14  ;;  %v920_v4 = vadd.f32 %v1242_v0, %v919_v3 }
  0x96   : > { %v653_v36 = vpop.f32.mrf.mxu3  ;;  %v922_v5 = vsel %vm921_vm4, %v1242_v0, %v920_v4 }
  0x97   : > { %1204 = vmatmul.msk.f32.vlgmr.msra.gmra.mxu0 %vm572_vm0, %v739_v31 }
  0x98   : > { %1205 = vmatmul.msk.f32.vlgmr.msra.gmra.mxu1 %vm572_vm0, %v739_v31  ;;  %1207 = vmatmul.msk.f32.vlgmr.msra.gmra.mxu3 %vm572_vm0, %v739_v31 }
  0x99   : > { %1210 = vmatmul.msk.f32.vlgmr.msrb.gmra.mxu2 %vm572_vm0, %v827_v32 }
  0x9f   : > { %1208 = vmatmul.msk.f32.vlgmr.msrb.gmra.mxu0 %vm572_vm0, %v827_v32 }
  0xa0   : > { %1211 = vmatmul.msk.f32.vlgmr.msrb.gmra.mxu3 %vm572_vm0, %v827_v32  ;;  %1209 = vmatmul.msk.f32.vlgmr.msrb.gmra.mxu1 %vm572_vm0, %v827_v32  ;;  %v1257_v32 = vmov 0  }
  0xa1   : > { %1238 = vset.pattern.permute.xlu0 %v1257_v32  ;;  %1239 = vset.pattern.permute.xlu1 %v1257_v32 }
  0xa2   : > { %1240 = vset.pattern.permute.xlu2 %v1257_v32 }
 0x10a   : > { %v716_v37 = vpop.f32.mrf.mxu2 }
 0x10b   : > { %v717_v48 = vadd.f32 %v716_v37, %v633_v33 }
 0x10c   : > { %v676_v38 = vpop.f32.mrf.mxu0 }
 0x10d   : > { %v696_v39 = vpop.f32.mrf.mxu1  ;;  %v677_v40 = vadd.f32 %v676_v38, %v593_v34 }
 0x10e   : > { %v697_v42 = vadd.f32 %v696_v39, %v613_v35  ;;  %v980_v35 = vld [vmem:[%s462_s22] sm:$0xff] }
 0x113   : > { %v736_v41 = vpop.f32.mrf.mxu3 }
 0x114   : > { %v760_v43 = vpop.f32.mrf.mxu0  ;;  %v800_v44 = vpop.f32.mrf.mxu2  ;;  %v737_v50 = vadd.f32 %v736_v41, %v653_v36 }
 0x115   : > { %v823_v45 = vadd.f32 %v760_v43, %v677_v40  ;;  %v780_v46 = vpop.f32.mrf.mxu1  ;;  %v825_v51 = vadd.f32 %v800_v44, %v717_v48 }
 0x116   : > { %v824_v47 = vadd.f32 %v780_v46, %v697_v42 }
 0x118   : > { %v911_v49 = vadd.f32 %v824_v47, %v823_v45 }
 0x11a   : > { %v912_v54 = vadd.f32 %v911_v49, %v825_v51 }
 0x11b   : > { %v820_v52 = vpop.f32.mrf.mxu3 }
 0x11c   : > { %v826_v53 = vadd.f32 %v820_v52, %v737_v50  ;;  %v848_v55 = vpop.f32.mrf.mxu0  ;;  %v888_v57 = vpop.f32.mrf.mxu2 }
 0x11d   : > { %v868_v56 = vpop.f32.mrf.mxu1 }
 0x11e   : > { %v913_v58 = vadd.f32 %v912_v54, %v826_v53  ;;  %v938_v59 = vadd.f32 %v868_v56, %v848_v55  ;;  %v990_v54 = vld [vmem:[%s466_s28] sm:$0xff] }
 0x120   : > { %914 = vadd.xlane.f32.xlu1 %v913_v58  ;;  %v939_v60 = vadd.f32 %v938_v59, %v888_v57 }
 0x123   : > { %v908_v61 = vpop.f32.mrf.mxu3 }
 0x124   : > { %v940_v62 = vadd.f32 %v939_v60, %v908_v61 }
 0x128   : > { %941 = vadd.xlane.f32.xlu1 %v940_v62 }
 0x193   : > { %v915_v6 = vpop.xlane.xlu1 %914 }
 0x194   : > { %v923_v7 = vmul.f32 %v922_v5, %v915_v6 }
 0x196   : > { %v1386_v8 = vsub.f32 %v823_v45, %v923_v7  ;;  %v1388_v9 = vsub.f32 %v824_v47, %v923_v7  ;;  %v1390_v10 = vsub.f32 %v825_v51, %v923_v7  ;;  %v1392_v11 = vsub.f32 %v826_v53, %v923_v7  ;;  %v958_v47 = vld [vmem:[%s458_s25] sm:$0xff] }
 0x198   : > { %v928_v12 = vmul.f32 %v1386_v8, %v1386_v8  ;;  %v929_v13 = vmul.f32 %v1388_v9, %v1388_v9  ;;  %v930_v14 = vmul.f32 %v1390_v10, %v1390_v10  ;;  %v931_v18 = vmul.f32 %v1392_v11, %v1392_v11 }
 0x19a   : > { %v932_v15 = vadd.f32 %v929_v13, %v928_v12 }
 0x19b   : > { %v942_v16 = vpop.xlane.xlu1 %941 }
 0x19c   : > { %v943_v17 = vmul.f32 %v942_v16, %v922_v5  ;;  %v933_v19 = vadd.f32 %v932_v15, %v930_v14 }
 0x19e   : > { %v1402_v20 = vsub.f32 %v848_v55, %v943_v17  ;;  %v1404_v21 = vsub.f32 %v868_v56, %v943_v17  ;;  %v934_v22 = vadd.f32 %v933_v19, %v931_v18  ;;  %v1406_v23 = vsub.f32 %v888_v57, %v943_v17  ;;  %v1012_v57 = vld [vmem:[%s470_s11] sm:$0xff] }
 0x19f   : > { %v1408_v24 = vsub.f32 %v908_v61, %v943_v17 }
 0x1a0   : > { %935 = vadd.xlane.f32.xlu2 %v934_v22  ;;  %v948_v25 = vmul.f32 %v1402_v20, %v1402_v20  ;;  %v949_v26 = vmul.f32 %v1404_v21, %v1404_v21  ;;  %v950_v27 = vmul.f32 %v1406_v23, %v1406_v23 }
 0x1a1   : > { %v951_v29 = vmul.f32 %v1408_v24, %v1408_v24 }
 0x1a2   : > { %v952_v28 = vadd.f32 %v949_v26, %v948_v25 }
 0x1a4   : > { %v953_v30 = vadd.f32 %v952_v28, %v950_v27 }
 0x1a6   : > { %v954_v31 = vadd.f32 %v953_v30, %v951_v29 }
 0x1a8   : > { %955 = vadd.xlane.f32.xlu2 %v954_v31 }
 0x1c0   : > { %983 = vperm.xlu2 %1240, %v980_v35  }
 0x213   : > { %v936_v33 = vpop.xlane.xlu2 %935 }
 0x214   : > { %v937_v34 = vmul.f32 %v936_v33, %v922_v5 }
 0x216   : > { %v959_v36 = vadd.f32 0.0001, %v937_v34 }
 0x218   : > { %1243 = vrsqrt.f32 %v959_v36  ;;  %vm966_vm6 = vweird.f32 %v959_v36 }
 0x21b   : > { %v956_v37 = vpop.xlane.xlu2 %955 }
 0x21c   : > { %v957_v38 = vmul.f32 %v956_v37, %v922_v5 }
 0x21e   : > { %v1244_v39 = vpop.eup %1243  ;;  %v991_v40 = vadd.f32 0.0001, %v957_v38 }
 0x21f   : > { %v961_v41 = vmul.f32 %v1244_v39, %v959_v36  ;;  %vm967_vm5 = vweird.f32 %v1244_v39 }
 0x220   : > { %1245 = vrsqrt.f32 %v991_v40  ;;  %vm968_vm7 = vmor %vm966_vm6, %vm967_vm5  ;;  %vm998_vm9 = vweird.f32 %v991_v40 }
 0x221   : > { %v962_v42 = vmul.f32 %v1244_v39, %v961_v41 }
 0x223   : > { %v963_v43 = vmul.f32 0.5, %v962_v42  ;;  %v984_v0 = vpop.permute.xlu2 %983 }
 0x225   : > { %v964_v44 = vsub.f32 1.5, %v963_v43 }
 0x226   : > { %v1246_v45 = vpop.eup %1245 }
 0x227   : > { %v993_v46 = vmul.f32 %v1246_v45, %v991_v40  ;;  %v965_v48 = vmul.f32 %v1244_v39, %v964_v44  ;;  %vm999_vm8 = vweird.f32 %v1246_v45 }
 0x228   : > { %vm1000_vm10 = vmor %vm998_vm9, %vm999_vm8 }
 0x229   : > { %v994_v49 = vmul.f32 %v1246_v45, %v993_v46  ;;  %v969_v50 = vsel %vm968_vm7, %v1244_v39, %v965_v48 }
 0x22a   : > { %v970_v51 = vmul.f32 %v969_v50, %v958_v47 }
 0x22b   : > { %v995_v52 = vmul.f32 0.5, %v994_v49 }
 0x22c   : > { %973 = vperm.xlu0 %1238, %v970_v51  }
 0x22d   : > { %v996_v53 = vsub.f32 1.5, %v995_v52 }
 0x22f   : > { %v997_v55 = vmul.f32 %v1246_v45, %v996_v53 }
 0x231   : > { %v1001_v56 = vsel %vm1000_vm10, %v1246_v45, %v997_v55 }
 0x232   : > { %v1002_v58 = vmul.f32 %v1001_v56, %v990_v54 }
 0x234   : > { %1005 = vperm.xlu1 %1239, %v1002_v58   ;;  %1015 = vperm.xlu0 %1238, %v1012_v57  }
 0x29e   : > { %v974_v59 = vpop.permute.xlu0 %973 }
 0x29f   : > { %v976_v60 = vmul.f32 %v974_v59, %v1386_v8  ;;  %v977_v61 = vmul.f32 %v974_v59, %v1388_v9  ;;  %v978_v62 = vmul.f32 %v974_v59, %v1390_v10  ;;  %v979_v63 = vmul.f32 %v974_v59, %v1392_v11 }
 0x2a1   : > { %v986_v6 = vadd.f32 %v984_v0, %v976_v60  ;;  %v987_v7 = vadd.f32 %v984_v0, %v977_v61  ;;  %v988_v8 = vadd.f32 %v984_v0, %v978_v62  ;;  %v989_v12 = vadd.f32 %v984_v0, %v979_v63 }
 0x2a6   : > { %v1006_v1 = vpop.permute.xlu1 %1005  ;;  %v1016_v9 = vpop.permute.xlu0 %1015 }
 0x2a7   : > { %v1008_v2 = vmul.f32 %v1006_v1, %v1402_v20  ;;  %v1009_v3 = vmul.f32 %v1006_v1, %v1404_v21  ;;  %v1010_v4 = vmul.f32 %v1006_v1, %v1406_v23  ;;  %v1011_v5 = vmul.f32 %v1006_v1, %v1408_v24 }
 0x2a9   : > { %v1018_v13 = vadd.f32 %v1016_v9, %v1008_v2  ;;  %v1019_v10 = vadd.f32 %v1016_v9, %v1009_v3  ;;  %v1020_v14 = vadd.f32 %v1016_v9, %v1010_v4  ;;  %v1021_v11 = vadd.f32 %v1016_v9, %v1011_v5 }
 0x2ab   : > { %v1022_v15 = vadd.f32 %v1018_v13, %v986_v6  ;;  %v1023_v16 = vadd.f32 %v1019_v10, %v987_v7  ;;  %v1024_v17 = vadd.f32 %v1020_v14, %v988_v8  ;;  %v1025_v18 = vadd.f32 %v1021_v11, %v989_v12 }
 0x2ad   : > { %v1026_v19 = vmul.f32 0.5, %v1022_v15  ;;  %v1027_v20 = vmul.f32 0.5, %v1023_v16  ;;  %v1028_v21 = vmul.f32 0.5, %v1024_v17  ;;  %v1029_v22 = vmul.f32 0.5, %v1025_v18 }
 0x2af   : > { %v1030_v23 = vmax.f32 %v1026_v19, 0.0  ;;  %v1031_v24 = vmax.f32 %v1027_v20, 0.0  ;;  %v1032_v25 = vmax.f32 %v1028_v21, 0.0  ;;  %v1033_v26 = vmax.f32 %v1029_v22, 0.0 }
 0x2b1   : > { %v1034_v27 = vpack.c.bf16 %v1031_v24, %v1030_v23  ;;  %v1035_v28 = vpack.c.bf16 %v1033_v26, %v1032_v25 }
 0x2b3   : > { %1036 = vst [vmem:[%s475_s16] sm:$0xff] %v1034_v27 }
 0x2b4   : > { %1037 = vst [vmem:[%s475_s16 + $0x8] sm:$0xff] %v1035_v28 }
 0x2b5 PF: > { %s20_s13 = sadd.s32 1, %s1253_s13  }
 0x2b6   : > { %p17_p4 = scmp.ge.s32.totalorder %s20_s13, 4  }
 0x2b8   :  { %19 = sbr.rel (!%p17_p4) target bundleno = 1 (0x1), region = 111 }

// kernel: _lambda_.13
= control target key start
LH: loop header
LB: loop body
LE: loop exit
PB: predicated region body
PF: predicated region fallthrough
CT: control target
= control target key end

     0   :  { %s1077_s21 = smov 0   ;;  %s1225_s0 = inlined_call_operand.vmem [shape: bf16[16,512], index: 0, kind: input, shape index: {}]   ;;  %s1226_s1 = inlined_call_operand.vmem [shape: f32[16,16], index: 1, kind: input, shape index: {}]   ;;  %s1227_s2 = inlined_call_operand.vmem [shape: f32[16,16], index: 2, kind: input, shape index: {}]   ;;  %s1228_s3 = inlined_call_operand.vmem [shape: f32[16,16], index: 3, kind: input, shape index: {}]   ;;  %s1229_s4 = inlined_call_operand.vmem [shape: f32[16,1], index: 4, kind: input, shape index: {}]   ;;  %s1230_s5 = inlined_call_operand.vmem [shape: f32[16,1], index: 5, kind: input, shape index: {}]   ;;  %s1231_s6 = inlined_call_operand.vmem [shape: bf16[16,512], index: 6, kind: output, shape index: {}]  }
   0x1 LB: > { %s1083_s22 = sadd.s32 4294967295, %s1036_s21   ;;  %p925_p0 = scmp.ge.s32.totalorder %s1036_s21, 1  ;;  %s1036_s21 = sphi %s1077_s21, %s16_s21  }
   0x2   : > { %p247_p1 = scmp.lt.s32.totalorder %s1036_s21, 3 }
   0x4   : > { %p248_p2 = pnand %p925_p0, %p247_p1 }
   0x5   : > { %s1038_s7 = smov (!%p248_p2), 1   ;;  %s1039_s8 = smov (!%p248_p2), 127  }
   0x6   : > { %251 = sbr.rel (%p248_p2) target bundleno = 694 (0x2b6), region = 44  ;;  %p292_p3 = scmp.lt.s32.totalorder (!%p248_p2), %s1083_s22, 1 }
   0x7   : > { %s961_s28 = sshll.u32 (!%p248_p2), %s1083_s22, 3 }
   0x8   : > { %s789_s29 = sshra.s32 (!%p248_p2), %s961_s28, 3 }
   0x9   : > { %s967_s30 = sshll.u32 (!%p248_p2), %s789_s29, 4 }
   0xa   : > { %s793_s11 = scalar_lea.vmem (!%p248_p2), %s1225_s0, %s967_s30 }
   0xb   : > { %v319_v0 = vld [vmem:[%s1225_s0 + $0x10] sm:$0xff]  ;;  %v320_v1 = vld [vmem:[%s1225_s0 + $0x18] sm:$0xff]  ;;  %v317_v6 = vld [vmem:[%s1225_s0] sm:$0xff]  ;;  %s1101_s9 = scalar_select %p292_p3, %s1083_s22, 1  ;;  %vm475_vm0 = vcmask 130048   ;;  %v329_v20 = vlaneseq }
   0xc   : > { %v326_v2 = vunpack.c.h.bf16 %v319_v0  ;;  %v327_v3 = vunpack.c.l.bf16 %v320_v1  ;;  %v325_v4 = vunpack.c.l.bf16 %v319_v0  ;;  %v328_v5 = vunpack.c.h.bf16 %v320_v1  ;;  %v318_v7 = vld [vmem:[%s1225_s0 + $0x8] sm:$0xff] }
   0xd   : > { %v322_v11 = vunpack.c.h.bf16 %v317_v6  ;;  %v323_v12 = vunpack.c.l.bf16 %v318_v7  ;;  %v321_v13 = vunpack.c.l.bf16 %v317_v6  ;;  %v324_v14 = vunpack.c.h.bf16 %v318_v7  ;;  %s1104_s10 = sshll.u32 %s1101_s9, 3  ;;  %s966_s22 = sshll.u32 %s1101_s9, 4 }
   0xe   : > { %v984_v8 = vpack.i.bf16 %v327_v3, %v326_v2  ;;  %v994_v9 = vpack.i.bf16 %v325_v4, %v328_v5  ;;  %v1004_v10 = vpack.i.bf16 %v328_v5, %v327_v3  ;;  %493 = vmatpush.msra.mxu0 %v325_v4  ;;  %513 = vmatpush.msra.mxu1 %v326_v2  ;;  %s299_s13 = scalar_lea.vmem %s1227_s2, %s1104_s10  ;;  %v1114_v21 = vand.u32 127, %v329_v20  ;;  %s295_s16 = scalar_lea.vmem %s1226_s1, %s1104_s10 }
   0xf   : > { %533 = vmatpush.msra.mxu2 %v327_v3  ;;  %553 = vmatpush.msra.mxu3 %v328_v5  ;;  %v989_v15 = vpack.i.bf16 %v323_v12, %v322_v11  ;;  %v999_v16 = vpack.i.bf16 %v321_v13, %v324_v14  ;;  %v1009_v17 = vpack.i.bf16 %v323_v12, %v325_v4  ;;  %v473_v19 = vld [vmem:[%s299_s13] sm:$0xff]  ;;  %s303_s19 = scalar_lea.vmem %s1228_s3, %s1104_s10  ;;  %s307_s24 = scalar_lea.vmem %s1229_s4, %s1104_s10 }
  0x10   : > { %985 = vrot.lane.b32.xlu0 %v984_v8, %s1038_s7  ;;  %995 = vrot.lane.b32.xlu1 %v994_v9, %s1038_s7  ;;  %v1019_v18 = vpack.i.bf16 %v322_v11, %v326_v2  ;;  %v332_v22 = vadd.s32 256, %v1114_v21  ;;  %v338_v24 = vand.u32 255, %v1114_v21  ;;  %vm402_vm1 = vcmp.lt.s32.totalorder %v1114_v21, 1  ;;  %v472_v55 = vld [vmem:[%s295_s16] sm:$0xff]  ;;  %s311_s27 = scalar_lea.vmem %s1230_s5, %s1104_s10  ;;  %s316_s13 = scalar_lea.vmem %s1231_s6, %s966_s22 }
  0x11   : > { %1005 = vrot.lane.b32.xlu2 %v1004_v10, %s1039_s8  ;;  %494 = vmatpush.msra.mxu0 %v321_v13  ;;  %v333_v38 = vadd.s32 384, %v1114_v21  ;;  %v331_v46 = vadd.s32 128, %v1114_v21  ;;  %vm447_vm4 = vcmp.lt.s32.totalorder %v1114_v21, 127  ;;  %v474_v8 = vld [vmem:[%s303_s19] sm:$0xff] }
  0x12   : > { %514 = vmatpush.msra.mxu1 %v322_v11  ;;  %534 = vmatpush.msra.mxu2 %v323_v12  ;;  %v352_v25 = vand.u32 255, %v332_v22  ;;  %vm1121_vm2 = vcmp.ne.s32.totalorder %v338_v24, 0  ;;  %v756_v63 = vld [vmem:[%s307_s24] sm:$0xff] }
  0x13   : > { %554 = vmatpush.msra.mxu3 %v324_v14  ;;  %933 = vmatmul.msk.f32.vlgmr.msra.gmra.mxu0 %vm475_vm0, %v473_v19  ;;  %v359_v45 = vand.u32 255, %v333_v38  ;;  %v345_v56 = vand.u32 255, %v331_v46 }
  0x14   : > { %934 = vmatmul.msk.f32.vlgmr.msra.gmra.mxu1 %vm475_vm0, %v473_v19  ;;  %935 = vmatmul.msk.f32.vlgmr.msra.gmra.mxu2 %vm475_vm0, %v473_v19  ;;  %vm1125_vm3 = vcmp.ne.s32.totalorder %v352_v25, 0 }
  0x15   : > { %936 = vmatmul.msk.f32.vlgmr.msra.gmra.mxu3 %vm475_vm0, %v473_v19  ;;  %vm1166_vm5 = vcmp.ne.s32.totalorder %v359_v45, 255  ;;  %vm1176_vm6 = vcmp.ne.s32.totalorder %v345_v56, 255 }
  0x18   : > { %990 = vrot.lane.b32.xlu0 %v989_v15, %s1038_s7  ;;  %1000 = vrot.lane.b32.xlu1 %v999_v16, %s1038_s7 }
  0x19   : > { %1010 = vrot.lane.b32.xlu2 %v1009_v17, %s1039_s8 }
  0x20   : > { %1015 = vrot.lane.b32.xlu0 %v999_v16, %s1039_s8  ;;  %1020 = vrot.lane.b32.xlu1 %v1019_v18, %s1039_s8 }
  0x6b   : > { %v1117_v23 = vpop.permute.xlu2 %1005 }
  0x6c   : > { %v1008_v40 = vunpack.i.h.bf16 %v1117_v23  ;;  %v1007_v41 = vunpack.i.l.bf16 %v1117_v23 }
  0x6e   : > { %v449_v57 = vsel %vm447_vm4, %v1007_v41, %v1008_v40 }
  0x73   : > { %v1011_v39 = vpop.permute.xlu2 %1010 }
  0x74   : > { %v1012_v42 = vunpack.i.l.bf16 %v1011_v39  ;;  %v1013_v60 = vunpack.i.h.bf16 %v1011_v39 }
  0x76   : > { %v455_v58 = vsel %vm447_vm4, %v1008_v40, %v1012_v42 }
  0x82   : > { %v986_v26 = vpop.permute.xlu0 %985  ;;  %v996_v27 = vpop.permute.xlu1 %995 }
  0x83   : > { %v988_v29 = vunpack.i.h.bf16 %v986_v26  ;;  %v987_v30 = vunpack.i.l.bf16 %v986_v26  ;;  %v998_v31 = vunpack.i.h.bf16 %v996_v27  ;;  %v997_v32 = vunpack.i.l.bf16 %v996_v27 }
  0x85   : > { %v410_v34 = vsel %vm402_vm1, %v997_v32, %v998_v31  ;;  %v408_v35 = vsel %vm402_vm1, %v998_v31, %v987_v30  ;;  %v406_v36 = vsel %vm402_vm1, %v987_v30, %v988_v29  ;;  %v404_v37 = vsel %vm402_vm1, %v988_v29, %v997_v32 }
  0x86   : > { %938 = vmatpush.msk.msrb.mxu0 %vm1121_vm2, %v410_v34  ;;  %596 = vmatpush.msrb.mxu1 %v408_v35  ;;  %v1040_v34 = vmov 512.0  }
  0x87   : > { %944 = vmatpush.msk.msrb.mxu2 %vm1125_vm3, %v406_v36  ;;  %636 = vmatpush.msrb.mxu3 %v404_v37  ;;  %1026 = vrcp.f32 %v1040_v34 }
  0x8a   : > { %v991_v43 = vpop.permute.xlu0 %990  ;;  %v1001_v44 = vpop.permute.xlu1 %1000 }
  0x8b   : > { %v993_v47 = vunpack.i.h.bf16 %v991_v43  ;;  %v992_v48 = vunpack.i.l.bf16 %v991_v43  ;;  %v1003_v49 = vunpack.i.h.bf16 %v1001_v44  ;;  %v1002_v50 = vunpack.i.l.bf16 %v1001_v44 }
  0x8d   : > { %v409_v51 = vsel %vm402_vm1, %v1002_v50, %v1003_v49  ;;  %v407_v52 = vsel %vm402_vm1, %v1003_v49, %v992_v48  ;;  %v405_v53 = vsel %vm402_vm1, %v992_v48, %v993_v47  ;;  %v403_v54 = vsel %vm402_vm1, %v993_v47, %v1002_v50  ;;  %v1027_v35 = vpop.eup %1026 }
  0x8e   : > { %940 = vmatpush.msk.msrb.mxu0 %vm1121_vm2, %v409_v51  ;;  %597 = vmatpush.msrb.mxu1 %v407_v52  ;;  %v735_v36 = vmul.f32 512.0, %v1027_v35  ;;  %vm739_vm7 = vweird.f32 %v1027_v35 }
  0x8f   : > { %946 = vmatpush.msk.msrb.mxu2 %vm1125_vm3, %v405_v53  ;;  %637 = vmatpush.msrb.mxu3 %v403_v54  ;;  %v1041_v54 = vmov 0  }
  0x90   : > { %941 = vmatmul.msk.f32.vlgmr.msrb.gmra.mxu0 %vm475_vm0, %v472_v55  ;;  %942 = vmatmul.msk.f32.vlgmr.msrb.gmra.mxu1 %vm475_vm0, %v472_v55  ;;  %v496_v11 = vpop.f32.mrf.mxu0  ;;  %v736_v37 = vsub.f32 1.0, %v735_v36 }
  0x91   : > { %947 = vmatmul.msk.f32.vlgmr.msrb.gmra.mxu2 %vm475_vm0, %v472_v55  ;;  %948 = vmatmul.msk.f32.vlgmr.msrb.gmra.mxu3 %vm475_vm0, %v472_v55  ;;  %v516_v12 = vpop.f32.mrf.mxu1 }
  0x92   : > { %699 = vmatpush.msra.mxu2 %v449_v57  ;;  %957 = vmatpush.msk.msra.mxu3 %vm1166_vm5, %v455_v58  ;;  %v1016_v61 = vpop.permute.xlu0 %1015  ;;  %v1021_v62 = vpop.permute.xlu1 %1020  ;;  %v737_v38 = vmul.f32 %v1027_v35, %v736_v37 }
  0x93   : > { %v1018_v0 = vunpack.i.h.bf16 %v1016_v61  ;;  %v1017_v1 = vunpack.i.l.bf16 %v1016_v61  ;;  %v1023_v2 = vunpack.i.h.bf16 %v1021_v62  ;;  %v1022_v3 = vunpack.i.l.bf16 %v1021_v62  ;;  %1024 = vset.pattern.permute.xlu1 %v1041_v54  ;;  %1025 = vset.pattern.permute.xlu0 %v1041_v54 }
  0x94   : > { %v738_v39 = vadd.f32 %v1027_v35, %v737_v38 }
  0x95   : > { %v453_v4 = vsel %vm447_vm4, %v1012_v42, %v1022_v3  ;;  %v451_v5 = vsel %vm447_vm4, %v1022_v3, %v1007_v41  ;;  %v448_v6 = vsel %vm447_vm4, %v1013_v60, %v1017_v1  ;;  %v454_v7 = vsel %vm447_vm4, %v1017_v1, %v1018_v0  ;;  %v778_v3 = vld [vmem:[%s311_s27] sm:$0xff] }
  0x96   : > { %659 = vmatpush.msra.mxu0 %v453_v4  ;;  %951 = vmatpush.msk.msra.mxu1 %vm1176_vm6, %v451_v5  ;;  %v452_v9 = vsel %vm447_vm4, %v1018_v0, %v1023_v2  ;;  %v450_v10 = vsel %vm447_vm4, %v1023_v2, %v1013_v60  ;;  %v740_v40 = vsel %vm739_vm7, %v1027_v35, %v738_v39  ;;  %v794_v5 = vld [vmem:[%s793_s11] sm:$0xff] }
  0x97   : > { %700 = vmatpush.msra.mxu2 %v448_v6  ;;  %959 = vmatpush.msk.msra.mxu3 %vm1166_vm5, %v454_v7  ;;  %v536_v13 = vpop.f32.mrf.mxu2  ;;  %v795_v6 = vld [vmem:[%s793_s11 + $0x8] sm:$0xff]  ;;  %v796_v7 = vunpack.c.l.bf16 %v794_v5 }
  0x98   : > { %660 = vmatpush.msra.mxu0 %v452_v9  ;;  %953 = vmatpush.msk.msra.mxu1 %vm1176_vm6, %v450_v10  ;;  %v556_v14 = vpop.f32.mrf.mxu3  ;;  %v798_v9 = vunpack.c.l.bf16 %v795_v6  ;;  %v799_v10 = vunpack.c.h.bf16 %v795_v6 }
  0x99   : > { %955 = vmatmul.msk.f32.vlgmr.msra.gmra.mxu2 %vm475_vm0, %v474_v8  ;;  %960 = vmatmul.msk.f32.vlgmr.msra.gmra.mxu3 %vm475_vm0, %v474_v8 }
  0x9a   : > { %949 = vmatmul.msk.f32.vlgmr.msra.gmra.mxu0 %vm475_vm0, %v474_v8  ;;  %954 = vmatmul.msk.f32.vlgmr.msra.gmra.mxu1 %vm475_vm0, %v474_v8  ;;  %v797_v8 = vunpack.c.h.bf16 %v794_v5 }
 0x10d   : > { %v579_v15 = vpop.f32.mrf.mxu0  ;;  %v599_v16 = vpop.f32.mrf.mxu1 }
 0x10e   : > { %v580_v19 = vadd.f32 %v579_v15, %v496_v11  ;;  %v600_v20 = vadd.f32 %v599_v16, %v516_v12 }
 0x114   : > { %v619_v17 = vpop.f32.mrf.mxu2  ;;  %v639_v18 = vpop.f32.mrf.mxu3 }
 0x115   : > { %v620_v25 = vadd.f32 %v619_v17, %v536_v13  ;;  %v640_v28 = vadd.f32 %v639_v18, %v556_v14 }
 0x117   : > { %v662_v21 = vpop.f32.mrf.mxu0  ;;  %v682_v22 = vpop.f32.mrf.mxu1 }
 0x118   : > { %v725_v23 = vadd.f32 %v662_v21, %v580_v19  ;;  %v726_v24 = vadd.f32 %v682_v22, %v600_v20 }
 0x11a   : > { %v729_v29 = vadd.f32 %v726_v24, %v725_v23 }
 0x11c   : > { %v702_v26 = vpop.f32.mrf.mxu2  ;;  %v722_v27 = vpop.f32.mrf.mxu3 }
 0x11d   : > { %v727_v30 = vadd.f32 %v702_v26, %v620_v25  ;;  %v728_v32 = vadd.f32 %v722_v27, %v640_v28 }
 0x11f   : > { %v730_v31 = vadd.f32 %v729_v29, %v727_v30 }
 0x121   : > { %v731_v33 = vadd.f32 %v730_v31, %v728_v32 }
 0x123   : > { %732 = vadd.xlane.f32.xlu2 %v731_v33 }
 0x196   : > { %v733_v41 = vpop.xlane.xlu2 %732 }
 0x197   : > { %v741_v42 = vmul.f32 %v740_v40, %v733_v41 }
 0x199   : > { %v742_v43 = vsub.f32 %v725_v23, %v741_v42  ;;  %v743_v44 = vsub.f32 %v726_v24, %v741_v42  ;;  %v744_v45 = vsub.f32 %v727_v30, %v741_v42  ;;  %v745_v46 = vsub.f32 %v728_v32, %v741_v42 }
 0x19b   : > { %v746_v47 = vmul.f32 %v742_v43, %v742_v43  ;;  %v747_v48 = vmul.f32 %v743_v44, %v743_v44  ;;  %v748_v49 = vmul.f32 %v744_v45, %v744_v45  ;;  %v749_v51 = vmul.f32 %v745_v46, %v745_v46 }
 0x19d   : > { %v750_v50 = vadd.f32 %v747_v48, %v746_v47 }
 0x19f   : > { %v751_v52 = vadd.f32 %v750_v50, %v748_v49 }
 0x1a1   : > { %v752_v53 = vadd.f32 %v751_v52, %v749_v51 }
 0x1a3   : > { %753 = vadd.xlane.f32.xlu0 %v752_v53 }
 0x216   : > { %v754_v55 = vpop.xlane.xlu0 %753 }
 0x217   : > { %v755_v56 = vmul.f32 %v754_v55, %v740_v40 }
 0x219   : > { %v757_v57 = vadd.f32 0.0001, %v755_v56 }
 0x21b   : > { %1028 = vrsqrt.f32 %v757_v57  ;;  %vm764_vm9 = vweird.f32 %v757_v57 }
 0x221   : > { %v1029_v58 = vpop.eup %1028 }
 0x222   : > { %v759_v59 = vmul.f32 %v1029_v58, %v757_v57  ;;  %vm765_vm8 = vweird.f32 %v1029_v58 }
 0x223   : > { %vm766_vm10 = vmor %vm764_vm9, %vm765_vm8 }
 0x224   : > { %v760_v60 = vmul.f32 %v1029_v58, %v759_v59 }
 0x226   : > { %v761_v61 = vmul.f32 0.5, %v760_v60 }
 0x228   : > { %v762_v62 = vsub.f32 1.5, %v761_v61 }
 0x22a   : > { %v763_v0 = vmul.f32 %v1029_v58, %v762_v62 }
 0x22c   : > { %v767_v1 = vsel %vm766_vm10, %v1029_v58, %v763_v0 }
 0x22d   : > { %v768_v2 = vmul.f32 %v767_v1, %v756_v63 }
 0x22f   : > { %771 = vperm.xlu1 %1024, %v768_v2  }
 0x237   : > { %781 = vperm.xlu1 %1024, %v778_v3  }
 0x2a1   : > { %v772_v4 = vpop.permute.xlu1 %771 }
 0x2a2   : > { %v774_v11 = vmul.f32 %v772_v4, %v742_v43  ;;  %v775_v12 = vmul.f32 %v772_v4, %v743_v44  ;;  %v776_v13 = vmul.f32 %v772_v4, %v744_v45  ;;  %v777_v14 = vmul.f32 %v772_v4, %v745_v46 }
 0x2a9   : > { %v782_v15 = vpop.permute.xlu1 %781 }
 0x2aa   : > { %v784_v16 = vadd.f32 %v782_v15, %v774_v11  ;;  %v785_v17 = vadd.f32 %v782_v15, %v775_v12  ;;  %v786_v18 = vadd.f32 %v782_v15, %v776_v13  ;;  %v787_v19 = vadd.f32 %v782_v15, %v777_v14 }
 0x2ac   : > { %v800_v20 = vadd.f32 %v796_v7, %v784_v16  ;;  %v801_v21 = vadd.f32 %v797_v8, %v785_v17  ;;  %v802_v22 = vadd.f32 %v798_v9, %v786_v18  ;;  %v803_v23 = vadd.f32 %v799_v10, %v787_v19 }
 0x2ae   : > { %v804_v24 = vmul.f32 0.5, %v800_v20  ;;  %v805_v25 = vmul.f32 0.5, %v801_v21  ;;  %v806_v26 = vmul.f32 0.5, %v802_v22  ;;  %v807_v27 = vmul.f32 0.5, %v803_v23 }
 0x2b0   : > { %v808_v28 = vmax.f32 %v804_v24, 0.0  ;;  %v809_v29 = vmax.f32 %v805_v25, 0.0  ;;  %v810_v30 = vmax.f32 %v806_v26, 0.0  ;;  %v811_v31 = vmax.f32 %v807_v27, 0.0 }
 0x2b2   : > { %v812_v32 = vpack.c.bf16 %v809_v29, %v808_v28  ;;  %v813_v33 = vpack.c.bf16 %v811_v31, %v810_v30 }
 0x2b4   : > { %814 = vst [vmem:[%s316_s13] sm:$0xff] %v812_v32 }
 0x2b5   : > { %815 = vst [vmem:[%s316_s13 + $0x8] sm:$0xff] %v813_v33 }
 0x2b6 PF: > { %s16_s21 = sadd.s32 1, %s1036_s21  }
 0x2b7   : > { %p13_p4 = scmp.ge.s32.totalorder %s16_s21, 4  }
 0x2b9   :  { %15 = sbr.rel (!%p13_p4) target bundleno = 1 (0x1), region = 87 }

// kernel: _lambda_.15
= control target key start
LH: loop header
LB: loop body
LE: loop exit
PB: predicated region body
PF: predicated region fallthrough
CT: control target
= control target key end

     0   :  { %s1041_s21 = smov 0   ;;  %s1212_s0 = inlined_call_operand.vmem [shape: bf16[32,256], index: 0, kind: input, shape index: {}]   ;;  %s1213_s1 = inlined_call_operand.vmem [shape: f32[32,32], index: 1, kind: input, shape index: {}]   ;;  %s1214_s2 = inlined_call_operand.vmem [shape: f32[32,32], index: 2, kind: input, shape index: {}]   ;;  %s1215_s3 = inlined_call_operand.vmem [shape: f32[32,32], index: 3, kind: input, shape index: {}]   ;;  %s1216_s4 = inlined_call_operand.vmem [shape: f32[32,1], index: 4, kind: input, shape index: {}]   ;;  %s1217_s5 = inlined_call_operand.vmem [shape: f32[32,1], index: 5, kind: input, shape index: {}]   ;;  %s1218_s6 = inlined_call_operand.vmem [shape: bf16[32,256], index: 6, kind: output, shape index: {}]  }
   0x1 LB: > { %s852_s22 = sadd.s32 4294967295, %s1000_s21   ;;  %p856_p0 = scmp.ge.s32.totalorder %s1000_s21, 1  ;;  %s1000_s21 = sphi %s1041_s21, %s16_s21  }
   0x2   : > { %p257_p1 = scmp.lt.s32.totalorder %s1000_s21, 3 }
   0x4   : > { %p258_p2 = pnand %p856_p0, %p257_p1 }
   0x5   : > { %s1002_s7 = smov (!%p258_p2), 1   ;;  %s1003_s8 = smov (!%p258_p2), 127  }
   0x6   : > { %261 = sbr.rel (%p258_p2) target bundleno = 685 (0x2ad), region = 44  ;;  %s857_s9 = sshll.u32 (!%p258_p2), %s852_s22, 1 }
   0x7   : > { %p309_p3 = scmp.lt.s32.totalorder (!%p258_p2), %s857_s9, 3  ;;  %s914_s28 = sshll.u32 (!%p258_p2), %s852_s22, 4 }
   0xb   : > { %v348_v0 = vld [vmem:[%s1212_s0 + $0x18] sm:$0xff]  ;;  %v346_v1 = vld [vmem:[%s1212_s0 + $0x8] sm:$0xff]  ;;  %v347_v6 = vld [vmem:[%s1212_s0 + $0x10] sm:$0xff]  ;;  %v357_v16 = vlaneseq  ;;  %s1224_s9 = smov (!%p309_p3, %s857_s9), 3  ;;  %vm468_vm0 = vcmask 261120  }
   0xc   : > { %v355_v2 = vunpack.c.l.bf16 %v348_v0  ;;  %v356_v3 = vunpack.c.h.bf16 %v348_v0  ;;  %v351_v4 = vunpack.c.l.bf16 %v346_v1  ;;  %v352_v5 = vunpack.c.h.bf16 %v346_v1  ;;  %v345_v7 = vld [vmem:[%s1212_s0] sm:$0xff]  ;;  %s1065_s10 = sshll.u32 %s1224_s9, 3 }
   0xd   : > { %v353_v10 = vunpack.c.l.bf16 %v347_v6  ;;  %v354_v11 = vunpack.c.h.bf16 %v347_v6  ;;  %v349_v12 = vunpack.c.l.bf16 %v345_v7  ;;  %v350_v13 = vunpack.c.h.bf16 %v345_v7  ;;  %s318_s13 = scalar_lea.vmem %s1214_s2, %s1065_s10  ;;  %s312_s16 = scalar_lea.vmem %s1213_s1, %s1065_s10 }
   0xe   : > { %v945_v8 = vpack.i.bf16 %v356_v3, %v355_v2  ;;  %v955_v9 = vpack.i.bf16 %v352_v5, %v351_v4  ;;  %925 = vmatpush.msra.mxu2 %v355_v2  ;;  %929 = vmatpush.msra.mxu3 %v356_v3  ;;  %v1063_v17 = vand.u32 127, %v357_v16  ;;  %v465_v19 = vld [vmem:[%s318_s13 + $0x8] sm:$0xff]  ;;  %v464_v27 = vld [vmem:[%s318_s13] sm:$0xff]  ;;  %s324_s19 = scalar_lea.vmem %s1215_s3, %s1065_s10  ;;  %s1188_s24 = scalar_lea.vmem %s1217_s5, %s1065_s10 }
   0xf   : > { %487 = vmatpush.msra.mxu0 %v355_v2  ;;  %510 = vmatpush.msra.mxu1 %v356_v3  ;;  %v950_v14 = vpack.i.bf16 %v354_v11, %v353_v10  ;;  %v960_v15 = vpack.i.bf16 %v350_v13, %v349_v12  ;;  %v462_v54 = vld [vmem:[%s312_s16] sm:$0xff]  ;;  %v463_v2 = vld [vmem:[%s312_s16 + $0x8] sm:$0xff]  ;;  %s330_s27 = scalar_lea.vmem %s1216_s4, %s1065_s10  ;;  %s343_s9 = scalar_lea.vmem %s1218_s6, %s1065_s10 }
  0x10   : > { %946 = vrot.lane.b32.xlu0 %v945_v8, %s1002_s7  ;;  %956 = vrot.lane.b32.xlu1 %v955_v9, %s1002_s7  ;;  %v359_v18 = vadd.s32 128, %v1063_v17  ;;  %vm441_vm1 = vcmp.lt.s32.totalorder %v1063_v17, 127  ;;  %vm923_vm3 = vcmp.ne.s32.totalorder %v1063_v17, 127  ;;  %vm402_vm4 = vcmp.lt.s32.totalorder %v1063_v17, 1  ;;  %v466_v1 = vld [vmem:[%s324_s19] sm:$0xff]  ;;  %v467_v3 = vld [vmem:[%s324_s19 + $0x8] sm:$0xff] }
  0x11   : > { %966 = vrot.lane.b32.xlu2 %v945_v8, %s1003_s8  ;;  %926 = vmatpush.msra.mxu2 %v353_v10  ;;  %vm921_vm5 = vcmp.ne.s32.totalorder %v1063_v17, 0 }
  0x12   : > { %930 = vmatpush.msra.mxu3 %v354_v11  ;;  %488 = vmatpush.msra.mxu0 %v353_v10  ;;  %v371_v20 = vand.u32 127, %v359_v18 }
  0x13   : > { %927 = vmatpush.msra.mxu2 %v351_v4  ;;  %511 = vmatpush.msra.mxu1 %v354_v11 }
  0x14   : > { %931 = vmatpush.msra.mxu3 %v352_v5  ;;  %489 = vmatpush.msra.mxu0 %v351_v4  ;;  %vm1075_vm2 = vcmp.ne.s32.totalorder %v371_v20, 127  ;;  %vm1100_vm6 = vcmp.ne.s32.totalorder %v371_v20, 0 }
  0x15   : > { %928 = vmatpush.msra.mxu2 %v349_v12  ;;  %512 = vmatpush.msra.mxu1 %v352_v5 }
  0x16   : > { %932 = vmatpush.msra.mxu3 %v350_v13  ;;  %490 = vmatpush.msra.mxu0 %v349_v12 }
  0x17   : > { %513 = vmatpush.msra.mxu1 %v350_v13  ;;  %871 = vmatmul.msk.f32.vlgmr.msra.gmra.mxu2 %vm468_vm0, %v465_v19 }
  0x18   : > { %951 = vrot.lane.b32.xlu0 %v950_v14, %s1002_s7  ;;  %961 = vrot.lane.b32.xlu1 %v960_v15, %s1002_s7  ;;  %s721_s7 = scalar_lea.vmem %s1212_s0, %s914_s28 }
  0x19   : > { %971 = vrot.lane.b32.xlu2 %v950_v14, %s1003_s8  ;;  %873 = vmatmul.msk.f32.vlgmr.msra.gmra.mxu3 %vm468_vm0, %v465_v19 }
  0x1a   : > { %870 = vmatmul.msk.f32.vlgmr.msra.gmra.mxu0 %vm468_vm0, %v464_v27  ;;  %872 = vmatmul.msk.f32.vlgmr.msra.gmra.mxu1 %vm468_vm0, %v464_v27 }
  0x20   : > { %976 = vrot.lane.b32.xlu0 %v955_v9, %s1003_s8  ;;  %981 = vrot.lane.b32.xlu1 %v960_v15, %s1003_s8 }
  0x6b   : > { %v967_v21 = vpop.permute.xlu2 %966 }
  0x6c   : > { %v969_v22 = vunpack.i.h.bf16 %v967_v21  ;;  %v968_v23 = vunpack.i.l.bf16 %v967_v21 }
  0x6e   : > { %v449_v25 = vsel %vm441_vm1, %v969_v22, %v968_v23  ;;  %v445_v26 = vsel %vm441_vm1, %v968_v23, %v969_v22 }
  0x6f   : > { %905 = vmatpush.msk.msrb.mxu1 %vm1075_vm2, %v449_v25  ;;  %895 = vmatpush.msk.msrb.mxu0 %vm923_vm3, %v445_v26  ;;  %v1004_v26 = vmov 256.0  }
  0x70   : > { %988 = vrcp.f32 %v1004_v26  ;;  %v723_v26 = vld [vmem:[%s721_s7 + $0x8] sm:$0xff] }
  0x73   : > { %v972_v28 = vpop.permute.xlu2 %971 }
  0x74   : > { %v974_v29 = vunpack.i.h.bf16 %v972_v28  ;;  %v973_v30 = vunpack.i.l.bf16 %v972_v28 }
  0x76   : > { %v448_v31 = vsel %vm441_vm1, %v974_v29, %v973_v30  ;;  %v444_v32 = vsel %vm441_vm1, %v973_v30, %v974_v29  ;;  %v989_v27 = vpop.eup %988 }
  0x77   : > { %907 = vmatpush.msk.msrb.mxu1 %vm1075_vm2, %v448_v31  ;;  %897 = vmatpush.msk.msrb.mxu0 %vm923_vm3, %v444_v32  ;;  %v636_v28 = vmul.f32 256.0, %v989_v27  ;;  %vm640_vm7 = vweird.f32 %v989_v27 }
  0x79   : > { %v637_v29 = vsub.f32 1.0, %v636_v28  ;;  %v726_v28 = vunpack.c.l.bf16 %v723_v26 }
  0x7b   : > { %v638_v30 = vmul.f32 %v989_v27, %v637_v29  ;;  %v727_v29 = vunpack.c.h.bf16 %v723_v26 }
  0x7d   : > { %v639_v31 = vadd.f32 %v989_v27, %v638_v30 }
  0x7f   : > { %v641_v32 = vsel %vm640_vm7, %v989_v27, %v639_v31 }
  0x82   : > { %v947_v33 = vpop.permute.xlu0 %946  ;;  %v957_v34 = vpop.permute.xlu1 %956 }
  0x83   : > { %v949_v35 = vunpack.i.h.bf16 %v947_v33  ;;  %v948_v36 = vunpack.i.l.bf16 %v947_v33  ;;  %v959_v40 = vunpack.i.h.bf16 %v957_v34  ;;  %v958_v41 = vunpack.i.l.bf16 %v957_v34 }
  0x85   : > { %v410_v38 = vsel %vm402_vm4, %v949_v35, %v948_v36  ;;  %v406_v39 = vsel %vm402_vm4, %v948_v36, %v949_v35  ;;  %v408_v50 = vsel %vm402_vm4, %v959_v40, %v958_v41  ;;  %v404_v51 = vsel %vm402_vm4, %v958_v41, %v959_v40 }
  0x86   : > { %875 = vmatpush.msk.msrb.mxu2 %vm921_vm5, %v410_v38  ;;  %885 = vmatpush.msk.msrb.mxu3 %vm1100_vm6, %v406_v39 }
  0x8a   : > { %v952_v42 = vpop.permute.xlu0 %951  ;;  %v962_v43 = vpop.permute.xlu1 %961 }
  0x8b   : > { %v954_v44 = vunpack.i.h.bf16 %v952_v42  ;;  %v953_v45 = vunpack.i.l.bf16 %v952_v42  ;;  %v964_v46 = vunpack.i.h.bf16 %v962_v43  ;;  %v963_v47 = vunpack.i.l.bf16 %v962_v43 }
  0x8d   : > { %v405_v48 = vsel %vm402_vm4, %v953_v45, %v954_v44  ;;  %v409_v49 = vsel %vm402_vm4, %v954_v44, %v953_v45  ;;  %v407_v52 = vsel %vm402_vm4, %v964_v46, %v963_v47  ;;  %v403_v53 = vsel %vm402_vm4, %v963_v47, %v964_v46 }
  0x8e   : > { %887 = vmatpush.msk.msrb.mxu3 %vm1100_vm6, %v405_v48  ;;  %877 = vmatpush.msk.msrb.mxu2 %vm921_vm5, %v409_v49  ;;  %v1005_v47 = vmov 0   ;;  %v700_v48 = vld [vmem:[%s1188_s24] sm:$0xff] }
  0x8f   : > { %987 = vset.pattern.permute.xlu1 %v1005_v47  ;;  %985 = vset.pattern.permute.xlu2 %v1005_v47 }
  0x90   : > { %879 = vmatpush.msk.msrb.mxu2 %vm921_vm5, %v408_v50  ;;  %889 = vmatpush.msk.msrb.mxu3 %vm1100_vm6, %v404_v51 }
  0x91   : > { %986 = vset.pattern.permute.xlu0 %v1005_v47 }
  0x92   : > { %881 = vmatpush.msk.msrb.mxu2 %vm921_vm5, %v407_v52  ;;  %891 = vmatpush.msk.msrb.mxu3 %vm1100_vm6, %v403_v53  ;;  %v977_v55 = vpop.permute.xlu0 %976  ;;  %v982_v56 = vpop.permute.xlu1 %981 }
  0x93   : > { %882 = vmatmul.msk.f32.vlgmr.msrb.gmra.mxu2 %vm468_vm0, %v462_v54  ;;  %892 = vmatmul.msk.f32.vlgmr.msrb.gmra.mxu3 %vm468_vm0, %v462_v54  ;;  %v979_v57 = vunpack.i.h.bf16 %v977_v55  ;;  %v978_v58 = vunpack.i.l.bf16 %v977_v55  ;;  %v984_v59 = vunpack.i.h.bf16 %v982_v56  ;;  %v983_v60 = vunpack.i.l.bf16 %v982_v56 }
  0x95   : > { %v443_v61 = vsel %vm441_vm1, %v978_v58, %v979_v57  ;;  %v447_v62 = vsel %vm441_vm1, %v979_v57, %v978_v58  ;;  %v442_v63 = vsel %vm441_vm1, %v983_v60, %v984_v59  ;;  %v446_v0 = vsel %vm441_vm1, %v984_v59, %v983_v60 }
  0x96   : > { %899 = vmatpush.msk.msrb.mxu0 %vm923_vm3, %v443_v61  ;;  %909 = vmatpush.msk.msrb.mxu1 %vm1075_vm2, %v447_v62  ;;  %v660_v62 = vld [vmem:[%s330_s27] sm:$0xff] }
  0x97   : > { %v492_v6 = vpop.f32.mrf.mxu0  ;;  %v515_v7 = vpop.f32.mrf.mxu1 }
  0x98   : > { %901 = vmatpush.msk.msrb.mxu0 %vm923_vm3, %v442_v63  ;;  %911 = vmatpush.msk.msrb.mxu1 %vm1075_vm2, %v446_v0 }
  0x99   : > { %902 = vmatmul.msk.f32.vlgmr.msrb.gmra.mxu0 %vm468_vm0, %v466_v1  ;;  %912 = vmatmul.msk.f32.vlgmr.msrb.gmra.mxu1 %vm468_vm0, %v466_v1 }
  0x9a   : > { %v495_v4 = vpop.f32.mrf.mxu2 }
  0x9b   : > { %883 = vmatmul.msk.f32.gmra.mxu2 %vm468_vm0, %v463_v2  ;;  %893 = vmatmul.msk.f32.gmra.mxu3 %vm468_vm0, %v463_v2 }
  0x9c   : > { %v518_v5 = vpop.f32.mrf.mxu3 }
  0xa1   : > { %903 = vmatmul.msk.f32.gmra.mxu0 %vm468_vm0, %v467_v3  ;;  %913 = vmatmul.msk.f32.gmra.mxu1 %vm468_vm0, %v467_v3 }
 0x116   : > { %v544_v8 = vpop.f32.mrf.mxu2  ;;  %v567_v9 = vpop.f32.mrf.mxu3 }
 0x117   : > { %v545_v10 = vadd.f32 %v544_v8, %v492_v6  ;;  %v568_v11 = vadd.f32 %v567_v9, %v515_v7  ;;  %v596_v12 = vpop.f32.mrf.mxu0  ;;  %v619_v13 = vpop.f32.mrf.mxu1  ;;  %v701_v8 = vld [vmem:[%s1188_s24 + $0x8] sm:$0xff] }
 0x119   : > { %v625_v14 = vadd.f32 %v596_v12, %v545_v10  ;;  %v626_v15 = vadd.f32 %v619_v13, %v568_v11  ;;  %v722_v10 = vld [vmem:[%s721_s7] sm:$0xff] }
 0x11b   : > { %v629_v16 = vadd.f32 %v626_v15, %v625_v14 }
 0x11d   : > { %630 = vadd.xlane.f32.xlu2 %v629_v16  ;;  %v725_v16 = vunpack.c.h.bf16 %v722_v10 }
 0x11e   : > { %v547_v17 = vpop.f32.mrf.mxu2  ;;  %v570_v18 = vpop.f32.mrf.mxu3 }
 0x11f   : > { %v548_v19 = vadd.f32 %v547_v17, %v495_v4  ;;  %v571_v20 = vadd.f32 %v570_v18, %v518_v5  ;;  %v599_v21 = vpop.f32.mrf.mxu0  ;;  %v622_v22 = vpop.f32.mrf.mxu1  ;;  %v661_v5 = vld [vmem:[%s330_s27 + $0x8] sm:$0xff] }
 0x121   : > { %v627_v23 = vadd.f32 %v599_v21, %v548_v19  ;;  %v628_v24 = vadd.f32 %v622_v22, %v571_v20 }
 0x123   : > { %v632_v25 = vadd.f32 %v628_v24, %v627_v23 }
 0x125   : > { %633 = vadd.xlane.f32.xlu0 %v632_v25 }
 0x190   : > { %v631_v33 = vpop.xlane.xlu2 %630 }
 0x191   : > { %v642_v34 = vmul.f32 %v641_v32, %v631_v33 }
 0x193   : > { %v1168_v35 = vsub.f32 %v625_v14, %v642_v34  ;;  %v1170_v36 = vsub.f32 %v626_v15, %v642_v34  ;;  %v724_v15 = vunpack.c.l.bf16 %v722_v10 }
 0x195   : > { %v648_v37 = vmul.f32 %v1168_v35, %v1168_v35  ;;  %v649_v38 = vmul.f32 %v1170_v36, %v1170_v36 }
 0x197   : > { %v652_v39 = vadd.f32 %v649_v38, %v648_v37 }
 0x198   : > { %v634_v40 = vpop.xlane.xlu0 %633 }
 0x199   : > { %v643_v41 = vmul.f32 %v641_v32, %v634_v40  ;;  %653 = vadd.xlane.f32.xlu1 %v652_v39 }
 0x19b   : > { %v1176_v42 = vsub.f32 %v627_v23, %v643_v41  ;;  %v1178_v43 = vsub.f32 %v628_v24, %v643_v41 }
 0x19d   : > { %v650_v44 = vmul.f32 %v1176_v42, %v1176_v42  ;;  %v651_v45 = vmul.f32 %v1178_v43, %v1178_v43 }
 0x19f   : > { %v655_v46 = vadd.f32 %v651_v45, %v650_v44 }
 0x1a1   : > { %656 = vadd.xlane.f32.xlu2 %v655_v46 }
 0x1b2   : > { %704 = vperm.xlu1 %987, %v700_v48  }
 0x20c   : > { %v654_v49 = vpop.xlane.xlu1 %653 }
 0x20d   : > { %v658_v50 = vmul.f32 %v654_v49, %v641_v32 }
 0x20f   : > { %v662_v51 = vadd.f32 0.0001, %v658_v50 }
 0x211   : > { %990 = vrsqrt.f32 %v662_v51  ;;  %vm670_vm9 = vweird.f32 %v662_v51 }
 0x214   : > { %v657_v52 = vpop.xlane.xlu2 %656 }
 0x215   : > { %v659_v53 = vmul.f32 %v657_v52, %v641_v32 }
 0x217   : > { %v991_v54 = vpop.eup %990  ;;  %v663_v55 = vadd.f32 0.0001, %v659_v53 }
 0x218   : > { %v665_v56 = vmul.f32 %v991_v54, %v662_v51  ;;  %vm671_vm8 = vweird.f32 %v991_v54 }
 0x219   : > { %992 = vrsqrt.f32 %v663_v55  ;;  %vm672_vm10 = vmor %vm670_vm9, %vm671_vm8  ;;  %vm680_vm12 = vweird.f32 %v663_v55 }
 0x21a   : > { %v666_v57 = vmul.f32 %v991_v54, %v665_v56 }
 0x21c   : > { %v667_v58 = vmul.f32 0.5, %v666_v57 }
 0x21e   : > { %v668_v59 = vsub.f32 1.5, %v667_v58 }
 0x21f   : > { %v993_v60 = vpop.eup %992 }
 0x220   : > { %v675_v61 = vmul.f32 %v993_v60, %v663_v55  ;;  %v669_v63 = vmul.f32 %v991_v54, %v668_v59  ;;  %vm681_vm11 = vweird.f32 %v993_v60 }
 0x221   : > { %vm682_vm13 = vmor %vm680_vm12, %vm681_vm11 }
 0x222   : > { %v676_v0 = vmul.f32 %v993_v60, %v675_v61  ;;  %v673_v1 = vsel %vm672_vm10, %v991_v54, %v669_v63 }
 0x223   : > { %v684_v2 = vmul.f32 %v673_v1, %v660_v62 }
 0x224   : > { %v677_v3 = vmul.f32 0.5, %v676_v0  ;;  %v705_v12 = vpop.permute.xlu1 %704 }
 0x225   : > { %688 = vperm.xlu2 %985, %v684_v2  }
 0x226   : > { %v678_v4 = vsub.f32 1.5, %v677_v3 }
 0x228   : > { %v679_v6 = vmul.f32 %v993_v60, %v678_v4 }
 0x22a   : > { %v683_v7 = vsel %vm682_vm13, %v993_v60, %v679_v6 }
 0x22b   : > { %v685_v9 = vmul.f32 %v683_v7, %v661_v5 }
 0x22d   : > { %693 = vperm.xlu0 %986, %v685_v9   ;;  %709 = vperm.xlu2 %985, %v701_v8  }
 0x27f   : > { %v689_v11 = vpop.permute.xlu2 %688 }
 0x280   : > { %v696_v13 = vmul.f32 %v689_v11, %v1168_v35  ;;  %v697_v14 = vmul.f32 %v689_v11, %v1170_v36 }
 0x282   : > { %v712_v17 = vadd.f32 %v705_v12, %v696_v13  ;;  %v713_v18 = vadd.f32 %v705_v12, %v697_v14 }
 0x284   : > { %v728_v19 = vadd.f32 %v724_v15, %v712_v17  ;;  %v729_v20 = vadd.f32 %v725_v16, %v713_v18 }
 0x286   : > { %v732_v21 = vmul.f32 0.5, %v728_v19  ;;  %v733_v22 = vmul.f32 0.5, %v729_v20 }
 0x287   : > { %v710_v32 = vpop.permute.xlu2 %709 }
 0x288   : > { %v736_v23 = vmax.f32 %v732_v21, 0.0  ;;  %v737_v24 = vmax.f32 %v733_v22, 0.0 }
 0x28a   : > { %v740_v25 = vpack.c.bf16 %v737_v24, %v736_v23 }
 0x28c   : > { %742 = vst [vmem:[%s343_s9] sm:$0xff] %v740_v25 }
 0x29f   : > { %v694_v27 = vpop.permute.xlu0 %693 }
 0x2a0   : > { %v698_v30 = vmul.f32 %v694_v27, %v1176_v42  ;;  %v699_v31 = vmul.f32 %v694_v27, %v1178_v43 }
 0x2a2   : > { %v714_v33 = vadd.f32 %v710_v32, %v698_v30  ;;  %v715_v34 = vadd.f32 %v710_v32, %v699_v31 }
 0x2a4   : > { %v730_v35 = vadd.f32 %v726_v28, %v714_v33  ;;  %v731_v36 = vadd.f32 %v727_v29, %v715_v34 }
 0x2a6   : > { %v734_v37 = vmul.f32 0.5, %v730_v35  ;;  %v735_v38 = vmul.f32 0.5, %v731_v36 }
 0x2a8   : > { %v738_v39 = vmax.f32 %v734_v37, 0.0  ;;  %v739_v40 = vmax.f32 %v735_v38, 0.0 }
 0x2aa   : > { %v741_v41 = vpack.c.bf16 %v739_v40, %v738_v39 }
 0x2ac   : > { %743 = vst [vmem:[%s343_s9 + $0x8] sm:$0xff] %v741_v41 }
 0x2ad PF: > { %s16_s21 = sadd.s32 1, %s1000_s21  }
 0x2ae   : > { %p13_p4 = scmp.ge.s32.totalorder %s16_s21, 4  }
 0x2b0   :  { %15 = sbr.rel (!%p13_p4) target bundleno = 1 (0x1), region = 87 }

// kernel: _lambda_.14
= control target key start
LH: loop header
LB: loop body
LE: loop exit
PB: predicated region body
PF: predicated region fallthrough
CT: control target
= control target key end

     0   :  { %s1280_s13 = smov 0   ;;  %s1415_s0 = inlined_call_operand.vmem [shape: bf16[16,256], index: 0, kind: input, shape index: {}]   ;;  %s1416_s1 = inlined_call_operand.vmem [shape: bf16[16,256], index: 1, kind: input, shape index: {}]   ;;  %s1417_s2 = inlined_call_operand.vmem [shape: f32[32,16], index: 2, kind: input, shape index: {}]   ;;  %s1418_s3 = inlined_call_operand.vmem [shape: f32[32,16], index: 3, kind: input, shape index: {}]   ;;  %s1419_s4 = inlined_call_operand.vmem [shape: f32[32,16], index: 4, kind: input, shape index: {}]   ;;  %s1420_s5 = inlined_call_operand.vmem [shape: f32[32,16], index: 5, kind: input, shape index: {}]   ;;  %s1421_s6 = inlined_call_operand.vmem [shape: f32[32,1], index: 6, kind: input, shape index: {}, may-alias: {6,8}]   ;;  %s1422_s7 = inlined_call_operand.vmem [shape: f32[32,1], index: 7, kind: input, shape index: {}, may-alias: {7,9}]   ;;  %s1423_s8 = inlined_call_operand.vmem [shape: f32[32,1], index: 8, kind: input, shape index: {}, may-alias: {6,8}]   ;;  %s1424_s9 = inlined_call_operand.vmem [shape: f32[32,1], index: 9, kind: input, shape index: {}, may-alias: {7,9}]   ;;  %s1425_s10 = inlined_call_operand.vmem [shape: bf16[32,256], index: 10, kind: output, shape index: {}]  }
   0x1 LB: > { %s1127_s14 = sadd.s32 4294967295, %s1220_s13   ;;  %p1131_p0 = scmp.ge.s32.totalorder %s1220_s13, 1  ;;  %s1220_s13 = sphi %s1280_s13, %s20_s13  }
   0x2   : > { %p390_p1 = scmp.lt.s32.totalorder %s1220_s13, 3 }
   0x4   : > { %p391_p2 = pnand %p1131_p0, %p390_p1 }
   0x5   : > { %s1222_s19 = smov (!%p391_p2), 1   ;;  %s1132_s20 = sshll.u32 (!%p391_p2), %s1127_s14, 1 }
   0x6   : > { %394 = sbr.rel (%p391_p2) target bundleno = 691 (0x2b3), region = 60  ;;  %p465_p3 = scmp.lt.s32.totalorder (!%p391_p2), %s1132_s20, 3 }
   0xb   : > { %v526_v0 = vld [vmem:[%s1416_s1 + $0x8] sm:$0xff]  ;;  %v525_v3 = vld [vmem:[%s1416_s1] sm:$0xff]  ;;  %s1427_s20 = smov (!%p465_p3, %s1132_s20), 3  ;;  %vm585_vm0 = vcmask 130048   ;;  %v531_v16 = vlaneseq }
   0xc   : > { %v529_v1 = vunpack.c.l.bf16 %v526_v0  ;;  %v530_v2 = vunpack.c.h.bf16 %v526_v0  ;;  %v527_v5 = vunpack.c.l.bf16 %v525_v3  ;;  %v528_v6 = vunpack.c.h.bf16 %v525_v3  ;;  %s1294_s21 = sshll.u32 %s1427_s20, 3  ;;  %v520_v8 = vld [vmem:[%s1415_s0 + $0x8] sm:$0xff]  ;;  %v519_v11 = vld [vmem:[%s1415_s0] sm:$0xff] }
   0xd   : > { %v523_v9 = vunpack.c.l.bf16 %v520_v8  ;;  %v524_v10 = vunpack.c.h.bf16 %v520_v8  ;;  %s474_s28 = scalar_lea.vmem %s1418_s3, %s1294_s21  ;;  %v521_v12 = vunpack.c.l.bf16 %v519_v11  ;;  %v522_v13 = vunpack.c.h.bf16 %v519_v11  ;;  %s480_s11 = scalar_lea.vmem %s1419_s4, %s1294_s21 }
   0xe   : > { %v1191_v4 = vpack.i.bf16 %v530_v2, %v529_v1  ;;  %v1196_v7 = vpack.i.bf16 %v528_v6, %v527_v5  ;;  %v583_v14 = vld [vmem:[%s474_s28] sm:$0xff]  ;;  %v584_v15 = vld [vmem:[%s474_s28 + $0x8] sm:$0xff]  ;;  %v532_v18 = vand.u32 127, %v531_v16  ;;  %s468_s15 = scalar_lea.vmem %s1417_s2, %s1294_s21  ;;  %s486_s18 = scalar_lea.vmem %s1420_s5, %s1294_s21  ;;  %v1223_v0 = vmov 256.0  }
   0xf   : > { %606 = vmatpush.msra.mxu0 %v523_v9  ;;  %629 = vmatpush.msra.mxu1 %v524_v10  ;;  %v690_v17 = vld [vmem:[%s480_s11] sm:$0xff]  ;;  %v691_v20 = vld [vmem:[%s480_s11 + $0x8] sm:$0xff]  ;;  %1204 = vrcp.f32 %v1223_v0  ;;  %s1376_s22 = scalar_lea.vmem %s1422_s7, %s1294_s21  ;;  %s1384_s25 = scalar_lea.vmem %s1424_s9, %s1294_s21 }
  0x10   : > { %1192 = vrot.lane.b32.xlu0 %v1191_v4, %s1222_s19  ;;  %v533_v19 = vadd.s32 128, %v532_v18  ;;  %vm568_vm1 = vcmp.lt.s32.totalorder %v532_v18, 1  ;;  %vm1178_vm2 = vcmp.ne.s32.totalorder %v532_v18, 0  ;;  %v581_v30 = vld [vmem:[%s468_s15] sm:$0xff]  ;;  %v582_v33 = vld [vmem:[%s468_s15 + $0x8] sm:$0xff]  ;;  %s492_s28 = scalar_lea.vmem %s1421_s6, %s1294_s21  ;;  %s504_s11 = scalar_lea.vmem %s1423_s8, %s1294_s21 }
  0x11   : > { %607 = vmatpush.msra.mxu0 %v521_v12  ;;  %630 = vmatpush.msra.mxu1 %v522_v13  ;;  %v748_v34 = vld [vmem:[%s486_s18] sm:$0xff]  ;;  %v749_v35 = vld [vmem:[%s486_s18 + $0x8] sm:$0xff]  ;;  %s517_s15 = scalar_lea.vmem %s1425_s10, %s1294_s21 }
  0x12   : > { %1151 = vmatmul.msk.f32.vlgmr.msra.gmra.mxu0 %vm585_vm0, %v583_v14  ;;  %1153 = vmatmul.msk.f32.vlgmr.msra.gmra.mxu1 %vm585_vm0, %v583_v14  ;;  %v545_v21 = vand.u32 127, %v533_v19 }
  0x13   : > { %712 = vmatpush.msrb.mxu0 %v529_v1  ;;  %735 = vmatpush.msrb.mxu1 %v530_v2 }
  0x14   : > { %vm1179_vm3 = vcmp.ne.s32.totalorder %v545_v21, 0 }
  0x15   : > { %713 = vmatpush.msrb.mxu0 %v527_v5  ;;  %736 = vmatpush.msrb.mxu1 %v528_v6  ;;  %v1205_v1 = vpop.eup %1204 }
  0x16   : > { %v809_v2 = vmul.f32 256.0, %v1205_v1  ;;  %vm813_vm4 = vweird.f32 %v1205_v1 }
  0x18   : > { %1197 = vrot.lane.b32.xlu0 %v1196_v7, %s1222_s19  ;;  %v810_v3 = vsub.f32 1.0, %v809_v2 }
  0x1a   : > { %1152 = vmatmul.msk.f32.gmra.mxu0 %vm585_vm0, %v584_v15  ;;  %1154 = vmatmul.msk.f32.gmra.mxu1 %vm585_vm0, %v584_v15  ;;  %v811_v4 = vmul.f32 %v1205_v1, %v810_v3 }
  0x1c   : > { %v812_v5 = vadd.f32 %v1205_v1, %v811_v4  ;;  %v858_v4 = vld [vmem:[%s492_s28 + $0x8] sm:$0xff] }
  0x1e   : > { %v1334_v6 = vsel %vm813_vm4, %v1205_v1, %v812_v5 }
  0x22   : > { %1167 = vmatmul.msk.f32.vlgmr.msrb.gmra.mxu0 %vm585_vm0, %v690_v17  ;;  %1169 = vmatmul.msk.f32.vlgmr.msrb.gmra.mxu1 %vm585_vm0, %v690_v17 }
  0x2a   : > { %1168 = vmatmul.msk.f32.gmra.mxu0 %vm585_vm0, %v691_v20  ;;  %1170 = vmatmul.msk.f32.gmra.mxu1 %vm585_vm0, %v691_v20 }
  0x82   : > { %v1193_v22 = vpop.permute.xlu0 %1192 }
  0x83   : > { %v1195_v23 = vunpack.i.h.bf16 %v1193_v22  ;;  %v1194_v24 = vunpack.i.l.bf16 %v1193_v22 }
  0x85   : > { %v572_v25 = vsel %vm568_vm1, %v1195_v23, %v1194_v24  ;;  %v570_v26 = vsel %vm568_vm1, %v1194_v24, %v1195_v23 }
  0x86   : > { %1156 = vmatpush.msk.msra.mxu2 %vm1178_vm2, %v572_v25  ;;  %1162 = vmatpush.msk.msra.mxu3 %vm1179_vm3, %v570_v26 }
  0x8a   : > { %v1198_v27 = vpop.permute.xlu0 %1197 }
  0x8b   : > { %v1200_v28 = vunpack.i.h.bf16 %v1198_v27  ;;  %v1199_v29 = vunpack.i.l.bf16 %v1198_v27 }
  0x8d   : > { %v571_v31 = vsel %vm568_vm1, %v1200_v28, %v1199_v29  ;;  %v569_v32 = vsel %vm568_vm1, %v1199_v29, %v1200_v28 }
  0x8e   : > { %1158 = vmatpush.msk.msra.mxu2 %vm1178_vm2, %v571_v31  ;;  %1164 = vmatpush.msk.msra.mxu3 %vm1179_vm3, %v569_v32 }
  0x8f   : > { %1159 = vmatmul.msk.f32.vlgmr.msra.gmra.mxu2 %vm585_vm0, %v581_v30  ;;  %1165 = vmatmul.msk.f32.vlgmr.msra.gmra.mxu3 %vm585_vm0, %v581_v30  ;;  %v609_v36 = vpop.f32.mrf.mxu0  ;;  %v632_v37 = vpop.f32.mrf.mxu1 }
  0x90   : > { %770 = vmatpush.msrb.mxu2 %v523_v9  ;;  %793 = vmatpush.msrb.mxu3 %v524_v10 }
  0x92   : > { %771 = vmatpush.msrb.mxu2 %v521_v12  ;;  %794 = vmatpush.msrb.mxu3 %v522_v13 }
  0x97   : > { %1160 = vmatmul.msk.f32.gmra.mxu2 %vm585_vm0, %v582_v33  ;;  %1166 = vmatmul.msk.f32.gmra.mxu3 %vm585_vm0, %v582_v33  ;;  %v612_v38 = vpop.f32.mrf.mxu0  ;;  %v635_v39 = vpop.f32.mrf.mxu1 }
  0x9f   : > { %1171 = vmatmul.msk.f32.vlgmr.msrb.gmra.mxu2 %vm585_vm0, %v748_v34  ;;  %1173 = vmatmul.msk.f32.vlgmr.msrb.gmra.mxu3 %vm585_vm0, %v748_v34  ;;  %v715_v40 = vpop.f32.mrf.mxu0  ;;  %v738_v41 = vpop.f32.mrf.mxu1 }
  0xa7   : > { %1172 = vmatmul.msk.f32.gmra.mxu2 %vm585_vm0, %v749_v35  ;;  %1174 = vmatmul.msk.f32.gmra.mxu3 %vm585_vm0, %v749_v35  ;;  %v718_v49 = vpop.f32.mrf.mxu0  ;;  %v741_v50 = vpop.f32.mrf.mxu1  ;;  %v1224_v35 = vmov 0  }
  0xa8   : > { %1201 = vset.pattern.permute.xlu1 %v1224_v35  ;;  %1202 = vset.pattern.permute.xlu2 %v1224_v35 }
  0xa9   : > { %1203 = vset.pattern.permute.xlu0 %v1224_v35 }
 0x112   : > { %v661_v42 = vpop.f32.mrf.mxu2  ;;  %v684_v43 = vpop.f32.mrf.mxu3 }
 0x113   : > { %v662_v44 = vadd.f32 %v661_v42, %v609_v36  ;;  %v685_v45 = vadd.f32 %v684_v43, %v632_v37  ;;  %v897_v36 = vld [vmem:[%s1376_s22] sm:$0xff] }
 0x115   : > { %v744_v46 = vadd.f32 %v715_v40, %v662_v44  ;;  %v745_v47 = vadd.f32 %v738_v41, %v685_v45  ;;  %v953_v40 = vld [vmem:[%s1384_s25] sm:$0xff] }
 0x117   : > { %v802_v48 = vadd.f32 %v745_v47, %v744_v46 }
 0x119   : > { %803 = vadd.xlane.f32.xlu1 %v802_v48 }
 0x11a   : > { %v664_v51 = vpop.f32.mrf.mxu2  ;;  %v687_v52 = vpop.f32.mrf.mxu3 }
 0x11b   : > { %v665_v53 = vadd.f32 %v664_v51, %v612_v38  ;;  %v688_v54 = vadd.f32 %v687_v52, %v635_v39 }
 0x11d   : > { %v746_v55 = vadd.f32 %v718_v49, %v665_v53  ;;  %v747_v56 = vadd.f32 %v741_v50, %v688_v54 }
 0x11f   : > { %v805_v57 = vadd.f32 %v747_v56, %v746_v55 }
 0x121   : > { %806 = vadd.xlane.f32.xlu2 %v805_v57 }
 0x122   : > { %v773_v58 = vpop.f32.mrf.mxu2  ;;  %v796_v59 = vpop.f32.mrf.mxu3 }
 0x123   : > { %v833_v60 = vadd.f32 %v796_v59, %v773_v58 }
 0x125   : > { %834 = vadd.xlane.f32.xlu1 %v833_v60 }
 0x12a   : > { %v776_v61 = vpop.f32.mrf.mxu2  ;;  %v799_v62 = vpop.f32.mrf.mxu3 }
 0x12b   : > { %v836_v63 = vadd.f32 %v799_v62, %v776_v61 }
 0x12d   : > { %837 = vadd.xlane.f32.xlu2 %v836_v63 }
 0x18c   : > { %v804_v7 = vpop.xlane.xlu1 %803 }
 0x18d   : > { %v815_v8 = vmul.f32 %v1334_v6, %v804_v7 }
 0x18f   : > { %v1337_v9 = vsub.f32 %v744_v46, %v815_v8  ;;  %v1339_v10 = vsub.f32 %v745_v47, %v815_v8 }
 0x191   : > { %v821_v11 = vmul.f32 %v1337_v9, %v1337_v9  ;;  %v822_v12 = vmul.f32 %v1339_v10, %v1339_v10 }
 0x193   : > { %v825_v13 = vadd.f32 %v822_v12, %v821_v11 }
 0x194   : > { %v807_v14 = vpop.xlane.xlu2 %806 }
 0x195   : > { %v816_v15 = vmul.f32 %v1334_v6, %v807_v14  ;;  %826 = vadd.xlane.f32.xlu0 %v825_v13  ;;  %v913_v13 = vld [vmem:[%s504_s11] sm:$0xff] }
 0x197   : > { %v1346_v16 = vsub.f32 %v746_v55, %v816_v15  ;;  %v1348_v17 = vsub.f32 %v747_v56, %v816_v15  ;;  %v857_v55 = vld [vmem:[%s492_s28] sm:$0xff] }
 0x198   : > { %v835_v18 = vpop.xlane.xlu1 %834 }
 0x199   : > { %v839_v19 = vmul.f32 %v835_v18, %v1334_v6  ;;  %v823_v20 = vmul.f32 %v1346_v16, %v1346_v16  ;;  %v824_v21 = vmul.f32 %v1348_v17, %v1348_v17 }
 0x19b   : > { %v1355_v22 = vsub.f32 %v773_v58, %v839_v19  ;;  %v1357_v23 = vsub.f32 %v796_v59, %v839_v19  ;;  %v828_v24 = vadd.f32 %v824_v21, %v823_v20 }
 0x19d   : > { %829 = vadd.xlane.f32.xlu2 %v828_v24  ;;  %v845_v25 = vmul.f32 %v1355_v22, %v1355_v22  ;;  %v846_v26 = vmul.f32 %v1357_v23, %v1357_v23  ;;  %v914_v24 = vld [vmem:[%s504_s11 + $0x8] sm:$0xff] }
 0x19f   : > { %v849_v27 = vadd.f32 %v846_v26, %v845_v25  ;;  %v954_v26 = vld [vmem:[%s1384_s25 + $0x8] sm:$0xff] }
 0x1a0   : > { %v838_v28 = vpop.xlane.xlu2 %837 }
 0x1a1   : > { %v840_v29 = vmul.f32 %v838_v28, %v1334_v6  ;;  %850 = vadd.xlane.f32.xlu1 %v849_v27 }
 0x1a3   : > { %v1364_v30 = vsub.f32 %v776_v61, %v840_v29  ;;  %v1366_v31 = vsub.f32 %v799_v62, %v840_v29  ;;  %v898_v29 = vld [vmem:[%s1376_s22 + $0x8] sm:$0xff] }
 0x1a5   : > { %v847_v32 = vmul.f32 %v1364_v30, %v1364_v30  ;;  %v848_v33 = vmul.f32 %v1366_v31, %v1366_v31 }
 0x1a7   : > { %v852_v34 = vadd.f32 %v848_v33, %v847_v32 }
 0x1a9   : > { %853 = vadd.xlane.f32.xlu1 %v852_v34  ;;  %957 = vperm.xlu0 %1203, %v953_v40  }
 0x1c2   : > { %901 = vperm.xlu1 %1201, %v897_v36  }
 0x208   : > { %v827_v37 = vpop.xlane.xlu0 %826 }
 0x209   : > { %v831_v38 = vmul.f32 %v827_v37, %v1334_v6 }
 0x20b   : > { %v859_v39 = vadd.f32 0.0001, %v831_v38 }
 0x20d   : > { %1206 = vrsqrt.f32 %v859_v39  ;;  %vm867_vm6 = vweird.f32 %v859_v39 }
 0x210   : > { %v830_v41 = vpop.xlane.xlu2 %829 }
 0x211   : > { %v832_v42 = vmul.f32 %v830_v41, %v1334_v6 }
 0x213   : > { %v1207_v43 = vpop.eup %1206  ;;  %v860_v44 = vadd.f32 0.0001, %v832_v42 }
 0x214   : > { %v862_v45 = vmul.f32 %v1207_v43, %v859_v39  ;;  %v851_v46 = vpop.xlane.xlu1 %850  ;;  %vm868_vm5 = vweird.f32 %v1207_v43 }
 0x215   : > { %1208 = vrsqrt.f32 %v860_v44  ;;  %v855_v47 = vmul.f32 %v851_v46, %v1334_v6  ;;  %vm869_vm7 = vmor %vm867_vm6, %vm868_vm5  ;;  %vm877_vm9 = vweird.f32 %v860_v44 }
 0x216   : > { %v863_v48 = vmul.f32 %v1207_v43, %v862_v45 }
 0x217   : > { %v915_v49 = vadd.f32 0.0001, %v855_v47 }
 0x218   : > { %v864_v50 = vmul.f32 0.5, %v863_v48 }
 0x219   : > { %1210 = vrsqrt.f32 %v915_v49  ;;  %vm923_vm12 = vweird.f32 %v915_v49 }
 0x21a   : > { %v865_v51 = vsub.f32 1.5, %v864_v50 }
 0x21b   : > { %v1209_v52 = vpop.eup %1208  ;;  %v958_v39 = vpop.permute.xlu0 %957 }
 0x21c   : > { %v872_v53 = vmul.f32 %v1209_v52, %v860_v44  ;;  %v854_v54 = vpop.xlane.xlu1 %853  ;;  %v866_v56 = vmul.f32 %v1207_v43, %v865_v51  ;;  %vm878_vm8 = vweird.f32 %v1209_v52 }
 0x21d   : > { %v856_v57 = vmul.f32 %v854_v54, %v1334_v6  ;;  %vm879_vm10 = vmor %vm877_vm9, %vm878_vm8 }
 0x21e   : > { %v873_v58 = vmul.f32 %v1209_v52, %v872_v53  ;;  %v870_v59 = vsel %vm869_vm7, %v1207_v43, %v866_v56 }
 0x21f   : > { %v1211_v60 = vpop.eup %1210  ;;  %v916_v61 = vadd.f32 0.0001, %v856_v57  ;;  %v881_v62 = vmul.f32 %v870_v59, %v857_v55 }
 0x220   : > { %v874_v63 = vmul.f32 0.5, %v873_v58  ;;  %v918_v0 = vmul.f32 %v1211_v60, %v915_v49  ;;  %vm924_vm11 = vweird.f32 %v1211_v60 }
 0x221   : > { %1212 = vrsqrt.f32 %v916_v61  ;;  %885 = vperm.xlu2 %1202, %v881_v62   ;;  %vm925_vm13 = vmor %vm923_vm12, %vm924_vm11  ;;  %vm933_vm15 = vweird.f32 %v916_v61 }
 0x222   : > { %v875_v1 = vsub.f32 1.5, %v874_v63  ;;  %v919_v2 = vmul.f32 %v1211_v60, %v918_v0 }
 0x224   : > { %v920_v3 = vmul.f32 0.5, %v919_v2  ;;  %v876_v5 = vmul.f32 %v1209_v52, %v875_v1 }
 0x226   : > { %v921_v6 = vsub.f32 1.5, %v920_v3  ;;  %v880_v7 = vsel %vm879_vm10, %v1209_v52, %v876_v5 }
 0x227   : > { %v1213_v8 = vpop.eup %1212  ;;  %v882_v11 = vmul.f32 %v880_v7, %v858_v4 }
 0x228   : > { %v928_v12 = vmul.f32 %v1213_v8, %v916_v61  ;;  %v922_v14 = vmul.f32 %v1211_v60, %v921_v6  ;;  %vm934_vm14 = vweird.f32 %v1213_v8 }
 0x229   : > { %890 = vperm.xlu2 %1202, %v882_v11   ;;  %vm935_vm0 = vmor %vm933_vm15, %vm934_vm14 }
 0x22a   : > { %v929_v15 = vmul.f32 %v1213_v8, %v928_v12  ;;  %v926_v18 = vsel %vm925_vm13, %v1211_v60, %v922_v14 }
 0x22b   : > { %v937_v19 = vmul.f32 %v926_v18, %v913_v13 }
 0x22c   : > { %v930_v20 = vmul.f32 0.5, %v929_v15 }
 0x22d   : > { %941 = vperm.xlu1 %1201, %v937_v19  }
 0x22e   : > { %v931_v21 = vsub.f32 1.5, %v930_v20 }
 0x230   : > { %v932_v25 = vmul.f32 %v1213_v8, %v931_v21 }
 0x232   : > { %v936_v27 = vsel %vm935_vm0, %v1213_v8, %v932_v25 }
 0x233   : > { %v938_v28 = vmul.f32 %v936_v27, %v914_v24 }
 0x234   : > { %v902_v34 = vpop.permute.xlu1 %901 }
 0x235   : > { %962 = vperm.xlu1 %1201, %v954_v26   ;;  %946 = vperm.xlu2 %1202, %v938_v28  }
 0x23d   : > { %906 = vperm.xlu2 %1202, %v898_v29  }
 0x27b   : > { %v886_v32 = vpop.permute.xlu2 %885 }
 0x27c   : > { %v893_v36 = vmul.f32 %v886_v32, %v1337_v9  ;;  %v894_v37 = vmul.f32 %v886_v32, %v1339_v10 }
 0x27e   : > { %v909_v42 = vadd.f32 %v902_v34, %v893_v36  ;;  %v910_v43 = vadd.f32 %v902_v34, %v894_v37 }
 0x283   : > { %v891_v33 = vpop.permute.xlu2 %890 }
 0x284   : > { %v895_v49 = vmul.f32 %v891_v33, %v1346_v16  ;;  %v896_v9 = vmul.f32 %v891_v33, %v1348_v17 }
 0x28f   : > { %v947_v35 = vpop.permute.xlu2 %946 }
 0x290   : > { %v951_v10 = vmul.f32 %v947_v35, %v1364_v30  ;;  %v952_v50 = vmul.f32 %v947_v35, %v1366_v31 }
 0x297   : > { %v907_v46 = vpop.permute.xlu2 %906 }
 0x298   : > { %v911_v52 = vadd.f32 %v907_v46, %v895_v49 }
 0x29f   : > { %v942_v38 = vpop.permute.xlu1 %941 }
 0x2a0   : > { %v949_v40 = vmul.f32 %v942_v38, %v1355_v22  ;;  %v950_v41 = vmul.f32 %v942_v38, %v1357_v23  ;;  %v912_v23 = vadd.f32 %v907_v46, %v896_v9 }
 0x2a2   : > { %v965_v44 = vadd.f32 %v958_v39, %v949_v40  ;;  %v966_v45 = vadd.f32 %v958_v39, %v950_v41 }
 0x2a4   : > { %v969_v47 = vadd.f32 %v965_v44, %v909_v42  ;;  %v970_v48 = vadd.f32 %v966_v45, %v910_v43 }
 0x2a6   : > { %v973_v51 = vmul.f32 0.5, %v969_v47  ;;  %v974_v22 = vmul.f32 0.5, %v970_v48 }
 0x2a7   : > { %v963_v53 = vpop.permute.xlu1 %962 }
 0x2a8   : > { %v977_v54 = vmax.f32 %v973_v51, 0.0  ;;  %v978_v55 = vmax.f32 %v974_v22, 0.0  ;;  %v967_v56 = vadd.f32 %v963_v53, %v951_v10  ;;  %v968_v57 = vadd.f32 %v963_v53, %v952_v50 }
 0x2aa   : > { %v981_v16 = vpack.c.bf16 %v978_v55, %v977_v54  ;;  %v971_v58 = vadd.f32 %v967_v56, %v911_v52  ;;  %v972_v17 = vadd.f32 %v968_v57, %v912_v23 }
 0x2ac   : > { %983 = vst [vmem:[%s517_s15] sm:$0xff] %v981_v16  ;;  %v975_v30 = vmul.f32 0.5, %v971_v58  ;;  %v976_v59 = vmul.f32 0.5, %v972_v17 }
 0x2ae   : > { %v979_v31 = vmax.f32 %v975_v30, 0.0  ;;  %v980_v60 = vmax.f32 %v976_v59, 0.0 }
 0x2b0   : > { %v982_v61 = vpack.c.bf16 %v980_v60, %v979_v31 }
 0x2b2   : > { %984 = vst [vmem:[%s517_s15 + $0x8] sm:$0xff] %v982_v61 }
 0x2b3 PF: > { %s20_s13 = sadd.s32 1, %s1220_s13  }
 0x2b4   : > { %p17_p4 = scmp.ge.s32.totalorder %s20_s13, 4  }
 0x2b6   :  { %19 = sbr.rel (!%p17_p4) target bundleno = 1 (0x1), region = 111 }

// kernel: _lambda_.16
= control target key start
LH: loop header
LB: loop body
LE: loop exit
PB: predicated region body
PF: predicated region fallthrough
CT: control target
= control target key end

     0   :  { %s1094_s27 = smov 0   ;;  %s1252_s0 = inlined_call_operand.vmem [shape: bf16[32,256], index: 0, kind: input, shape index: {}]   ;;  %s1253_s1 = inlined_call_operand.vmem [shape: f32[16,32], index: 1, kind: input, shape index: {}]   ;;  %s1254_s2 = inlined_call_operand.vmem [shape: f32[16,32], index: 2, kind: input, shape index: {}]   ;;  %s1255_s3 = inlined_call_operand.vmem [shape: f32[16,32], index: 3, kind: input, shape index: {}]   ;;  %s1256_s4 = inlined_call_operand.vmem [shape: f32[16,32], index: 4, kind: input, shape index: {}]   ;;  %s1257_s5 = inlined_call_operand.vmem [shape: f32[16,1], index: 5, kind: input, shape index: {}]   ;;  %s1258_s6 = inlined_call_operand.vmem [shape: f32[16,1], index: 6, kind: input, shape index: {}]   ;;  %s1259_s7 = inlined_call_operand.vmem [shape: bf16[16,256], index: 7, kind: output, shape index: {0}]   ;;  %s1260_s8 = inlined_call_operand.vmem [shape: bf16[16,256], index: 8, kind: output, shape index: {1}]  }
   0x1 LB: > { %s916_s28 = sadd.s32 4294967295, %s1043_s27   ;;  %p920_p0 = scmp.ge.s32.totalorder %s1043_s27, 1  ;;  %s1043_s27 = sphi %s1094_s27, %s19_s27  }
   0x2   : > { %p309_p1 = scmp.lt.s32.totalorder %s1043_s27, 3 }
   0x4   : > { %p310_p2 = pnand %p920_p0, %p309_p1 }
   0x5   : > { %s1045_s15 = smov (!%p310_p2), 1   ;;  %s1046_s16 = smov (!%p310_p2), 127  }
   0x6   : > { %313 = sbr.rel (%p310_p2) target bundleno = 680 (0x2a8), region = 48  ;;  %p367_p3 = scmp.lt.s32.totalorder (!%p310_p2), %s916_s28, 1 }
   0xb   : > { %v404_v0 = vld [vmem:[%s1252_s0 + $0x18] sm:$0xff]  ;;  %v402_v1 = vld [vmem:[%s1252_s0 + $0x8] sm:$0xff]  ;;  %v403_v6 = vld [vmem:[%s1252_s0 + $0x10] sm:$0xff]  ;;  %s1266_s28 = smov (!%p367_p3, %s916_s28), 1  ;;  %vm520_vm0 = vcmask 261120   ;;  %v413_v17 = vlaneseq }
   0xc   : > { %v411_v2 = vunpack.c.l.bf16 %v404_v0  ;;  %v412_v3 = vunpack.c.h.bf16 %v404_v0  ;;  %v407_v4 = vunpack.c.l.bf16 %v402_v1  ;;  %v408_v5 = vunpack.c.h.bf16 %v402_v1  ;;  %v401_v7 = vld [vmem:[%s1252_s0] sm:$0xff]  ;;  %s1118_s17 = sshll.u32 %s1266_s28, 3 }
   0xd   : > { %v409_v10 = vunpack.c.l.bf16 %v403_v6  ;;  %v410_v11 = vunpack.c.h.bf16 %v403_v6  ;;  %v405_v12 = vunpack.c.l.bf16 %v401_v7  ;;  %v406_v13 = vunpack.c.h.bf16 %v401_v7  ;;  %s370_s20 = scalar_lea.vmem %s1253_s1, %s1118_s17  ;;  %s378_s23 = scalar_lea.vmem %s1255_s3, %s1118_s17 }
   0xe   : > { %v991_v8 = vpack.i.bf16 %v412_v3, %v411_v2  ;;  %v1001_v9 = vpack.i.bf16 %v408_v5, %v407_v4  ;;  %579 = vmatpush.msra.mxu2 %v411_v2  ;;  %599 = vmatpush.msra.mxu3 %v412_v3  ;;  %v518_v16 = vld [vmem:[%s370_s20] sm:$0xff]  ;;  %v1132_v19 = vand.u32 127, %v413_v17  ;;  %s374_s26 = scalar_lea.vmem %s1254_s2, %s1118_s17  ;;  %s382_s30 = scalar_lea.vmem %s1256_s4, %s1118_s17 }
   0xf   : > { %v996_v14 = vpack.i.bf16 %v410_v11, %v409_v10  ;;  %v1006_v15 = vpack.i.bf16 %v406_v13, %v405_v12  ;;  %v607_v18 = vld [vmem:[%s378_s23] sm:$0xff]  ;;  %s386_s11 = scalar_lea.vmem %s1257_s5, %s1118_s17  ;;  %s390_s14 = scalar_lea.vmem %s1258_s6, %s1118_s17 }
  0x10   : > { %992 = vrot.lane.b32.xlu0 %v991_v8, %s1045_s15  ;;  %1002 = vrot.lane.b32.xlu1 %v1001_v9, %s1045_s15  ;;  %v415_v20 = vadd.s32 128, %v1132_v19  ;;  %vm458_vm1 = vcmp.lt.s32.totalorder %v1132_v19, 1  ;;  %vm975_vm2 = vcmp.ne.s32.totalorder %v1132_v19, 0  ;;  %vm497_vm4 = vcmp.lt.s32.totalorder %v1132_v19, 127  ;;  %v519_v49 = vld [vmem:[%s374_s26] sm:$0xff]  ;;  %s395_s18 = scalar_lea.vmem %s1259_s7, %s1118_s17  ;;  %s400_s21 = scalar_lea.vmem %s1260_s8, %s1118_s17 }
  0x11   : > { %1012 = vrot.lane.b32.xlu2 %v991_v8, %s1046_s16  ;;  %580 = vmatpush.msra.mxu2 %v409_v10  ;;  %vm977_vm5 = vcmp.ne.s32.totalorder %v1132_v19, 127  ;;  %v608_v1 = vld [vmem:[%s382_s30] sm:$0xff] }
  0x12   : > { %600 = vmatpush.msra.mxu3 %v410_v11  ;;  %v427_v21 = vand.u32 127, %v415_v20 }
  0x13   : > { %581 = vmatpush.msra.mxu2 %v407_v4 }
  0x14   : > { %601 = vmatpush.msra.mxu3 %v408_v5  ;;  %vm1137_vm3 = vcmp.ne.s32.totalorder %v427_v21, 0  ;;  %vm1177_vm6 = vcmp.ne.s32.totalorder %v427_v21, 127 }
  0x15   : > { %582 = vmatpush.msra.mxu2 %v405_v12 }
  0x16   : > { %602 = vmatpush.msra.mxu3 %v406_v13  ;;  %949 = vmatmul.msk.f32.vlgmr.msra.gmra.mxu2 %vm520_vm0, %v518_v16 }
  0x17   : > { %667 = vmatpush.msrb.mxu2 %v411_v2  ;;  %950 = vmatmul.msk.f32.vlgmr.msra.gmra.mxu3 %vm520_vm0, %v518_v16  ;;  %v1047_v16 = vmov 512.0  }
  0x18   : > { %687 = vmatpush.msrb.mxu3 %v412_v3  ;;  %997 = vrot.lane.b32.xlu0 %v996_v14, %s1045_s15  ;;  %1033 = vrcp.f32 %v1047_v16 }
  0x19   : > { %1007 = vrot.lane.b32.xlu1 %v1006_v15, %s1045_s15  ;;  %1017 = vrot.lane.b32.xlu2 %v996_v14, %s1046_s16 }
  0x1a   : > { %668 = vmatpush.msrb.mxu2 %v409_v10  ;;  %688 = vmatpush.msrb.mxu3 %v410_v11 }
  0x1c   : > { %669 = vmatpush.msrb.mxu2 %v407_v4  ;;  %689 = vmatpush.msrb.mxu3 %v408_v5 }
  0x1e   : > { %670 = vmatpush.msrb.mxu2 %v405_v12  ;;  %690 = vmatpush.msrb.mxu3 %v406_v13  ;;  %v1034_v17 = vpop.eup %1033 }
  0x1f   : > { %969 = vmatmul.msk.f32.vlgmr.msrb.gmra.mxu2 %vm520_vm0, %v607_v18  ;;  %970 = vmatmul.msk.f32.vlgmr.msrb.gmra.mxu3 %vm520_vm0, %v607_v18  ;;  %v703_v18 = vmul.f32 512.0, %v1034_v17  ;;  %vm707_vm7 = vweird.f32 %v1034_v17 }
  0x20   : > { %1022 = vrot.lane.b32.xlu0 %v1001_v9, %s1046_s16 }
  0x21   : > { %1027 = vrot.lane.b32.xlu1 %v1006_v15, %s1046_s16  ;;  %v704_v19 = vsub.f32 1.0, %v703_v18 }
  0x23   : > { %v705_v20 = vmul.f32 %v1034_v17, %v704_v19 }
  0x25   : > { %v706_v21 = vadd.f32 %v1034_v17, %v705_v20 }
  0x6b   : > { %v1013_v22 = vpop.permute.xlu2 %1012 }
  0x6c   : > { %v1015_v39 = vunpack.i.h.bf16 %v1013_v22  ;;  %v1014_v40 = vunpack.i.l.bf16 %v1013_v22 }
  0x6e   : > { %v501_v50 = vsel %vm497_vm4, %v1014_v40, %v1015_v39  ;;  %v505_v53 = vsel %vm497_vm4, %v1015_v39, %v1014_v40 }
  0x73   : > { %v1018_v38 = vpop.permute.xlu2 %1017 }
  0x74   : > { %v1020_v43 = vunpack.i.h.bf16 %v1018_v38  ;;  %v1019_v44 = vunpack.i.l.bf16 %v1018_v38 }
  0x76   : > { %v500_v55 = vsel %vm497_vm4, %v1019_v44, %v1020_v43  ;;  %v504_v56 = vsel %vm497_vm4, %v1020_v43, %v1019_v44 }
  0x82   : > { %v993_v23 = vpop.permute.xlu0 %992  ;;  %v1003_v24 = vpop.permute.xlu1 %1002 }
  0x83   : > { %v995_v25 = vunpack.i.h.bf16 %v993_v23  ;;  %v994_v26 = vunpack.i.l.bf16 %v993_v23  ;;  %v1005_v30 = vunpack.i.h.bf16 %v1003_v24  ;;  %v1004_v31 = vunpack.i.l.bf16 %v1003_v24 }
  0x84   : > { %v708_v23 = vsel %vm707_vm7, %v1034_v17, %v706_v21 }
  0x85   : > { %v466_v28 = vsel %vm458_vm1, %v995_v25, %v994_v26  ;;  %v462_v29 = vsel %vm458_vm1, %v994_v26, %v995_v25  ;;  %v464_v45 = vsel %vm458_vm1, %v1005_v30, %v1004_v31  ;;  %v460_v46 = vsel %vm458_vm1, %v1004_v31, %v1005_v30 }
  0x86   : > { %932 = vmatpush.msk.msra.mxu0 %vm975_vm2, %v466_v28  ;;  %941 = vmatpush.msk.msra.mxu1 %vm1137_vm3, %v462_v29 }
  0x8a   : > { %v998_v32 = vpop.permute.xlu0 %997 }
  0x8b   : > { %v1008_v33 = vpop.permute.xlu1 %1007  ;;  %v1000_v34 = vunpack.i.h.bf16 %v998_v32  ;;  %v999_v35 = vunpack.i.l.bf16 %v998_v32 }
  0x8c   : > { %v1010_v36 = vunpack.i.h.bf16 %v1008_v33  ;;  %v1009_v37 = vunpack.i.l.bf16 %v1008_v33 }
  0x8d   : > { %v465_v41 = vsel %vm458_vm1, %v1000_v34, %v999_v35  ;;  %v461_v42 = vsel %vm458_vm1, %v999_v35, %v1000_v34 }
  0x8e   : > { %934 = vmatpush.msk.msra.mxu0 %vm975_vm2, %v465_v41  ;;  %943 = vmatpush.msk.msra.mxu1 %vm1137_vm3, %v461_v42  ;;  %v463_v47 = vsel %vm458_vm1, %v1010_v36, %v1009_v37  ;;  %v459_v48 = vsel %vm458_vm1, %v1009_v37, %v1010_v36  ;;  %v1048_v37 = vmov 0  }
  0x8f   : > { %1031 = vset.pattern.permute.xlu2 %v1048_v37  ;;  %1032 = vset.pattern.permute.xlu0 %v1048_v37 }
  0x90   : > { %936 = vmatpush.msk.msra.mxu0 %vm975_vm2, %v464_v45  ;;  %945 = vmatpush.msk.msra.mxu1 %vm1137_vm3, %v460_v46 }
  0x92   : > { %938 = vmatpush.msk.msra.mxu0 %vm975_vm2, %v463_v47  ;;  %947 = vmatpush.msk.msra.mxu1 %vm1137_vm3, %v459_v48  ;;  %v1023_v52 = vpop.permute.xlu0 %1022  ;;  %v726_v48 = vld [vmem:[%s386_s11] sm:$0xff] }
  0x93   : > { %v1028_v54 = vpop.permute.xlu1 %1027  ;;  %v1025_v57 = vunpack.i.h.bf16 %v1023_v52  ;;  %v1024_v58 = vunpack.i.l.bf16 %v1023_v52  ;;  %939 = vmatmul.msk.f32.vlgmr.msra.gmra.mxu0 %vm520_vm0, %v519_v49  ;;  %948 = vmatmul.msk.f32.vlgmr.msra.gmra.mxu1 %vm520_vm0, %v519_v49  ;;  %v739_v52 = vld [vmem:[%s390_s14] sm:$0xff] }
  0x94   : > { %v1030_v59 = vunpack.i.h.bf16 %v1028_v54  ;;  %v1029_v60 = vunpack.i.l.bf16 %v1028_v54  ;;  %952 = vmatpush.msk.msrb.mxu0 %vm977_vm5, %v501_v50  ;;  %961 = vmatpush.msk.msrb.mxu1 %vm1177_vm6, %v505_v53 }
  0x95   : > { %v499_v61 = vsel %vm497_vm4, %v1024_v58, %v1025_v57  ;;  %v503_v62 = vsel %vm497_vm4, %v1025_v57, %v1024_v58 }
  0x96   : > { %954 = vmatpush.msk.msrb.mxu0 %vm977_vm5, %v500_v55  ;;  %963 = vmatpush.msk.msrb.mxu1 %vm1177_vm6, %v504_v56  ;;  %v498_v63 = vsel %vm497_vm4, %v1029_v60, %v1030_v59  ;;  %v502_v0 = vsel %vm497_vm4, %v1030_v59, %v1029_v60 }
  0x98   : > { %956 = vmatpush.msk.msrb.mxu0 %vm977_vm5, %v499_v61  ;;  %965 = vmatpush.msk.msrb.mxu1 %vm1177_vm6, %v503_v62 }
  0x99   : > { %v584_v2 = vpop.f32.mrf.mxu2 }
  0x9a   : > { %958 = vmatpush.msk.msrb.mxu0 %vm977_vm5, %v498_v63  ;;  %967 = vmatpush.msk.msrb.mxu1 %vm1177_vm6, %v502_v0  ;;  %v604_v3 = vpop.f32.mrf.mxu3 }
  0x9b   : > { %959 = vmatmul.msk.f32.vlgmr.msrb.gmra.mxu0 %vm520_vm0, %v608_v1  ;;  %968 = vmatmul.msk.f32.vlgmr.msrb.gmra.mxu1 %vm520_vm0, %v608_v1 }
  0xa2   : > { %v672_v9 = vpop.f32.mrf.mxu2  ;;  %v692_v10 = vpop.f32.mrf.mxu3 }
 0x110   : > { %v541_v4 = vpop.f32.mrf.mxu0  ;;  %v561_v5 = vpop.f32.mrf.mxu1 }
 0x111   : > { %v1223_v6 = vadd.f32 %v584_v2, %v541_v4  ;;  %v1225_v7 = vadd.f32 %v604_v3, %v561_v5 }
 0x113   : > { %v695_v8 = vadd.f32 %v1225_v7, %v1223_v6 }
 0x115   : > { %696 = vadd.xlane.f32.xlu2 %v695_v8 }
 0x118   : > { %v629_v11 = vpop.f32.mrf.mxu0  ;;  %v649_v12 = vpop.f32.mrf.mxu1 }
 0x119   : > { %v673_v13 = vadd.f32 %v672_v9, %v629_v11  ;;  %v693_v14 = vadd.f32 %v692_v10, %v649_v12 }
 0x11b   : > { %v698_v15 = vadd.f32 %v693_v14, %v673_v13 }
 0x11d   : > { %699 = vadd.xlane.f32.xlu0 %v698_v15 }
 0x188   : > { %v697_v22 = vpop.xlane.xlu2 %696 }
 0x190   : > { %v700_v24 = vpop.xlane.xlu0 %699 }
 0x191   : > { %v701_v25 = vadd.f32 %v700_v24, %v697_v22 }
 0x193   : > { %v709_v26 = vmul.f32 %v708_v23, %v701_v25 }
 0x195   : > { %v717_v27 = vsub.f32 %v673_v13, %v709_v26  ;;  %v718_v28 = vsub.f32 %v693_v14, %v709_v26  ;;  %v710_v29 = vsub.f32 %v1223_v6, %v709_v26  ;;  %v711_v30 = vsub.f32 %v1225_v7, %v709_v26 }
 0x197   : > { %v719_v31 = vmul.f32 %v717_v27, %v717_v27  ;;  %v720_v32 = vmul.f32 %v718_v28, %v718_v28  ;;  %v712_v33 = vmul.f32 %v710_v29, %v710_v29  ;;  %v713_v34 = vmul.f32 %v711_v30, %v711_v30 }
 0x199   : > { %v721_v35 = vadd.f32 %v720_v32, %v719_v31  ;;  %v714_v36 = vadd.f32 %v713_v34, %v712_v33 }
 0x19b   : > { %722 = vadd.xlane.f32.xlu2 %v721_v35  ;;  %715 = vadd.xlane.f32.xlu1 %v714_v36 }
 0x20e   : > { %v723_v38 = vpop.xlane.xlu2 %722  ;;  %v716_v39 = vpop.xlane.xlu1 %715 }
 0x20f   : > { %v724_v40 = vadd.f32 %v723_v38, %v716_v39 }
 0x211   : > { %v725_v41 = vmul.f32 %v724_v40, %v708_v23 }
 0x213   : > { %v727_v42 = vadd.f32 1e-05, %v725_v41 }
 0x215   : > { %1035 = vrsqrt.f32 %v727_v42  ;;  %vm734_vm9 = vweird.f32 %v727_v42 }
 0x21b   : > { %v1036_v43 = vpop.eup %1035 }
 0x21c   : > { %v729_v44 = vmul.f32 %v1036_v43, %v727_v42  ;;  %vm735_vm8 = vweird.f32 %v1036_v43 }
 0x21d   : > { %vm736_vm10 = vmor %vm734_vm9, %vm735_vm8 }
 0x21e   : > { %v730_v45 = vmul.f32 %v1036_v43, %v729_v44 }
 0x220   : > { %v731_v46 = vmul.f32 0.5, %v730_v45 }
 0x222   : > { %v732_v47 = vsub.f32 1.5, %v731_v46 }
 0x224   : > { %v733_v49 = vmul.f32 %v1036_v43, %v732_v47 }
 0x226   : > { %v737_v50 = vsel %vm736_vm10, %v1036_v43, %v733_v49 }
 0x227   : > { %v738_v51 = vmul.f32 %v737_v50, %v726_v48 }
 0x229   : > { %744 = vperm.xlu2 %1031, %v738_v51   ;;  %v740_v53 = vmul.f32 %v738_v51, %v709_v26 }
 0x22b   : > { %v741_v54 = vsub.f32 %v739_v52, %v740_v53 }
 0x22d   : > { %751 = vperm.xlu0 %1032, %v741_v54  }
 0x283   : > { %v745_v55 = vpop.permute.xlu2 %744 }
 0x284   : > { %v747_v56 = vmul.f32 %v745_v55, %v1223_v6  ;;  %v748_v57 = vmul.f32 %v745_v55, %v1225_v7  ;;  %v760_v58 = vmul.f32 %v745_v55, %v673_v13  ;;  %v761_v59 = vmul.f32 %v745_v55, %v693_v14 }
 0x29f   : > { %v752_v60 = vpop.permute.xlu0 %751 }
 0x2a0   : > { %v754_v61 = vadd.f32 %v752_v60, %v747_v56  ;;  %v755_v62 = vadd.f32 %v752_v60, %v748_v57  ;;  %v762_v63 = vadd.f32 %v760_v58, %v752_v60  ;;  %v763_v0 = vadd.f32 %v761_v59, %v752_v60 }
 0x2a2   : > { %v756_v1 = vmax.f32 %v754_v61, 0.0  ;;  %v757_v2 = vmax.f32 %v755_v62, 0.0  ;;  %v764_v3 = vmax.f32 %v762_v63, 0.0  ;;  %v765_v4 = vmax.f32 %v763_v0, 0.0 }
 0x2a4   : > { %v758_v5 = vpack.c.bf16 %v757_v2, %v756_v1  ;;  %v766_v6 = vpack.c.bf16 %v765_v4, %v764_v3 }
 0x2a6   : > { %759 = vst [vmem:[%s395_s18] sm:$0xff] %v758_v5 }
 0x2a7   : > { %767 = vst [vmem:[%s400_s21] sm:$0xff] %v766_v6 }
 0x2a8 PF: > { %s19_s27 = sadd.s32 1, %s1043_s27  }
 0x2a9   : > { %p16_p4 = scmp.ge.s32.totalorder %s19_s27, 4  }
 0x2ab   :  { %18 = sbr.rel (!%p16_p4) target bundleno = 1 (0x1), region = 105 }

// kernel: _lambda_.17
= control target key start
LH: loop header
LB: loop body
LE: loop exit
PB: predicated region body
PF: predicated region fallthrough
CT: control target
= control target key end

     0   :  { %s808_s17 = smov 1   ;;  %v43_v19 = vlaneseq  ;;  %vm188_vm3 = vcmask 130048   ;;  %vm661_vm11 = vcmask 1040384   ;;  %vm663_vm12 = vcmask 1042434   ;;  %s1095_s0 = inlined_call_operand.vmem [shape: bf16[16,512], index: 0, kind: input, shape index: {}]   ;;  %s1096_s2 = inlined_call_operand.vmem [shape: f32[8,16], index: 2, kind: input, shape index: {}]   ;;  %s1097_s1 = inlined_call_operand.vmem [shape: f32[8,16], index: 1, kind: input, shape index: {}]   ;;  %s1098_s4 = inlined_call_operand.vmem [shape: f32[8,16], index: 4, kind: input, shape index: {}]   ;;  %s1099_s3 = inlined_call_operand.vmem [shape: f32[8,16], index: 3, kind: input, shape index: {}]   ;;  %s1100_s7 = inlined_call_operand.vmem [shape: f32[8,1], index: 7, kind: input, shape index: {}]   ;;  %s1101_s5 = inlined_call_operand.vmem [shape: f32[8,1], index: 5, kind: input, shape index: {}]   ;;  %s1102_s6 = inlined_call_operand.vmem [shape: f32[8,1], index: 6, kind: input, shape index: {}]   ;;  %s1103_s8 = inlined_call_operand.vmem [shape: f32[1,512], index: 8, kind: output, shape index: {0}]   ;;  %s1104_s9 = inlined_call_operand.vmem [shape: f32[1,512], index: 9, kind: output, shape index: {1}]  }
   0x1   :  { %v33_v0 = vld [vmem:[%s1095_s0 + $0x10] sm:$0xff]  ;;  %v34_v1 = vld [vmem:[%s1095_s0 + $0x18] sm:$0xff]  ;;  %v31_v6 = vld [vmem:[%s1095_s0] sm:$0xff]  ;;  %vm665_vm13 = vcmask 1041408  }
   0x2   :  { %v868_v2 = vunpack.c.h.bf16 %v33_v0  ;;  %v870_v3 = vunpack.c.l.bf16 %v34_v1  ;;  %v872_v4 = vunpack.c.l.bf16 %v33_v0  ;;  %v874_v5 = vunpack.c.h.bf16 %v34_v1  ;;  %v32_v7 = vld [vmem:[%s1095_s0 + $0x8] sm:$0xff]  ;;  %s809_s0 = smov 127   ;;  %v187_v50 = vld [vmem:[%s1096_s2] sm:$0xff] }
   0x3   :  { %v888_v11 = vunpack.c.h.bf16 %v31_v6  ;;  %v890_v12 = vunpack.c.l.bf16 %v32_v7  ;;  %v892_v13 = vunpack.c.l.bf16 %v31_v6  ;;  %v894_v14 = vunpack.c.h.bf16 %v32_v7 }
   0x4   :  { %v761_v8 = vpack.i.bf16 %v870_v3, %v868_v2  ;;  %v771_v9 = vpack.i.bf16 %v872_v4, %v874_v5  ;;  %v781_v10 = vpack.i.bf16 %v874_v5, %v870_v3  ;;  %v905_v20 = vand.u32 127, %v43_v19 }
   0x5   :  { %v766_v15 = vpack.i.bf16 %v890_v12, %v888_v11  ;;  %v776_v16 = vpack.i.bf16 %v892_v13, %v894_v14  ;;  %v786_v17 = vpack.i.bf16 %v890_v12, %v872_v4  ;;  %v796_v18 = vpack.i.bf16 %v888_v11, %v868_v2 }
   0x6   :  { %762 = vrot.lane.b32.xlu0 %v761_v8, %s808_s17  ;;  %772 = vrot.lane.b32.xlu1 %v771_v9, %s808_s17  ;;  %v46_v21 = vadd.s32 256, %v905_v20  ;;  %v52_v23 = vand.u32 255, %v905_v20  ;;  %vm116_vm0 = vcmp.lt.s32.totalorder %v905_v20, 1  ;;  %v47_v39 = vadd.s32 384, %v905_v20  ;;  %v186_v8 = vld [vmem:[%s1097_s1] sm:$0xff] }
   0x7   :  { %782 = vrot.lane.b32.xlu2 %v781_v10, %s809_s0  ;;  %v45_v45 = vadd.s32 128, %v905_v20  ;;  %vm161_vm4 = vcmp.lt.s32.totalorder %v905_v20, 127  ;;  %vm1075_vm14 = vcmp.lt.s32.totalorder %v43_v19, 512 }
   0x8   :  { %v66_v22 = vand.u32 255, %v46_v21  ;;  %vm916_vm2 = vcmp.ne.s32.totalorder %v52_v23, 0  ;;  %v73_v54 = vand.u32 255, %v47_v39 }
   0x9   :  { %v59_v55 = vand.u32 255, %v45_v45 }
   0xa   :  { %vm912_vm1 = vcmp.ne.s32.totalorder %v66_v22, 0  ;;  %vm962_vm5 = vcmp.ne.s32.totalorder %v73_v54, 255 }
   0xb   :  { %vm970_vm6 = vcmp.ne.s32.totalorder %v59_v55, 255 }
   0xe   :  { %767 = vrot.lane.b32.xlu0 %v766_v15, %s808_s17  ;;  %777 = vrot.lane.b32.xlu1 %v776_v16, %s808_s17 }
   0xf   :  { %787 = vrot.lane.b32.xlu2 %v786_v17, %s809_s0 }
  0x16   :  { %797 = vrot.lane.b32.xlu1 %v796_v18, %s809_s0  ;;  %792 = vrot.lane.b32.xlu0 %v776_v16, %s809_s0  ;;  %v356_v18 = vld [vmem:[%s1098_s4] sm:$0xff] }
  0x61   :  { %v909_v24 = vpop.permute.xlu2 %782 }
  0x62   :  { %v785_v51 = vunpack.i.h.bf16 %v909_v24  ;;  %v784_v52 = vunpack.i.l.bf16 %v909_v24 }
  0x64   :  { %v163_v56 = vsel %vm161_vm4, %v784_v52, %v785_v51 }
  0x69   :  { %v788_v44 = vpop.permute.xlu2 %787 }
  0x6a   :  { %v789_v53 = vunpack.i.l.bf16 %v788_v44  ;;  %v790_v61 = vunpack.i.h.bf16 %v788_v44 }
  0x6c   :  { %v169_v58 = vsel %vm161_vm4, %v785_v51, %v789_v53 }
  0x78   :  { %v763_v25 = vpop.permute.xlu0 %762  ;;  %v773_v26 = vpop.permute.xlu1 %772 }
  0x79   :  { %v765_v28 = vunpack.i.h.bf16 %v763_v25  ;;  %v764_v29 = vunpack.i.l.bf16 %v763_v25  ;;  %v775_v30 = vunpack.i.h.bf16 %v773_v26  ;;  %v774_v31 = vunpack.i.l.bf16 %v773_v26 }
  0x7b   :  { %v122_v33 = vsel %vm116_vm0, %v775_v30, %v764_v29  ;;  %v120_v34 = vsel %vm116_vm0, %v764_v29, %v765_v28  ;;  %v118_v35 = vsel %vm116_vm0, %v765_v28, %v774_v31  ;;  %v124_v36 = vsel %vm116_vm0, %v774_v31, %v775_v30 }
  0x7c   :  { %226 = vmatpush.msra.mxu1 %v122_v33  ;;  %728 = vmatpush.msk.msra.mxu2 %vm912_vm1, %v120_v34 }
  0x7d   :  { %266 = vmatpush.msra.mxu3 %v118_v35  ;;  %722 = vmatpush.msk.msra.mxu0 %vm916_vm2, %v124_v36 }
  0x80   :  { %v768_v37 = vpop.permute.xlu0 %767  ;;  %v778_v38 = vpop.permute.xlu1 %777 }
  0x81   :  { %v770_v40 = vunpack.i.h.bf16 %v768_v37  ;;  %v769_v41 = vunpack.i.l.bf16 %v768_v37  ;;  %v780_v42 = vunpack.i.h.bf16 %v778_v38  ;;  %v779_v43 = vunpack.i.l.bf16 %v778_v38 }
  0x83   :  { %v123_v46 = vsel %vm116_vm0, %v779_v43, %v780_v42  ;;  %v121_v47 = vsel %vm116_vm0, %v780_v42, %v769_v41  ;;  %v119_v48 = vsel %vm116_vm0, %v769_v41, %v770_v40  ;;  %v117_v49 = vsel %vm116_vm0, %v770_v40, %v779_v43 }
  0x84   :  { %724 = vmatpush.msk.msra.mxu0 %vm916_vm2, %v123_v46  ;;  %227 = vmatpush.msra.mxu1 %v121_v47  ;;  %v810_v43 = vmov 1024.0  }
  0x85   :  { %730 = vmatpush.msk.msra.mxu2 %vm912_vm1, %v119_v48  ;;  %267 = vmatpush.msra.mxu3 %v117_v49  ;;  %804 = vrcp.f32 %v810_v43 }
  0x86   :  { %725 = vmatmul.msk.f32.vlgmr.msra.gmra.mxu0 %vm188_vm3, %v187_v50  ;;  %726 = vmatmul.msk.f32.vlgmr.msra.gmra.mxu1 %vm188_vm3, %v187_v50 }
  0x87   :  { %731 = vmatmul.msk.f32.vlgmr.msra.gmra.mxu2 %vm188_vm3, %v187_v50  ;;  %732 = vmatmul.msk.f32.vlgmr.msra.gmra.mxu3 %vm188_vm3, %v187_v50 }
  0x88   :  { %329 = vmatpush.msrb.mxu2 %v870_v3  ;;  %349 = vmatpush.msrb.mxu3 %v874_v5  ;;  %v798_v57 = vpop.permute.xlu1 %797  ;;  %v793_v60 = vpop.permute.xlu0 %792 }
  0x89   :  { %v800_v62 = vunpack.i.h.bf16 %v798_v57  ;;  %v799_v63 = vunpack.i.l.bf16 %v798_v57  ;;  %289 = vmatpush.msrb.mxu0 %v872_v4  ;;  %309 = vmatpush.msrb.mxu1 %v868_v2  ;;  %v794_v0 = vunpack.i.l.bf16 %v793_v60  ;;  %v795_v1 = vunpack.i.h.bf16 %v793_v60 }
  0x8a   :  { %330 = vmatpush.msrb.mxu2 %v890_v12  ;;  %350 = vmatpush.msrb.mxu3 %v894_v14 }
  0x8b   :  { %v165_v7 = vsel %vm161_vm4, %v799_v63, %v784_v52  ;;  %v167_v9 = vsel %vm161_vm4, %v789_v53, %v799_v63  ;;  %310 = vmatpush.msrb.mxu1 %v888_v11  ;;  %290 = vmatpush.msrb.mxu0 %v892_v13  ;;  %v164_v10 = vsel %vm161_vm4, %v800_v62, %v790_v61  ;;  %v805_v44 = vpop.eup %804 }
  0x8c   :  { %414 = vmatpush.msra.mxu2 %v163_v56  ;;  %745 = vmatpush.msk.msra.mxu3 %vm962_vm5, %v169_v58  ;;  %v162_v15 = vsel %vm161_vm4, %v790_v61, %v794_v0  ;;  %v166_v16 = vsel %vm161_vm4, %v795_v1, %v800_v62  ;;  %v168_v17 = vsel %vm161_vm4, %v794_v0, %v795_v1  ;;  %v535_v45 = vmul.f32 1024.0, %v805_v44 }
  0x8d   :  { %739 = vmatpush.msk.msra.mxu1 %vm970_vm6, %v165_v7  ;;  %374 = vmatpush.msra.mxu0 %v167_v9  ;;  %vm539_vm7 = vweird.f32 %v805_v44 }
  0x8e   :  { %733 = vmatmul.msk.f32.vlgmr.msrb.gmra.mxu0 %vm188_vm3, %v186_v8  ;;  %734 = vmatmul.msk.f32.vlgmr.msrb.gmra.mxu1 %vm188_vm3, %v186_v8  ;;  %v536_v46 = vsub.f32 1.0, %v535_v45 }
  0x8f   :  { %735 = vmatmul.msk.f32.vlgmr.msrb.gmra.mxu2 %vm188_vm3, %v186_v8  ;;  %736 = vmatmul.msk.f32.vlgmr.msrb.gmra.mxu3 %vm188_vm3, %v186_v8 }
  0x90   :  { %741 = vmatpush.msk.msra.mxu1 %vm970_vm6, %v164_v10  ;;  %415 = vmatpush.msra.mxu2 %v162_v15  ;;  %v537_v47 = vmul.f32 %v805_v44, %v536_v46 }
  0x91   :  { %375 = vmatpush.msra.mxu0 %v166_v16  ;;  %747 = vmatpush.msk.msra.mxu3 %vm962_vm5, %v168_v17 }
  0x92   :  { %497 = vmatpush.msrb.mxu2 %v870_v3  ;;  %477 = vmatpush.msrb.mxu1 %v868_v2  ;;  %v355_v2 = vld [vmem:[%s1099_s3] sm:$0xff]  ;;  %v538_v48 = vadd.f32 %v805_v44, %v537_v47 }
  0x93   :  { %517 = vmatpush.msrb.mxu3 %v874_v5  ;;  %457 = vmatpush.msrb.mxu0 %v872_v4 }
  0x94   :  { %498 = vmatpush.msrb.mxu2 %v890_v12  ;;  %478 = vmatpush.msrb.mxu1 %v888_v11  ;;  %v540_v50 = vsel %vm539_vm7, %v805_v44, %v538_v48 }
  0x95   :  { %518 = vmatpush.msrb.mxu3 %v894_v14  ;;  %458 = vmatpush.msrb.mxu0 %v892_v13 }
  0x96   :  { %737 = vmatmul.msk.f32.vlgmr.msra.gmra.mxu0 %vm188_vm3, %v356_v18  ;;  %742 = vmatmul.msk.f32.vlgmr.msra.gmra.mxu1 %vm188_vm3, %v356_v18 }
  0x97   :  { %743 = vmatmul.msk.f32.vlgmr.msra.gmra.mxu2 %vm188_vm3, %v356_v18  ;;  %748 = vmatmul.msk.f32.vlgmr.msra.gmra.mxu3 %vm188_vm3, %v356_v18 }
  0x9e   :  { %749 = vmatmul.msk.f32.vlgmr.msrb.gmra.mxu0 %vm188_vm3, %v355_v2  ;;  %750 = vmatmul.msk.f32.vlgmr.msrb.gmra.mxu1 %vm188_vm3, %v355_v2 }
  0x9f   :  { %751 = vmatmul.msk.f32.vlgmr.msrb.gmra.mxu2 %vm188_vm3, %v355_v2  ;;  %752 = vmatmul.msk.f32.vlgmr.msrb.gmra.mxu3 %vm188_vm3, %v355_v2 }
 0x103   :  { %v209_v3 = vpop.f32.mrf.mxu0  ;;  %v229_v4 = vpop.f32.mrf.mxu1 }
 0x10a   :  { %v249_v5 = vpop.f32.mrf.mxu2  ;;  %v269_v11 = vpop.f32.mrf.mxu3 }
 0x10b   :  { %v292_v12 = vpop.f32.mrf.mxu0  ;;  %v312_v13 = vpop.f32.mrf.mxu1 }
 0x10c   :  { %v1025_v14 = vadd.f32 %v292_v12, %v209_v3  ;;  %v1027_v20 = vadd.f32 %v312_v13, %v229_v4  ;;  %v811_v3 = vmov 0  }
 0x10d   :  { %801 = vset.pattern.permute.xlu2 %v811_v3  ;;  %802 = vset.pattern.permute.xlu0 %v811_v3 }
 0x10e   :  { %v523_v23 = vadd.f32 %v1027_v20, %v1025_v14  ;;  %803 = vset.pattern.permute.xlu1 %v811_v3 }
 0x112   :  { %v332_v21 = vpop.f32.mrf.mxu2  ;;  %v352_v22 = vpop.f32.mrf.mxu3 }
 0x113   :  { %v1031_v24 = vadd.f32 %v332_v21, %v249_v5  ;;  %v377_v25 = vpop.f32.mrf.mxu0  ;;  %v397_v26 = vpop.f32.mrf.mxu1  ;;  %v1033_v27 = vadd.f32 %v352_v22, %v269_v11  ;;  %v620_v5 = vld [vmem:[%s1100_s7] sm:$0xff] }
 0x115   :  { %v524_v28 = vadd.f32 %v523_v23, %v1031_v24 }
 0x117   :  { %v525_v29 = vadd.f32 %v524_v28, %v1033_v27 }
 0x119   :  { %526 = vadd.xlane.f32.xlu2 %v525_v29  ;;  %v570_v29 = vld [vmem:[%s1101_s5] sm:$0xff] }
 0x11a   :  { %v417_v30 = vpop.f32.mrf.mxu2  ;;  %v437_v31 = vpop.f32.mrf.mxu3 }
 0x11b   :  { %v460_v32 = vpop.f32.mrf.mxu0  ;;  %v480_v33 = vpop.f32.mrf.mxu1 }
 0x11c   :  { %v1037_v34 = vadd.f32 %v460_v32, %v377_v25  ;;  %v1039_v35 = vadd.f32 %v480_v33, %v397_v26  ;;  %v583_v33 = vld [vmem:[%s1102_s6] sm:$0xff] }
 0x11e   :  { %v528_v38 = vadd.f32 %v1039_v35, %v1037_v34 }
 0x122   :  { %v500_v36 = vpop.f32.mrf.mxu2  ;;  %v520_v37 = vpop.f32.mrf.mxu3 }
 0x123   :  { %v1043_v39 = vadd.f32 %v500_v36, %v417_v30  ;;  %v1045_v40 = vadd.f32 %v520_v37, %v437_v31 }
 0x125   :  { %v529_v41 = vadd.f32 %v528_v38, %v1043_v39 }
 0x127   :  { %v530_v42 = vadd.f32 %v529_v41, %v1045_v40 }
 0x129   :  { %531 = vadd.xlane.f32.xlu0 %v530_v42 }
 0x18c   :  { %v527_v49 = vpop.xlane.xlu2 %526 }
 0x19c   :  { %v532_v51 = vpop.xlane.xlu0 %531 }
 0x19d   :  { %v533_v52 = vadd.f32 %v532_v51, %v527_v49 }
 0x19f   :  { %v541_v53 = vmul.f32 %v540_v50, %v533_v52 }
 0x1a1   :  { %v555_v54 = vsub.f32 %v1037_v34, %v541_v53  ;;  %v556_v55 = vsub.f32 %v1039_v35, %v541_v53  ;;  %v557_v56 = vsub.f32 %v1043_v39, %v541_v53  ;;  %v542_v57 = vsub.f32 %v1025_v14, %v541_v53 }
 0x1a2   :  { %v543_v58 = vsub.f32 %v1027_v20, %v541_v53  ;;  %v544_v59 = vsub.f32 %v1031_v24, %v541_v53  ;;  %v558_v60 = vsub.f32 %v1045_v40, %v541_v53  ;;  %v545_v63 = vsub.f32 %v1033_v27, %v541_v53 }
 0x1a3   :  { %v559_v61 = vmul.f32 %v555_v54, %v555_v54  ;;  %v560_v62 = vmul.f32 %v556_v55, %v556_v55  ;;  %v546_v0 = vmul.f32 %v542_v57, %v542_v57  ;;  %v561_v6 = vmul.f32 %v557_v56, %v557_v56 }
 0x1a4   :  { %v547_v1 = vmul.f32 %v543_v58, %v543_v58  ;;  %v548_v8 = vmul.f32 %v544_v59, %v544_v59  ;;  %v562_v10 = vmul.f32 %v558_v60, %v558_v60  ;;  %v549_v16 = vmul.f32 %v545_v63, %v545_v63 }
 0x1a5   :  { %v563_v7 = vadd.f32 %v560_v62, %v559_v61 }
 0x1a6   :  { %v550_v9 = vadd.f32 %v547_v1, %v546_v0 }
 0x1a7   :  { %v564_v15 = vadd.f32 %v563_v7, %v561_v6 }
 0x1a8   :  { %v551_v17 = vadd.f32 %v550_v9, %v548_v8 }
 0x1a9   :  { %v565_v18 = vadd.f32 %v564_v15, %v562_v10 }
 0x1aa   :  { %v552_v2 = vadd.f32 %v551_v17, %v549_v16 }
 0x1ab   :  { %566 = vadd.xlane.f32.xlu2 %v565_v18 }
 0x1ac   :  { %553 = vadd.xlane.f32.xlu1 %v552_v2 }
 0x1c5   :  { %623 = vperm.xlu1 %803, %v620_v5  }
 0x21e   :  { %v567_v4 = vpop.xlane.xlu2 %566 }
 0x21f   :  { %v554_v11 = vpop.xlane.xlu1 %553 }
 0x220   :  { %v568_v12 = vadd.f32 %v567_v4, %v554_v11 }
 0x222   :  { %v569_v13 = vmul.f32 %v568_v12, %v540_v50 }
 0x224   :  { %v571_v21 = vadd.f32 1e-05, %v569_v13 }
 0x226   :  { %806 = vrsqrt.f32 %v571_v21  ;;  %vm578_vm9 = vweird.f32 %v571_v21 }
 0x22c   :  { %v807_v22 = vpop.eup %806 }
 0x22d   :  { %v573_v23 = vmul.f32 %v807_v22, %v571_v21  ;;  %vm579_vm8 = vweird.f32 %v807_v22 }
 0x22e   :  { %vm580_vm10 = vmor %vm578_vm9, %vm579_vm8 }
 0x22f   :  { %v574_v25 = vmul.f32 %v807_v22, %v573_v23 }
 0x231   :  { %v575_v26 = vmul.f32 0.5, %v574_v25 }
 0x233   :  { %v576_v28 = vsub.f32 1.5, %v575_v26 }
 0x235   :  { %v577_v30 = vmul.f32 %v807_v22, %v576_v28 }
 0x237   :  { %v581_v31 = vsel %vm580_vm10, %v807_v22, %v577_v30 }
 0x238   :  { %v582_v32 = vmul.f32 %v581_v31, %v570_v29 }
 0x23a   :  { %588 = vperm.xlu2 %801, %v582_v32   ;;  %v584_v36 = vmul.f32 %v582_v32, %v541_v53 }
 0x23c   :  { %v585_v37 = vsub.f32 %v583_v33, %v584_v36 }
 0x23e   :  { %597 = vperm.xlu0 %802, %v585_v37  }
 0x294   :  { %v589_v38 = vpop.permute.xlu2 %588 }
 0x295   :  { %v591_v41 = vmul.f32 %v589_v38, %v1025_v14  ;;  %v592_v42 = vmul.f32 %v589_v38, %v1027_v20  ;;  %v593_v43 = vmul.f32 %v589_v38, %v1031_v24  ;;  %v594_v44 = vmul.f32 %v589_v38, %v1033_v27  ;;  %v624_v24 = vpop.permute.xlu1 %623 }
 0x296   :  { %v608_v45 = vmul.f32 %v589_v38, %v1037_v34  ;;  %v609_v46 = vmul.f32 %v589_v38, %v1039_v35  ;;  %v610_v47 = vmul.f32 %v589_v38, %v1043_v39  ;;  %v611_v48 = vmul.f32 %v589_v38, %v1045_v40 }
 0x2b0   :  { %v598_v49 = vpop.permute.xlu0 %597 }
 0x2b1   :  { %v600_v50 = vadd.f32 %v598_v49, %v591_v41  ;;  %v601_v51 = vadd.f32 %v598_v49, %v592_v42  ;;  %v602_v52 = vadd.f32 %v598_v49, %v593_v43  ;;  %v603_v53 = vadd.f32 %v598_v49, %v594_v44 }
 0x2b2   :  { %v612_v14 = vadd.f32 %v608_v45, %v598_v49  ;;  %v613_v54 = vadd.f32 %v609_v46, %v598_v49  ;;  %v614_v20 = vadd.f32 %v610_v47, %v598_v49  ;;  %v615_v55 = vadd.f32 %v611_v48, %v598_v49 }
 0x2b3   :  { %v604_v56 = vmax.f32 %v600_v50, 0.0  ;;  %v605_v27 = vmax.f32 %v601_v51, 0.0  ;;  %v606_v57 = vmax.f32 %v602_v52, 0.0  ;;  %v607_v34 = vmax.f32 %v603_v53, 0.0 }
 0x2b4   :  { %v616_v58 = vmax.f32 %v612_v14, 0.0  ;;  %v617_v35 = vmax.f32 %v613_v54, 0.0  ;;  %v618_v59 = vmax.f32 %v614_v20, 0.0  ;;  %v619_v39 = vmax.f32 %v615_v55, 0.0 }
 0x2b5   :  { %v626_v60 = vmul.f32 %v624_v24, %v604_v56  ;;  %v627_v40 = vmul.f32 %v624_v24, %v605_v27  ;;  %v628_v61 = vmul.f32 %v624_v24, %v606_v57  ;;  %v629_v62 = vmul.f32 %v624_v24, %v607_v34 }
 0x2b6   :  { %v673_v63 = vmul.f32 %v624_v24, %v616_v58  ;;  %v674_v0 = vmul.f32 %v624_v24, %v617_v35  ;;  %v675_v1 = vmul.f32 %v624_v24, %v618_v59  ;;  %v676_v6 = vmul.f32 %v624_v24, %v619_v39 }
 0x2b7   :  { %v630_v7 = vrot.slane %v626_v60, 4  ;;  %v636_v8 = vrot.slane %v627_v40, 4  ;;  %v642_v9 = vrot.slane %v628_v61, 4  ;;  %v648_v10 = vrot.slane %v629_v62, 4 }
 0x2b8   :  { %v677_v15 = vrot.slane %v673_v63, 4  ;;  %v683_v16 = vrot.slane %v674_v0, 4  ;;  %v689_v17 = vrot.slane %v675_v1, 4  ;;  %v695_v18 = vrot.slane %v676_v6, 4 }
 0x2b9   :  { %v631_v2 = vadd.f32 %v630_v7, %v626_v60  ;;  %v637_v3 = vadd.f32 %v636_v8, %v627_v40  ;;  %v643_v4 = vadd.f32 %v642_v9, %v628_v61  ;;  %v649_v5 = vadd.f32 %v648_v10, %v629_v62 }
 0x2ba   :  { %v678_v11 = vadd.f32 %v677_v15, %v673_v63  ;;  %v684_v12 = vadd.f32 %v683_v16, %v674_v0  ;;  %v690_v13 = vadd.f32 %v689_v17, %v675_v1  ;;  %v696_v21 = vadd.f32 %v695_v18, %v676_v6 }
 0x2bb   :  { %v632_v22 = vrot.slane %v631_v2, 2  ;;  %v638_v23 = vrot.slane %v637_v3, 2  ;;  %v644_v25 = vrot.slane %v643_v4, 2  ;;  %v650_v26 = vrot.slane %v649_v5, 2 }
 0x2bc   :  { %v679_v28 = vrot.slane %v678_v11, 2  ;;  %v685_v29 = vrot.slane %v684_v12, 2  ;;  %v691_v30 = vrot.slane %v690_v13, 2  ;;  %v697_v31 = vrot.slane %v696_v21, 2 }
 0x2bd   :  { %v633_v32 = vadd.f32 %v632_v22, %v631_v2  ;;  %v639_v33 = vadd.f32 %v638_v23, %v637_v3  ;;  %v645_v36 = vadd.f32 %v644_v25, %v643_v4  ;;  %v651_v37 = vadd.f32 %v650_v26, %v649_v5 }
 0x2be   :  { %v680_v38 = vadd.f32 %v679_v28, %v678_v11  ;;  %v686_v41 = vadd.f32 %v685_v29, %v684_v12  ;;  %v692_v42 = vadd.f32 %v691_v30, %v690_v13  ;;  %v698_v43 = vadd.f32 %v697_v31, %v696_v21 }
 0x2bf   :  { %v634_v44 = vrot.slane %v633_v32, 1  ;;  %v640_v45 = vrot.slane %v639_v33, 1  ;;  %v646_v46 = vrot.slane %v645_v36, 1  ;;  %v652_v47 = vrot.slane %v651_v37, 1 }
 0x2c0   :  { %v681_v48 = vrot.slane %v680_v38, 1  ;;  %v687_v49 = vrot.slane %v686_v41, 1  ;;  %v693_v50 = vrot.slane %v692_v42, 1  ;;  %v699_v51 = vrot.slane %v698_v43, 1 }
 0x2c1   :  { %v641_v52 = vadd.f32 %v640_v45, %v639_v33  ;;  %v647_v53 = vadd.f32 %v646_v46, %v645_v36  ;;  %v653_v14 = vadd.f32 %v652_v47, %v651_v37  ;;  %v635_v56 = vadd.f32 %v634_v44, %v633_v32 }
 0x2c2   :  { %v688_v20 = vadd.f32 %v687_v49, %v686_v41  ;;  %v694_v55 = vadd.f32 %v693_v50, %v692_v42  ;;  %v700_v24 = vadd.f32 %v699_v51, %v698_v43  ;;  %v682_v58 = vadd.f32 %v681_v48, %v680_v38 }
 0x2c3   :  { %v658_v27 = vrot.slane %v641_v52, 7  ;;  %v659_v57 = vrot.slane %v647_v53, 6  ;;  %v660_v34 = vrot.slane %v653_v14, 5 }
 0x2c4   :  { %v705_v35 = vrot.slane %v688_v20, 7  ;;  %v706_v59 = vrot.slane %v694_v55, 6  ;;  %v707_v39 = vrot.slane %v700_v24, 5 }
 0x2c5   :  { %v662_v60 = vsel %vm661_vm11, %v635_v56, %v658_v27  ;;  %v664_v40 = vsel %vm663_vm12, %v659_v57, %v660_v34 }
 0x2c6   :  { %v666_v19 = vsel %vm665_vm13, %v662_v60, %v664_v40  ;;  %v708_v61 = vsel %vm661_vm11, %v682_v58, %v705_v35  ;;  %v709_v62 = vsel %vm663_vm12, %v706_v59, %v707_v39 }
 0x2c7   :  { %672 = vst.msk [vmem:[%s1103_s8] sm:$0xf] %vm1075_vm14, %v666_v19  ;;  %v710_v63 = vsel %vm665_vm13, %v708_v61, %v709_v62 }
 0x2c8   :  { %712 = vst.msk [vmem:[%s1104_s9] sm:$0xf] %vm1075_vm14, %v710_v63 }

</bundles_post_ra>
